<compile_context>
chip_gen: v6e
topology: v6e:2x2x1
jax: 0.10.0
libtpu: 0.0.40
codegen_flags: <defaults>
</compile_context>

<pallas_src>
import math
from functools import partial

import jax
import jax.numpy as jnp
from jax import lax
from jax.experimental import pallas as pl
from jax.experimental.pallas import tpu as pltpu

# ---------------- model dims (small synthetic version of DVMNet) ----------------
B = 2
S = 4                       # spatial_size      (14 in the original)
P = 2                       # patch_size        (16 in the original)
C_IN = 16                   # in_channels       (768)
VC = 8                      # volume_channels   (64)
C_DEC = (VC + 1) * S        # decode_channels = 36   (910)
C_EMB = VC * S              # embed_channels  = 32   (896)
HEAD_OUT = P * P * 4        # prediction head out = 16 (1024)
N_TOK = S * S               # tokens per image = 16  (196)
N3 = S ** 3                 # voxels = 64            (2744)
IMG = S * P                 # image side = 8         (224)
TEMP_MASK = 1.0
LN_EPS = 1e-5               # torch nn.LayerNorm default (prediction_head)
LANE = 128                  # lane-dense output width


def _full_spec(shape):
    nd = len(shape)
    return pl.BlockSpec(shape, lambda i, _nd=nd: (0,) * _nd)


def _pad_last(a, n):
    """Zero-pad the last dim of a (2D) array up to n."""
    return jnp.pad(a, ((0, 0), (0, n - a.shape[-1])))


# ---- kernel 1: fused patch-embed + encoder_embed + LayerNorm + prediction head ----
#   emb  = (x @ Wp + bp) @ We + be                  (rows, C_DEC)  [lane-padded to 128]
#   feat = emb[:, :C_EMB]                            (== the decode feat, see forward)
#   pred = LN(feat) * g + b  @ Wh + bh              (rows, HEAD_OUT) [lane-padded]
def _encode_head_kernel(x_ref, pw_ref, pb_ref, ew_ref, eb_ref,
                        g_ref, beta_ref, hw_ref, hb_ref,
                        emb_ref, pred_ref):
    h = jnp.dot(x_ref[...], pw_ref[...],
                preferred_element_type=jnp.float32) + pb_ref[...]
    emb = jnp.dot(h, ew_ref[...],
                  preferred_element_type=jnp.float32) + eb_ref[...]
    emb_ref[...] = emb

    feat = emb[:, :C_EMB]                               # first C_EMB real channels
    mu = jnp.mean(feat, axis=-1, keepdims=True)
    var = jnp.mean((feat - mu) ** 2, axis=-1, keepdims=True)
    xn = (feat - mu) * lax.rsqrt(var + LN_EPS)
    xn = xn * g_ref[...] + beta_ref[...]
    pred_ref[...] = jnp.dot(xn, hw_ref[...],
                            preferred_element_type=jnp.float32) + hb_ref[...]


def encode_and_head(x2d, pw, pb, ew, eb, ln_g, ln_b, hw, hb):
    """x2d: (M, patch_dim) -> (emb (M, C_DEC), pred (M, HEAD_OUT))."""
    M, K = x2d.shape
    C1 = pw.shape[1]
    ew_p = _pad_last(ew, LANE)                       # (C_IN, 128)
    eb_p = _pad_last(eb.reshape(1, -1), LANE)        # (1, 128)
    hw_p = _pad_last(hw, LANE)                       # (C_EMB, 128)
    hb_p = _pad_last(hb.reshape(1, -1), LANE)        # (1, 128)
    emb, pred = pl.pallas_call(
        _encode_head_kernel,
        out_shape=(jax.ShapeDtypeStruct((M, LANE), jnp.float32),
                   jax.ShapeDtypeStruct((M, LANE), jnp.float32)),
        grid=(1,),
        in_specs=[_full_spec((M, K)),
                  _full_spec((K, C1)), _full_spec((1, C1)),
                  _full_spec((C1, LANE)), _full_spec((1, LANE)),
                  _full_spec((1, C_EMB)), _full_spec((1, C_EMB)),
                  _full_spec((C_EMB, LANE)), _full_spec((1, LANE))],
        out_specs=(_full_spec((M, LANE)), _full_spec((M, LANE))),
    )(x2d, pw, pb.reshape(1, C1), ew_p, eb_p,
      ln_g.reshape(1, C_EMB), ln_b.reshape(1, C_EMB), hw_p, hb_p)
    return emb[:, :C_DEC], pred[:, :HEAD_OUT]


# ------ kernel 2: SVDHead_Mask hot path (transport=None, mask='both') ------
# Packed side operand rows (one (B, 8, N3) array):
#   [ xyz(3) | tgt_depth_mask(1) | tgt_img_mask(1) | src_depth_mask(1) | src_img_mask(1) | 0 ]
def _svd_head_kernel(set_ref, te_ref, pk_ref, h_ref, cmean_ref):
    se_t = set_ref[0]                    # (N, C) src embedding, token-major
    te = te_ref[0]                       # (C, N) tgt embedding
    d_k = te.shape[0]
    # scores = softmax(src_emb^T @ tgt_emb / sqrt(d_k), dim=-1)
    logits = jnp.dot(se_t, te, preferred_element_type=jnp.float32) * (1.0 / math.sqrt(d_k))
    m = jnp.max(logits, axis=-1, keepdims=True)
    p = jnp.exp(logits - m)
    inv_den = pl.reciprocal(jnp.sum(p, axis=-1, keepdims=True), approx=True)
    scores = p * inv_den                                          # (N_src, N_tgt)

    pack = pk_ref[0]                     # (8, N3)
    # Single 8-row MXU push: pack @ scores^T  (rows 5..7 are dead weight, same push cost)
    corr = lax.dot_general(pack, scores, (((1,), (1,)), ((), ())),
                           preferred_element_type=jnp.float32)    # (8, N_src)
    src_corr = corr[0:3]                 # (3, N)  = tgt_xyz @ scores^T
    tdm = corr[3:4]                      # (1, N)  tgt depth mask transported
    tim = corr[4:5]                      # (1, N)  tgt img  mask transported

    src = pack[0:3]                      # (3, N)  src xyz (same grid as tgt)
    sdm = pack[5:6]                      # (1, N)  src depth mask (raw)
    sim = pack[6:7]                      # (1, N)  src img  mask (raw)

    img_mask = 0.5 * (sim + tim)
    depth_mask = 0.5 * (sdm + tdm)
    mask = (jax.nn.sigmoid(depth_mask / TEMP_MASK)
            * jax.nn.sigmoid(img_mask / TEMP_MASK))
    mmin = jnp.min(mask, axis=-1, keepdims=True)
    mmax = jnp.max(mask, axis=-1, keepdims=True)
    mask = (mask - mmin) * pl.reciprocal(jnp.maximum(mmax - mmin, 1e-6), approx=True)

    # Unweighted centering (matches the PyTorch reference exactly).
    src_mean = jnp.mean(src, axis=-1, keepdims=True)
    src_c = src - src_mean
    corr_mean = jnp.mean(src_corr, axis=-1, keepdims=True)
    corr_c = src_corr - corr_mean

    weighted = src_c * mask                                       # src_centered @ diag(mask)
    h = lax.dot_general(weighted, corr_c, (((1,), (1,)), ((), ())),
                        preferred_element_type=jnp.float32)       # (3, 3)
    h_ref[0] = h
    cmean_ref[0] = corr_mean


def svd_head_pallas(src_emb_t, tgt_emb, pack):
    Bsz, _, C = src_emb_t.shape
    in_specs = [
        pl.BlockSpec((1, N3, C), lambda b: (b, 0, 0)),
        pl.BlockSpec((1, C, N3), lambda b: (b, 0, 0)),
        pl.BlockSpec((1, 8, N3), lambda b: (b, 0, 0)),
    ]
    out_specs = (pl.BlockSpec((1, 3, 3), lambda b: (b, 0, 0)),
                 pl.BlockSpec((1, 3, 1), lambda b: (b, 0, 0)))
    out_shapes = (jax.ShapeDtypeStruct((Bsz, 3, 3), jnp.float32),
                  jax.ShapeDtypeStruct((Bsz, 3, 1), jnp.float32))
    return pl.pallas_call(
        _svd_head_kernel,
        out_shape=out_shapes,
        grid=(Bsz,),
        in_specs=in_specs,
        out_specs=out_specs,
        compiler_params=pltpu.CompilerParams(dimension_semantics=("parallel",)),
    )(src_emb_t, tgt_emb, pack)


# ---------------- JAX glue ----------------
def point_coordinates(D, H, W):
    gz, gy, gx = jnp.meshgrid(jnp.arange(D), jnp.arange(H), jnp.arange(W),
                              indexing="ij")
    return jnp.stack((gx, gy, gz), axis=0).reshape(3, -1).astype(jnp.float32)


def patchify(img):
    # img: (B, 3, IMG, IMG) NCHW -> (B, N_TOK, 3*P*P)
    x = img.reshape(B, 3, S, P, S, P)
    x = x.transpose(0, 2, 4, 1, 3, 5)
    return x.reshape(B, N_TOK, 3 * P * P)


def init_params(key):
    ks = jax.random.split(key, 5)
    patch_dim = 3 * P * P
    return {
        "patch_w": jax.random.normal(ks[0], (patch_dim, C_IN), jnp.float32) / math.sqrt(patch_dim),
        "patch_b": jnp.zeros((C_IN,), jnp.float32),
        "enc_w": jax.random.normal(ks[1], (C_IN, C_DEC), jnp.float32) / math.sqrt(C_IN),
        "enc_b": jax.random.normal(ks[2], (C_DEC,), jnp.float32) * 0.01,
        "ln_g": jnp.ones((C_EMB,), jnp.float32),
        "ln_b": jnp.zeros((C_EMB,), jnp.float32),
        "head_w": jax.random.normal(ks[3], (C_EMB, HEAD_OUT), jnp.float32) / math.sqrt(C_EMB),
        "head_b": jax.random.normal(ks[4], (HEAD_OUT,), jnp.float32) * 0.01,
    }


def dvmnet_forward(params, img_src, img_tgt):
    # TODO(synk): CroCoNet backbone + cross-attention DecoderBlocks require an external
    # checkpoint / classes not provided; replaced by a deterministic patch-embed linear.
    # TODO(synk): DecoderBlock_Monocular dec_blocks class not provided; treated as identity,
    # so the decode feat equals emb[:, :, :C_EMB] and is fused into the same kernel.
    x = jnp.concatenate([patchify(img_src), patchify(img_tgt)], axis=0)      # (2B, N_TOK, pd)
    x2d = x.reshape(2 * B * N_TOK, -1)
    emb2d, pred2d = encode_and_head(
        x2d, params["patch_w"], params["patch_b"], params["enc_w"], params["enc_b"],
        params["ln_g"], params["ln_b"], params["head_w"], params["head_b"])
    emb = emb2d.reshape(2 * B, N_TOK, C_DEC)                                 # (2B, N_TOK, C_DEC)
    pred = pred2d.reshape(2 * B, N_TOK, HEAD_OUT)                            # (2B, N_TOK, 4*P*P)

    emb_t = emb.transpose(0, 2, 1)                                           # (2B, C_DEC, N_TOK)
    vol = emb_t.reshape(2 * B, VC + 1, S, S, S)
    occupancy = vol[:, VC:].reshape(2 * B, 1, N3)                            # (2B, 1, N3)
    embed = vol[:, :VC].reshape(2 * B, VC, N3)                               # (2B, VC, N3)

    pred_src, pred_tgt = pred[:B], pred[B:]
    occupancy_src, occupancy_tgt = occupancy[:B], occupancy[B:]
    embed_src, embed_tgt = embed[:B], embed[B:]

    img_mask = pred.reshape(2 * B, S, S, -1, VC)[..., -1].mean(axis=-1)      # (2B, S, S)
    img_mask = jnp.broadcast_to(img_mask[:, None], (2 * B, S, S, S)).reshape(2 * B, 1, N3)
    img_mask_src, img_mask_tgt = img_mask[:B], img_mask[B:]

    # xyz grid (normalized to [-1, 1]; original hardcodes 6.5 = (14-1)/2)
    center = (S - 1) / 2.0
    xyz = (point_coordinates(S, S, S) - center) / center
    xyz_b = jnp.broadcast_to(xyz[None], (B, 3, N3))

    # Pack ALL small side operands into one (B, 8, N3) array (one DMA, one 8-row MXU matmul).
    zeros1 = jnp.zeros((B, 1, N3), jnp.float32)
    pack = jnp.concatenate([xyz_b, occupancy_tgt, img_mask_tgt,
                            occupancy_src, img_mask_src, zeros1], axis=1)    # (B, 8, N3)
    src_emb_t = embed_src.transpose(0, 2, 1)                                 # (B, N3, VC)

    H, corr_mean = svd_head_pallas(src_emb_t, embed_tgt, pack)

    # torch.svd path: H = U diag(S) V^T ; R = V U^T with reflection fix.
    u, s, vh = jnp.linalg.svd(H)
    v = jnp.swapaxes(vh, -1, -2)
    ut = jnp.swapaxes(u, -1, -2)
    r = v @ ut
    det = jnp.linalg.det(r)
    flip = jnp.where(det < 0, -1.0, 1.0)
    scale = jnp.stack([jnp.ones_like(flip), jnp.ones_like(flip), flip], axis=-1)
    R = (v * scale[:, None, :]) @ ut
    src_mean = jnp.mean(xyz_b, axis=-1, keepdims=True)                       # (B, 3, 1)
    t = (-R @ src_mean + corr_mean).reshape(B, 3)
    return pred_src, pred_tgt, occupancy_src, occupancy_tgt, R, t


if __name__ == "__main__":
    key = jax.random.PRNGKey(0)
    kp, k1, k2 = jax.random.split(key, 3)
    params = init_params(kp)
    img_src = jax.random.normal(k1, (B, 3, IMG, IMG), jnp.float32)
    img_tgt = jax.random.normal(k2, (B, 3, IMG, IMG), jnp.float32)

    outs = jax.jit(partial(dvmnet_forward, params))(img_src, img_tgt)
    outs = jax.block_until_ready(outs)

    pred_src, pred_tgt, occ_src, occ_tgt, R, t = outs
    assert pred_src.shape == (B, N_TOK, HEAD_OUT)
    assert pred_tgt.shape == (B, N_TOK, HEAD_OUT)
    assert occ_src.shape == (B, 1, N3) and occ_tgt.shape == (B, 1, N3)
    assert R.shape == (B, 3, 3) and t.shape == (B, 3)
    assert bool(jnp.all(jnp.isfinite(R))) and bool(jnp.all(jnp.isfinite(t)))
    print("KERNEL_OK")
</pallas_src>

<mosaic_0001>
module attributes {stable_mosaic.version = 11 : i64} {
  func.func @_encode_head_kernel(%arg0: i32, %arg1: memref<64x12xf32, #tpu.memory_space<vmem>>, %arg2: memref<12x16xf32, #tpu.memory_space<vmem>>, %arg3: memref<1x16xf32, #tpu.memory_space<vmem>>, %arg4: memref<16x128xf32, #tpu.memory_space<vmem>>, %arg5: memref<1x128xf32, #tpu.memory_space<vmem>>, %arg6: memref<1x32xf32, #tpu.memory_space<vmem>>, %arg7: memref<1x32xf32, #tpu.memory_space<vmem>>, %arg8: memref<32x128xf32, #tpu.memory_space<vmem>>, %arg9: memref<1x128xf32, #tpu.memory_space<vmem>>, %arg10: memref<64x128xf32, #tpu.memory_space<vmem>>, %arg11: memref<64x128xf32, #tpu.memory_space<vmem>>) attributes {dimension_semantics = [#tpu.dimension_semantics<arbitrary>], iteration_bounds = array<i64: 1>, scalar_prefetch = 0 : i64, scratch_operands = 0 : i64, tpu.core_type = #tpu.core_type<tc>, window_params = [{pipeline_mode = #tpu.pipeline_mode<synchronous>, transform_indices = @transform_0, window_bounds = array<i64: 64, 12>}, {pipeline_mode = #tpu.pipeline_mode<synchronous>, transform_indices = @transform_1, window_bounds = array<i64: 12, 16>}, {pipeline_mode = #tpu.pipeline_mode<synchronous>, transform_indices = @transform_2, window_bounds = array<i64: 1, 16>}, {pipeline_mode = #tpu.pipeline_mode<synchronous>, transform_indices = @transform_3, window_bounds = array<i64: 16, 128>}, {pipeline_mode = #tpu.pipeline_mode<synchronous>, transform_indices = @transform_4, window_bounds = array<i64: 1, 128>}, {pipeline_mode = #tpu.pipeline_mode<synchronous>, transform_indices = @transform_5, window_bounds = array<i64: 1, 32>}, {pipeline_mode = #tpu.pipeline_mode<synchronous>, transform_indices = @transform_6, window_bounds = array<i64: 1, 32>}, {pipeline_mode = #tpu.pipeline_mode<synchronous>, transform_indices = @transform_7, window_bounds = array<i64: 32, 128>}, {pipeline_mode = #tpu.pipeline_mode<synchronous>, transform_indices = @transform_8, window_bounds = array<i64: 1, 128>}, {pipeline_mode = #tpu.pipeline_mode<synchronous>, transform_indices = @transform_9, window_bounds = array<i64: 64, 128>}, {pipeline_mode = #tpu.pipeline_mode<synchronous>, transform_indices = @transform_10, window_bounds = array<i64: 64, 128>}]} {
    %c0 = arith.constant 0 : index
    %c0_0 = arith.constant 0 : index
    %0 = vector.load %arg1[%c0, %c0_0] : memref<64x12xf32, #tpu.memory_space<vmem>>, vector<64x12xf32>
    %c0_1 = arith.constant 0 : index
    %c0_2 = arith.constant 0 : index
    %1 = vector.load %arg2[%c0_1, %c0_2] : memref<12x16xf32, #tpu.memory_space<vmem>>, vector<12x16xf32>
    %cst = arith.constant dense<0.000000e+00> : vector<64x16xf32>
    %2 = tpu.matmul %0, %1, %cst {dimension_numbers = #tpu.dot_dimension_numbers<[1], [0], [0], [1], [0, 0, 1, 1], [], []>} : vector<64x12xf32>, vector<12x16xf32>, vector<64x16xf32> -> vector<64x16xf32>
    %c0_3 = arith.constant 0 : index
    %c0_4 = arith.constant 0 : index
    %3 = vector.load %arg3[%c0_3, %c0_4] : memref<1x16xf32, #tpu.memory_space<vmem>>, vector<1x16xf32>
    %4 = vector.broadcast %3 : vector<1x16xf32> to vector<64x16xf32>
    %5 = arith.addf %2, %4 : vector<64x16xf32>
    %c0_5 = arith.constant 0 : index
    %c0_6 = arith.constant 0 : index
    %6 = vector.load %arg4[%c0_5, %c0_6] : memref<16x128xf32, #tpu.memory_space<vmem>>, vector<16x128xf32>
    %cst_7 = arith.constant dense<0.000000e+00> : vector<64x128xf32>
    %7 = tpu.matmul %5, %6, %cst_7 {dimension_numbers = #tpu.dot_dimension_numbers<[1], [0], [0], [1], [0, 0, 1, 1], [], []>} : vector<64x16xf32>, vector<16x128xf32>, vector<64x128xf32> -> vector<64x128xf32>
    %c0_8 = arith.constant 0 : index
    %c0_9 = arith.constant 0 : index
    %8 = vector.load %arg5[%c0_8, %c0_9] : memref<1x128xf32, #tpu.memory_space<vmem>>, vector<1x128xf32>
    %9 = vector.broadcast %8 : vector<1x128xf32> to vector<64x128xf32>
    %10 = arith.addf %7, %9 : vector<64x128xf32>
    %c0_10 = arith.constant 0 : index
    %c0_11 = arith.constant 0 : index
    %11 = vector.load %arg10[%c0_10, %c0_11] : memref<64x128xf32, #tpu.memory_space<vmem>>, vector<64x128xf32>
    tpu.vector_store %arg10[%c0_10, %c0_11], %10 {strides = array<i32>} : memref<64x128xf32, #tpu.memory_space<vmem>>, vector<64x128xf32>,
    %12 = vector.extract_strided_slice %10 {offsets = [0, 0], sizes = [64, 32], strides = [1, 1]} : vector<64x128xf32> to vector<64x32xf32>
    %cst_12 = arith.constant dense<0.000000e+00> : vector<64xf32>
    %13 = vector.multi_reduction <add>, %12, %cst_12 [1] : vector<64x32xf32> to vector<64xf32>
    %14 = vector.shape_cast %13 : vector<64xf32> to vector<64x1xf32>
    %cst_13 = arith.constant 3.200000e+01 : f32
    %15 = vector.broadcast %cst_13 : f32 to vector<64x1xf32>
    %16 = arith.divf %14, %15 : vector<64x1xf32>
    %17 = vector.broadcast %16 : vector<64x1xf32> to vector<64x32xf32>
    %18 = arith.subf %12, %17 : vector<64x32xf32>
    %19 = arith.mulf %18, %18 : vector<64x32xf32>
    %cst_14 = arith.constant dense<0.000000e+00> : vector<64xf32>
    %20 = vector.multi_reduction <add>, %19, %cst_14 [1] : vector<64x32xf32> to vector<64xf32>
    %21 = vector.shape_cast %20 : vector<64xf32> to vector<64x1xf32>
    %cst_15 = arith.constant 3.200000e+01 : f32
    %22 = vector.broadcast %cst_15 : f32 to vector<64x1xf32>
    %23 = arith.divf %21, %22 : vector<64x1xf32>
    %24 = vector.broadcast %16 : vector<64x1xf32> to vector<64x32xf32>
    %25 = arith.subf %12, %24 : vector<64x32xf32>
    %cst_16 = arith.constant 9.99999974E-6 : f32
    %26 = vector.broadcast %cst_16 : f32 to vector<64x1xf32>
    %27 = arith.addf %23, %26 : vector<64x1xf32>
    %28 = math.rsqrt %27 : vector<64x1xf32>
    %29 = vector.broadcast %28 : vector<64x1xf32> to vector<64x32xf32>
    %30 = arith.mulf %25, %29 : vector<64x32xf32>
    %c0_17 = arith.constant 0 : index
    %c0_18 = arith.constant 0 : index
    %31 = vector.load %arg6[%c0_17, %c0_18] : memref<1x32xf32, #tpu.memory_space<vmem>>, vector<1x32xf32>
    %32 = vector.broadcast %31 : vector<1x32xf32> to vector<64x32xf32>
    %33 = arith.mulf %30, %32 : vector<64x32xf32>
    %c0_19 = arith.constant 0 : index
    %c0_20 = arith.constant 0 : index
    %34 = vector.load %arg7[%c0_19, %c0_20] : memref<1x32xf32, #tpu.memory_space<vmem>>, vector<1x32xf32>
    %35 = vector.broadcast %34 : vector<1x32xf32> to vector<64x32xf32>
    %36 = arith.addf %33, %35 : vector<64x32xf32>
    %c0_21 = arith.constant 0 : index
    %c0_22 = arith.constant 0 : index
    %37 = vector.load %arg8[%c0_21, %c0_22] : memref<32x128xf32, #tpu.memory_space<vmem>>, vector<32x128xf32>
    %cst_23 = arith.constant dense<0.000000e+00> : vector<64x128xf32>
    %38 = tpu.matmul %36, %37, %cst_23 {dimension_numbers = #tpu.dot_dimension_numbers<[1], [0], [0], [1], [0, 0, 1, 1], [], []>} : vector<64x32xf32>, vector<32x128xf32>, vector<64x128xf32> -> vector<64x128xf32>
    %c0_24 = arith.constant 0 : index
    %c0_25 = arith.constant 0 : index
    %39 = vector.load %arg9[%c0_24, %c0_25] : memref<1x128xf32, #tpu.memory_space<vmem>>, vector<1x128xf32>
    %40 = vector.broadcast %39 : vector<1x128xf32> to vector<64x128xf32>
    %41 = arith.addf %38, %40 : vector<64x128xf32>
    %c0_26 = arith.constant 0 : index
    %c0_27 = arith.constant 0 : index
    %42 = vector.load %arg11[%c0_26, %c0_27] : memref<64x128xf32, #tpu.memory_space<vmem>>, vector<64x128xf32>
    tpu.vector_store %arg11[%c0_26, %c0_27], %41 {strides = array<i32>} : memref<64x128xf32, #tpu.memory_space<vmem>>, vector<64x128xf32>,
    return
  }
  func.func @transform_0(%arg0: i32) -> (i32, i32) {
    %c0_i32 = arith.constant 0 : i32
    %c0_i32_0 = arith.constant 0 : i32
    %c0_i32_1 = arith.constant 0 : i32
    return %c0_i32, %c0_i32_0 : i32, i32
  }
  func.func @transform_1(%arg0: i32) -> (i32, i32) {
    %c0_i32 = arith.constant 0 : i32
    %c0_i32_0 = arith.constant 0 : i32
    %c0_i32_1 = arith.constant 0 : i32
    return %c0_i32, %c0_i32_0 : i32, i32
  }
  func.func @transform_2(%arg0: i32) -> (i32, i32) {
    %c0_i32 = arith.constant 0 : i32
    %c0_i32_0 = arith.constant 0 : i32
    %c0_i32_1 = arith.constant 0 : i32
    return %c0_i32, %c0_i32_0 : i32, i32
  }
  func.func @transform_3(%arg0: i32) -> (i32, i32) {
    %c0_i32 = arith.constant 0 : i32
    %c0_i32_0 = arith.constant 0 : i32
    %c0_i32_1 = arith.constant 0 : i32
    return %c0_i32, %c0_i32_0 : i32, i32
  }
  func.func @transform_4(%arg0: i32) -> (i32, i32) {
    %c0_i32 = arith.constant 0 : i32
    %c0_i32_0 = arith.constant 0 : i32
    %c0_i32_1 = arith.constant 0 : i32
    return %c0_i32, %c0_i32_0 : i32, i32
  }
  func.func @transform_5(%arg0: i32) -> (i32, i32) {
    %c0_i32 = arith.constant 0 : i32
    %c0_i32_0 = arith.constant 0 : i32
    %c0_i32_1 = arith.constant 0 : i32
    return %c0_i32, %c0_i32_0 : i32, i32
  }
  func.func @transform_6(%arg0: i32) -> (i32, i32) {
    %c0_i32 = arith.constant 0 : i32
    %c0_i32_0 = arith.constant 0 : i32
    %c0_i32_1 = arith.constant 0 : i32
    return %c0_i32, %c0_i32_0 : i32, i32
  }
  func.func @transform_7(%arg0: i32) -> (i32, i32) {
    %c0_i32 = arith.constant 0 : i32
    %c0_i32_0 = arith.constant 0 : i32
    %c0_i32_1 = arith.constant 0 : i32
    return %c0_i32, %c0_i32_0 : i32, i32
  }
  func.func @transform_8(%arg0: i32) -> (i32, i32) {
    %c0_i32 = arith.constant 0 : i32
    %c0_i32_0 = arith.constant 0 : i32
    %c0_i32_1 = arith.constant 0 : i32
    return %c0_i32, %c0_i32_0 : i32, i32
  }
  func.func @transform_9(%arg0: i32) -> (i32, i32) {
    %c0_i32 = arith.constant 0 : i32
    %c0_i32_0 = arith.constant 0 : i32
    %c0_i32_1 = arith.constant 0 : i32
    return %c0_i32, %c0_i32_0 : i32, i32
  }
  func.func @transform_10(%arg0: i32) -> (i32, i32) {
    %c0_i32 = arith.constant 0 : i32
    %c0_i32_0 = arith.constant 0 : i32
    %c0_i32_1 = arith.constant 0 : i32
    return %c0_i32, %c0_i32_0 : i32, i32
  }
}

module attributes {stable_mosaic.version = 11 : i64} {
  func.func @_svd_head_kernel(%arg0: i32, %arg1: memref<1x64x8xf32, #tpu.memory_space<vmem>>, %arg2: memref<1x8x64xf32, #tpu.memory_space<vmem>>, %arg3: memref<1x8x64xf32, #tpu.memory_space<vmem>>, %arg4: memref<1x3x3xf32, #tpu.memory_space<vmem>>, %arg5: memref<1x3x1xf32, #tpu.memory_space<vmem>>) attributes {dimension_semantics = [#tpu.dimension_semantics<parallel>], iteration_bounds = array<i64: 2>, scalar_prefetch = 0 : i64, scratch_operands = 0 : i64, tpu.core_type = #tpu.core_type<tc>, window_params = [{transform_indices = @transform_0, window_bounds = array<i64: 1, 64, 8>}, {transform_indices = @transform_1, window_bounds = array<i64: 1, 8, 64>}, {transform_indices = @transform_2, window_bounds = array<i64: 1, 8, 64>}, {transform_indices = @transform_3, window_bounds = array<i64: 1, 3, 3>}, {transform_indices = @transform_4, window_bounds = array<i64: 1, 3, 1>}]} {
    %c0 = arith.constant 0 : index
    %c0_0 = arith.constant 0 : index
    %c0_1 = arith.constant 0 : index
    %0 = vector.load %arg1[%c0, %c0_0, %c0_1] : memref<1x64x8xf32, #tpu.memory_space<vmem>>, vector<1x64x8xf32>
    %1 = vector.shape_cast %0 : vector<1x64x8xf32> to vector<64x8xf32>
    %c0_2 = arith.constant 0 : index
    %c0_3 = arith.constant 0 : index
    %c0_4 = arith.constant 0 : index
    %2 = vector.load %arg2[%c0_2, %c0_3, %c0_4] : memref<1x8x64xf32, #tpu.memory_space<vmem>>, vector<1x8x64xf32>
    %3 = vector.shape_cast %2 : vector<1x8x64xf32> to vector<8x64xf32>
    %cst = arith.constant dense<0.000000e+00> : vector<64x64xf32>
    %4 = tpu.matmul %1, %3, %cst {dimension_numbers = #tpu.dot_dimension_numbers<[1], [0], [0], [1], [0, 0, 1, 1], [], []>} : vector<64x8xf32>, vector<8x64xf32>, vector<64x64xf32> -> vector<64x64xf32>
    %cst_5 = arith.constant 0.353553385 : f32
    %5 = vector.broadcast %cst_5 : f32 to vector<64x64xf32>
    %6 = arith.mulf %4, %5 : vector<64x64xf32>
    %cst_6 = arith.constant dense<0xFF800000> : vector<64xf32>
    %7 = vector.multi_reduction <maximumf>, %6, %cst_6 [1] : vector<64x64xf32> to vector<64xf32>
    %8 = vector.shape_cast %7 : vector<64xf32> to vector<64x1xf32>
    %9 = vector.broadcast %8 : vector<64x1xf32> to vector<64x64xf32>
    %10 = arith.subf %6, %9 : vector<64x64xf32>
    %11 = math.exp %10 : vector<64x64xf32>
    %cst_7 = arith.constant dense<0.000000e+00> : vector<64xf32>
    %12 = vector.multi_reduction <add>, %11, %cst_7 [1] : vector<64x64xf32> to vector<64xf32>
    %13 = vector.shape_cast %12 : vector<64xf32> to vector<64x1xf32>
    %14 = tpu.reciprocal %13 {approx = true} : vector<64x1xf32> -> vector<64x1xf32>
    %15 = vector.broadcast %14 : vector<64x1xf32> to vector<64x64xf32>
    %16 = arith.mulf %11, %15 : vector<64x64xf32>
    %c0_8 = arith.constant 0 : index
    %c0_9 = arith.constant 0 : index
    %c0_10 = arith.constant 0 : index
    %17 = vector.load %arg3[%c0_8, %c0_9, %c0_10] : memref<1x8x64xf32, #tpu.memory_space<vmem>>, vector<1x8x64xf32>
    %18 = vector.shape_cast %17 : vector<1x8x64xf32> to vector<8x64xf32>
    %cst_11 = arith.constant dense<0.000000e+00> : vector<8x64xf32>
    %19 = tpu.matmul %18, %16, %cst_11 {dimension_numbers = #tpu.dot_dimension_numbers<[1], [1], [0], [0], [0, 0, 1, 0], [], []>} : vector<8x64xf32>, vector<64x64xf32>, vector<8x64xf32> -> vector<8x64xf32>
    %20 = vector.extract_strided_slice %19 {offsets = [0, 0], sizes = [3, 64], strides = [1, 1]} : vector<8x64xf32> to vector<3x64xf32>
    %21 = vector.extract_strided_slice %19 {offsets = [3, 0], sizes = [1, 64], strides = [1, 1]} : vector<8x64xf32> to vector<1x64xf32>
    %22 = vector.extract_strided_slice %19 {offsets = [4, 0], sizes = [1, 64], strides = [1, 1]} : vector<8x64xf32> to vector<1x64xf32>
    %23 = vector.extract_strided_slice %18 {offsets = [0, 0], sizes = [3, 64], strides = [1, 1]} : vector<8x64xf32> to vector<3x64xf32>
    %24 = vector.extract_strided_slice %18 {offsets = [5, 0], sizes = [1, 64], strides = [1, 1]} : vector<8x64xf32> to vector<1x64xf32>
    %25 = vector.extract_strided_slice %18 {offsets = [6, 0], sizes = [1, 64], strides = [1, 1]} : vector<8x64xf32> to vector<1x64xf32>
    %26 = arith.addf %25, %22 : vector<1x64xf32>
    %cst_12 = arith.constant 5.000000e-01 : f32
    %27 = vector.broadcast %cst_12 : f32 to vector<1x64xf32>
    %28 = arith.mulf %27, %26 : vector<1x64xf32>
    %29 = arith.addf %24, %21 : vector<1x64xf32>
    %cst_13 = arith.constant 5.000000e-01 : f32
    %30 = vector.broadcast %cst_13 : f32 to vector<1x64xf32>
    %31 = arith.mulf %30, %29 : vector<1x64xf32>
    %cst_14 = arith.constant 1.000000e+00 : f32
    %32 = vector.broadcast %cst_14 : f32 to vector<1x64xf32>
    %33 = arith.divf %31, %32 : vector<1x64xf32>
    %34 = arith.negf %33 : vector<1x64xf32>
    %35 = math.exp %34 : vector<1x64xf32>
    %cst_15 = arith.constant 1.000000e+00 : f32
    %36 = vector.broadcast %cst_15 : f32 to vector<1x64xf32>
    %37 = arith.addf %36, %35 : vector<1x64xf32>
    %38 = arith.divf %36, %37 : vector<1x64xf32>
    %cst_16 = arith.constant 1.000000e+00 : f32
    %39 = vector.broadcast %cst_16 : f32 to vector<1x64xf32>
    %40 = arith.divf %28, %39 : vector<1x64xf32>
    %41 = arith.negf %40 : vector<1x64xf32>
    %42 = math.exp %41 : vector<1x64xf32>
    %cst_17 = arith.constant 1.000000e+00 : f32
    %43 = vector.broadcast %cst_17 : f32 to vector<1x64xf32>
    %44 = arith.addf %43, %42 : vector<1x64xf32>
    %45 = arith.divf %43, %44 : vector<1x64xf32>
    %46 = arith.mulf %38, %45 : vector<1x64xf32>
    %cst_18 = arith.constant dense<0x7F800000> : vector<1xf32>
    %47 = vector.multi_reduction <minimumf>, %46, %cst_18 [1] : vector<1x64xf32> to vector<1xf32>
    %48 = vector.shape_cast %47 : vector<1xf32> to vector<1x1xf32>
    %cst_19 = arith.constant dense<0xFF800000> : vector<1xf32>
    %49 = vector.multi_reduction <maximumf>, %46, %cst_19 [1] : vector<1x64xf32> to vector<1xf32>
    %50 = vector.shape_cast %49 : vector<1xf32> to vector<1x1xf32>
    %51 = vector.broadcast %48 : vector<1x1xf32> to vector<1x64xf32>
    %52 = arith.subf %46, %51 : vector<1x64xf32>
    %53 = arith.subf %50, %48 : vector<1x1xf32>
    %cst_20 = arith.constant 9.99999997E-7 : f32
    %54 = vector.broadcast %cst_20 : f32 to vector<1x1xf32>
    %55 = arith.maximumf %53, %54 : vector<1x1xf32>
    %56 = tpu.reciprocal %55 {approx = true} : vector<1x1xf32> -> vector<1x1xf32>
    %57 = vector.broadcast %56 : vector<1x1xf32> to vector<1x64xf32>
    %58 = arith.mulf %52, %57 : vector<1x64xf32>
    %cst_21 = arith.constant dense<0.000000e+00> : vector<3xf32>
    %59 = vector.multi_reduction <add>, %23, %cst_21 [1] : vector<3x64xf32> to vector<3xf32>
    %60 = vector.shape_cast %59 : vector<3xf32> to vector<3x1xf32>
    %cst_22 = arith.constant 6.400000e+01 : f32
    %61 = vector.broadcast %cst_22 : f32 to vector<3x1xf32>
    %62 = arith.divf %60, %61 : vector<3x1xf32>
    %63 = vector.broadcast %62 : vector<3x1xf32> to vector<3x64xf32>
    %64 = arith.subf %23, %63 : vector<3x64xf32>
    %cst_23 = arith.constant dense<0.000000e+00> : vector<3xf32>
    %65 = vector.multi_reduction <add>, %20, %cst_23 [1] : vector<3x64xf32> to vector<3xf32>
    %66 = vector.shape_cast %65 : vector<3xf32> to vector<3x1xf32>
    %cst_24 = arith.constant 6.400000e+01 : f32
    %67 = vector.broadcast %cst_24 : f32 to vector<3x1xf32>
    %68 = arith.divf %66, %67 : vector<3x1xf32>
    %69 = vector.broadcast %68 : vector<3x1xf32> to vector<3x64xf32>
    %70 = arith.subf %20, %69 : vector<3x64xf32>
    %71 = vector.broadcast %58 : vector<1x64xf32> to vector<3x64xf32>
    %72 = arith.mulf %64, %71 : vector<3x64xf32>
    %cst_25 = arith.constant dense<0.000000e+00> : vector<3x3xf32>
    %73 = tpu.matmul %72, %70, %cst_25 {dimension_numbers = #tpu.dot_dimension_numbers<[1], [1], [0], [0], [0, 0, 1, 0], [], []>} : vector<3x64xf32>, vector<3x64xf32>, vector<3x3xf32> -> vector<3x3xf32>
    %c0_26 = arith.constant 0 : index
    %c0_27 = arith.constant 0 : index
    %c0_28 = arith.constant 0 : index
    %74 = vector.load %arg4[%c0_26, %c0_27, %c0_28] : memref<1x3x3xf32, #tpu.memory_space<vmem>>, vector<1x3x3xf32>
    %75 = vector.shape_cast %74 : vector<1x3x3xf32> to vector<3x3xf32>
    %76 = vector.shape_cast %73 : vector<3x3xf32> to vector<1x3x3xf32>
    tpu.vector_store %arg4[%c0_26, %c0_27, %c0_28], %76 {strides = array<i32>} : memref<1x3x3xf32, #tpu.memory_space<vmem>>, vector<1x3x3xf32>,
    %c0_29 = arith.constant 0 : index
    %c0_30 = arith.constant 0 : index
    %c0_31 = arith.constant 0 : index
    %77 = vector.load %arg5[%c0_29, %c0_30, %c0_31] : memref<1x3x1xf32, #tpu.memory_space<vmem>>, vector<1x3x1xf32>
    %78 = vector.shape_cast %77 : vector<1x3x1xf32> to vector<3x1xf32>
    %79 = vector.shape_cast %68 : vector<3x1xf32> to vector<1x3x1xf32>
    tpu.vector_store %arg5[%c0_29, %c0_30, %c0_31], %79 {strides = array<i32>} : memref<1x3x1xf32, #tpu.memory_space<vmem>>, vector<1x3x1xf32>,
    return
  }
  func.func @transform_0(%arg0: i32) -> (i32, i32, i32) {
    %c0_i32 = arith.constant 0 : i32
    %c0_i32_0 = arith.constant 0 : i32
    %c0_i32_1 = arith.constant 0 : i32
    return %arg0, %c0_i32, %c0_i32_0 : i32, i32, i32
  }
  func.func @transform_1(%arg0: i32) -> (i32, i32, i32) {
    %c0_i32 = arith.constant 0 : i32
    %c0_i32_0 = arith.constant 0 : i32
    %c0_i32_1 = arith.constant 0 : i32
    return %arg0, %c0_i32, %c0_i32_0 : i32, i32, i32
  }
  func.func @transform_2(%arg0: i32) -> (i32, i32, i32) {
    %c0_i32 = arith.constant 0 : i32
    %c0_i32_0 = arith.constant 0 : i32
    %c0_i32_1 = arith.constant 0 : i32
    return %arg0, %c0_i32, %c0_i32_0 : i32, i32, i32
  }
  func.func @transform_3(%arg0: i32) -> (i32, i32, i32) {
    %c0_i32 = arith.constant 0 : i32
    %c0_i32_0 = arith.constant 0 : i32
    %c0_i32_1 = arith.constant 0 : i32
    return %arg0, %c0_i32, %c0_i32_0 : i32, i32, i32
  }
  func.func @transform_4(%arg0: i32) -> (i32, i32, i32) {
    %c0_i32 = arith.constant 0 : i32
    %c0_i32_0 = arith.constant 0 : i32
    %c0_i32_1 = arith.constant 0 : i32
    return %arg0, %c0_i32, %c0_i32_0 : i32, i32, i32
  }
}

</mosaic_0001>

<bundles_post_ra>
// kernel: custom-call.50
= control target key start
LH: loop header
LB: loop body
LE: loop exit
PB: predicated region body
PF: predicated region fallthrough
CT: control target
= control target key end

     0   :  { %s6_s0 = inlined_call_operand.hbm [shape: pred[2], index: 0, kind: output, shape index: {}]  }

// kernel: dvmnet_forward.2
= control target key start
LH: loop header
LB: loop body
LE: loop exit
PB: predicated region body
PF: predicated region fallthrough
CT: control target
= control target key end

     0   :  { %vm76_vm0 = vcmask 1043456   ;;  %vm51_vm1 = vcmask 97280   ;;  %vm194_vm2 = vcmask 130048   ;;  %vm332_vm3 = vcmask 261120   ;;  %s1004_s1 = inlined_call_operand.vmem [shape: f32[12,16], index: 1, kind: input, shape index: {}]   ;;  %s1005_s0 = inlined_call_operand.vmem [shape: f32[64,12], index: 0, kind: input, shape index: {}]   ;;  %s1006_s3 = inlined_call_operand.vmem [shape: f32[16,128], index: 3, kind: input, shape index: {}]   ;;  %s1007_s2 = inlined_call_operand.vmem [shape: f32[1,16], index: 2, kind: input, shape index: {}]   ;;  %s1008_s4 = inlined_call_operand.vmem [shape: f32[1,128], index: 4, kind: input, shape index: {}]   ;;  %s1009_s9 = inlined_call_operand.vmem [shape: f32[64,128], index: 9, kind: output, shape index: {0}]   ;;  %s1010_s7 = inlined_call_operand.vmem [shape: f32[32,128], index: 7, kind: input, shape index: {}]   ;;  %s1011_s5 = inlined_call_operand.vmem [shape: f32[1,32], index: 5, kind: input, shape index: {}]   ;;  %s1012_s6 = inlined_call_operand.vmem [shape: f32[1,32], index: 6, kind: input, shape index: {}]   ;;  %s1013_s8 = inlined_call_operand.vmem [shape: f32[1,128], index: 8, kind: input, shape index: {}]   ;;  %s1014_s10 = inlined_call_operand.vmem [shape: f32[64,128], index: 10, kind: output, shape index: {1}]  }
   0x1   :  { %v43_v0 = vld [vmem:[%s1004_s1 + $0x8] sm:$0xf]  ;;  %v42_v1 = vld [vmem:[%s1004_s1] sm:$0xff]  ;;  %v36_v4 = vld [vmem:[%s1005_s0 + $0x10] sm:$0xff] }
   0x2   :  { %v34_v2 = vld [vmem:[%s1005_s0] sm:$0xff]  ;;  %686 = vmatprep.subr.msk.mxu0 %vm76_vm0, %v43_v0  ;;  %v35_v3 = vld [vmem:[%s1005_s0 + $0x8] sm:$0xff]  ;;  %738 = vmatprep.subr.msk.mxu1 %vm76_vm0, %v43_v0  ;;  %v40_v8 = vld [vmem:[%s1005_s0 + $0x30] sm:$0xff] }
   0x3   :  { %690 = vmatprep.mubr.msk.f32.mxu0 %vm51_vm1, %v34_v2  ;;  %687 = vmatpush3.msk.msra.mxu0 %vm76_vm0, %v43_v0  ;;  %v38_v5 = vld [vmem:[%s1005_s0 + $0x20] sm:$0xff]  ;;  %v39_v6 = vld [vmem:[%s1005_s0 + $0x28] sm:$0xff]  ;;  %v37_v9 = vld [vmem:[%s1005_s0 + $0x18] sm:$0xff] }
   0x4   :  { %688 = vmatprep.subr.mxu0 %v42_v1  ;;  %740 = vmatpush3.msk.msra.mxu1 %vm76_vm0, %v43_v0  ;;  %v186_v7 = vld [vmem:[%s1006_s3 + $0x8] sm:$0xff]  ;;  %v41_v10 = vld [vmem:[%s1005_s0 + $0x38] sm:$0xff]  ;;  %v185_v11 = vld [vmem:[%s1006_s3] sm:$0xff] }
   0x5   :  { %689 = vmatpush3.msra.mxu0 %v42_v1  ;;  %739 = vmatprep.subr.mxu1 %v42_v1  ;;  %v624_v13 = vld [vmem:[%s1007_s2] ss:$0 sm:$0xff] }
   0x6   :  { %691 = vmatmul.mubr.msk.f32.vlgmr.msra.gmra.mxu0 %vm51_vm1, %v35_v3  ;;  %741 = vmatpush3.msra.mxu1 %v42_v1  ;;  %v634_v29 = vld [vmem:[%s1008_s4] ss:$0 sm:$0xff] }
   0x7   :  { %693 = vmatprep.mubr.msk.f32.mxu0 %vm51_vm1, %v36_v4  ;;  %696 = vmatprep.mubr.msk.f32.mxu1 %vm51_vm1, %v38_v5 }
   0x8   :  { %697 = vmatmul.mubr.msk.f32.vlgmr.msra.gmra.mxu1 %vm51_vm1, %v39_v6  ;;  %702 = vmatprep.subr.mxu1 %v186_v7 }
   0x9   :  { %699 = vmatprep.mubr.msk.f32.mxu1 %vm51_vm1, %v40_v8  ;;  %703 = vmatpush3.msra.mxu1 %v186_v7 }
   0xa   :  { %694 = vmatmul.mubr.msk.f32.gmra.mxu0 %vm51_vm1, %v37_v9  ;;  %704 = vmatprep.subr.mxu1 %v185_v11 }
   0xb   :  { %705 = vmatpush3.msra.mxu1 %v185_v11 }
   0xc   :  { %700 = vmatmul.mubr.msk.f32.gmra.mxu1 %vm51_vm1, %v41_v10 }
  0xc6   :  { %v692_v12 = vpop.f32.mrf.mxu0 }
  0xc7   :  { %v152_v17 = vadd.f32 %v692_v12, %v624_v13 }
  0xc8   :  { %v146_v14 = vpop.f32.mrf.mxu0  ;;  %v698_v15 = vpop.f32.mrf.mxu1 }
  0xc9   :  { %v147_v16 = vadd.f32 %v624_v13, %v146_v14  ;;  %v172_v26 = vadd.f32 %v698_v15, %v624_v13 }
  0xca   :  { %v695_v18 = vpop.f32.mrf.mxu0  ;;  %v166_v19 = vpop.f32.mrf.mxu1 }
  0xcb   :  { %706 = vmatprep.mubr.msk.f32.mxu1 %vm194_vm2, %v147_v16  ;;  %v167_v23 = vadd.f32 %v624_v13, %v166_v19  ;;  %v162_v24 = vadd.f32 %v695_v18, %v624_v13 }
  0xcc   :  { %v156_v20 = vpop.f32.mrf.mxu0  ;;  %707 = vmatmul.mubr.msk.f32.vlgmr.msra.gmra.mxu1 %vm194_vm2, %v152_v17  ;;  %v701_v21 = vpop.f32.mrf.mxu1 }
  0xcd   :  { %v157_v22 = vadd.f32 %v624_v13, %v156_v20  ;;  %v182_v28 = vadd.f32 %v701_v21, %v624_v13 }
  0xce   :  { %v176_v25 = vpop.f32.mrf.mxu1 }
  0xcf   :  { %709 = vmatprep.mubr.msk.f32.mxu1 %vm194_vm2, %v157_v22  ;;  %v177_v27 = vadd.f32 %v624_v13, %v176_v25 }
  0xd0   :  { %710 = vmatmul.mubr.msk.f32.gmra.mxu1 %vm194_vm2, %v162_v24 }
  0xd1   :  { %712 = vmatprep.mubr.msk.f32.mxu1 %vm194_vm2, %v167_v23 }
  0xd4   :  { %713 = vmatmul.mubr.msk.f32.gmra.mxu1 %vm194_vm2, %v172_v26 }
  0xd5   :  { %715 = vmatprep.mubr.msk.f32.mxu1 %vm194_vm2, %v177_v27 }
  0xd8   :  { %716 = vmatmul.mubr.msk.f32.gmra.mxu1 %vm194_vm2, %v182_v28 }
 0x18c   :  { %v708_v30 = vpop.f32.mrf.mxu1 }
 0x18d   :  { %v291_v31 = vadd.f32 %v708_v30, %v634_v29  ;;  %v471_v30 = vld [vmem:[%s1010_s7 + $0x18] sm:$0xff] }
 0x18e   :  { %v285_v32 = vpop.f32.mrf.mxu1  ;;  %718 = vmatprep.subr.mxu0 %v471_v30 }
 0x18f   :  { %325 = vst [vmem:[%s1009_s9 + $0x8] sm:$0xff] %v291_v31  ;;  %v286_v33 = vadd.f32 %v634_v29, %v285_v32  ;;  %v336_v42 = vsel %vm332_vm3, %v291_v31, 0.0  ;;  %719 = vmatpush3.msra.mxu0 %v471_v30  ;;  %v469_v32 = vld [vmem:[%s1010_s7 + $0x8] sm:$0xff] }
 0x190   :  { %v711_v34 = vpop.f32.mrf.mxu1 }
 0x191   :  { %324 = vst [vmem:[%s1009_s9] sm:$0xff] %v286_v33  ;;  %v301_v35 = vadd.f32 %v711_v34, %v634_v29  ;;  %v333_v36 = vsel %vm332_vm3, %v286_v33, 0.0 }
 0x192   :  { %v295_v37 = vpop.f32.mrf.mxu1  ;;  %334 = vadd.xlane.f32.xlu0 %v333_v36 }
 0x193   :  { %327 = vst [vmem:[%s1009_s9 + $0x18] sm:$0xff] %v301_v35  ;;  %v296_v38 = vadd.f32 %v634_v29, %v295_v37  ;;  %v342_v47 = vsel %vm332_vm3, %v301_v35, 0.0 }
 0x194   :  { %v714_v39 = vpop.f32.mrf.mxu1 }
 0x195   :  { %326 = vst [vmem:[%s1009_s9 + $0x10] sm:$0xff] %v296_v38  ;;  %v311_v40 = vadd.f32 %v714_v39, %v634_v29  ;;  %v339_v41 = vsel %vm332_vm3, %v296_v38, 0.0 }
 0x196   :  { %v305_v43 = vpop.f32.mrf.mxu1  ;;  %340 = vadd.xlane.f32.xlu1 %v339_v41  ;;  %337 = vadd.xlane.f32.xlu0 %v336_v42 }
 0x197   :  { %329 = vst [vmem:[%s1009_s9 + $0x28] sm:$0xff] %v311_v40  ;;  %v306_v44 = vadd.f32 %v634_v29, %v305_v43  ;;  %v348_v51 = vsel %vm332_vm3, %v311_v40, 0.0 }
 0x198   :  { %v717_v45 = vpop.f32.mrf.mxu1 }
 0x199   :  { %328 = vst [vmem:[%s1009_s9 + $0x20] sm:$0xff] %v306_v44  ;;  %v321_v46 = vadd.f32 %v717_v45, %v634_v29  ;;  %v345_v48 = vsel %vm332_vm3, %v306_v44, 0.0 }
 0x19a   :  { %v315_v49 = vpop.f32.mrf.mxu1  ;;  %343 = vadd.xlane.f32.xlu1 %v342_v47  ;;  %346 = vadd.xlane.f32.xlu0 %v345_v48 }
 0x19b   :  { %331 = vst [vmem:[%s1009_s9 + $0x38] sm:$0xff] %v321_v46  ;;  %v316_v50 = vadd.f32 %v634_v29, %v315_v49  ;;  %v354_v53 = vsel %vm332_vm3, %v321_v46, 0.0 }
 0x19d   :  { %330 = vst [vmem:[%s1009_s9 + $0x30] sm:$0xff] %v316_v50  ;;  %v351_v52 = vsel %vm332_vm3, %v316_v50, 0.0 }
 0x19e   :  { %349 = vadd.xlane.f32.xlu1 %v348_v51  ;;  %352 = vadd.xlane.f32.xlu0 %v351_v52 }
 0x1a2   :  { %355 = vadd.xlane.f32.xlu1 %v354_v53 }
 0x21b   :  { %v335_v54 = vpop.xlane.xlu0 %334 }
 0x21c   :  { %v358_v55 = vmul.f32 0.03125, %v335_v54 }
 0x21e   :  { %v903_v56 = vsub.f32 %v286_v33, %v358_v55  ;;  %v468_v33 = vld [vmem:[%s1010_s7] sm:$0xff] }
 0x21f   :  { %v341_v57 = vpop.xlane.xlu1 %340  ;;  %v338_v58 = vpop.xlane.xlu0 %337 }
 0x220   :  { %v360_v59 = vmul.f32 0.03125, %v341_v57  ;;  %v359_v60 = vmul.f32 0.03125, %v338_v58  ;;  %v374_v61 = vmul.f32 %v903_v56, %v903_v56 }
 0x222   :  { %v907_v62 = vsub.f32 %v296_v38, %v360_v59  ;;  %v909_v63 = vsub.f32 %v291_v31, %v359_v60  ;;  %v382_v0 = vsel %vm332_vm3, %v374_v61, 0.0  ;;  %v470_v31 = vld [vmem:[%s1010_s7 + $0x10] sm:$0xff]  ;;  %v643_v59 = vld [vmem:[%s1011_s5] ss:$0 sm:$0xff] }
 0x223   :  { %v344_v1 = vpop.xlane.xlu1 %343  ;;  %383 = vadd.xlane.f32.xlu0 %v382_v0  ;;  %v347_v2 = vpop.xlane.xlu0 %346  ;;  %720 = vmatprep.subr.mxu0 %v470_v31  ;;  %v644_v0 = vld [vmem:[%s1012_s6] ss:$0 sm:$0xff] }
 0x224   :  { %v361_v3 = vmul.f32 0.03125, %v344_v1  ;;  %v362_v4 = vmul.f32 0.03125, %v347_v2  ;;  %v376_v5 = vmul.f32 %v907_v62, %v907_v62  ;;  %v375_v6 = vmul.f32 %v909_v63, %v909_v63  ;;  %721 = vmatpush3.msra.mxu0 %v470_v31 }
 0x225   :  { %722 = vmatprep.subr.mxu0 %v469_v32 }
 0x226   :  { %v916_v7 = vsub.f32 %v301_v35, %v361_v3  ;;  %v918_v8 = vsub.f32 %v306_v44, %v362_v4  ;;  %v388_v9 = vsel %vm332_vm3, %v376_v5, 0.0  ;;  %v385_v10 = vsel %vm332_vm3, %v375_v6, 0.0  ;;  %723 = vmatpush3.msra.mxu0 %v469_v32 }
 0x227   :  { %v350_v11 = vpop.xlane.xlu1 %349  ;;  %389 = vadd.xlane.f32.xlu0 %v388_v9  ;;  %386 = vadd.xlane.f32.xlu1 %v385_v10  ;;  %v353_v12 = vpop.xlane.xlu0 %352 }
 0x228   :  { %v363_v13 = vmul.f32 0.03125, %v350_v11  ;;  %v364_v14 = vmul.f32 0.03125, %v353_v12  ;;  %v377_v15 = vmul.f32 %v916_v7, %v916_v7  ;;  %v378_v16 = vmul.f32 %v918_v8, %v918_v8  ;;  %724 = vmatprep.subr.mxu0 %v468_v33 }
 0x229   :  { %725 = vmatpush3.msra.mxu0 %v468_v33 }
 0x22a   :  { %v926_v17 = vsub.f32 %v311_v40, %v363_v13  ;;  %v928_v18 = vsub.f32 %v316_v50, %v364_v14  ;;  %v391_v19 = vsel %vm332_vm3, %v377_v15, 0.0  ;;  %v394_v20 = vsel %vm332_vm3, %v378_v16, 0.0 }
 0x22b   :  { %v356_v21 = vpop.xlane.xlu1 %355  ;;  %392 = vadd.xlane.f32.xlu1 %v391_v19  ;;  %395 = vadd.xlane.f32.xlu0 %v394_v20 }
 0x22c   :  { %v365_v22 = vmul.f32 0.03125, %v356_v21  ;;  %v379_v23 = vmul.f32 %v926_v17, %v926_v17  ;;  %v380_v24 = vmul.f32 %v928_v18, %v928_v18 }
 0x22e   :  { %v936_v25 = vsub.f32 %v321_v46, %v365_v22  ;;  %v397_v26 = vsel %vm332_vm3, %v379_v23, 0.0  ;;  %v400_v27 = vsel %vm332_vm3, %v380_v24, 0.0 }
 0x22f   :  { %398 = vadd.xlane.f32.xlu1 %v397_v26  ;;  %401 = vadd.xlane.f32.xlu0 %v400_v27 }
 0x230   :  { %v381_v28 = vmul.f32 %v936_v25, %v936_v25 }
 0x232   :  { %v403_v29 = vsel %vm332_vm3, %v381_v28, 0.0 }
 0x233   :  { %404 = vadd.xlane.f32.xlu1 %v403_v29 }
 0x2ac   :  { %v384_v34 = vpop.xlane.xlu0 %383 }
 0x2ad   :  { %v406_v35 = vmul.f32 0.03125, %v384_v34 }
 0x2af   :  { %v414_v36 = vadd.f32 1e-05, %v406_v35 }
 0x2b0   :  { %v387_v37 = vpop.xlane.xlu1 %386  ;;  %v390_v38 = vpop.xlane.xlu0 %389 }
 0x2b1   :  { %742 = vrsqrt.f32 %v414_v36  ;;  %v407_v39 = vmul.f32 0.03125, %v387_v37  ;;  %v408_v40 = vmul.f32 0.03125, %v390_v38 }
 0x2b3   :  { %v415_v41 = vadd.f32 1e-05, %v407_v39  ;;  %v416_v42 = vadd.f32 1e-05, %v408_v40 }
 0x2b4   :  { %v393_v43 = vpop.xlane.xlu1 %392  ;;  %v396_v44 = vpop.xlane.xlu0 %395 }
 0x2b5   :  { %744 = vrsqrt.f32 %v415_v41  ;;  %v409_v45 = vmul.f32 0.03125, %v393_v43  ;;  %v410_v46 = vmul.f32 0.03125, %v396_v44 }
 0x2b6   :  { %746 = vrsqrt.f32 %v416_v42 }
 0x2b7   :  { %v417_v47 = vadd.f32 1e-05, %v409_v45  ;;  %v418_v48 = vadd.f32 1e-05, %v410_v46 }
 0x2b8   :  { %v399_v49 = vpop.xlane.xlu1 %398  ;;  %v402_v50 = vpop.xlane.xlu0 %401 }
 0x2b9   :  { %748 = vrsqrt.f32 %v417_v47  ;;  %v411_v51 = vmul.f32 0.03125, %v399_v49  ;;  %v412_v52 = vmul.f32 0.03125, %v402_v50 }
 0x2ba   :  { %750 = vrsqrt.f32 %v418_v48 }
 0x2bb   :  { %v419_v53 = vadd.f32 1e-05, %v411_v51  ;;  %v420_v54 = vadd.f32 1e-05, %v412_v52 }
 0x2bc   :  { %v405_v55 = vpop.xlane.xlu1 %404 }
 0x2bd   :  { %752 = vrsqrt.f32 %v419_v53  ;;  %v413_v57 = vmul.f32 0.03125, %v405_v55 }
 0x2be   :  { %v743_v58 = vpop.eup %742  ;;  %754 = vrsqrt.f32 %v420_v54 }
 0x2bf   :  { %v421_v60 = vadd.f32 1e-05, %v413_v57  ;;  %v430_v61 = vmul.f32 %v743_v58, %v903_v56 }
 0x2c1   :  { %756 = vrsqrt.f32 %v421_v60  ;;  %v445_v1 = vmul.f32 %v643_v59, %v430_v61 }
 0x2c2   :  { %v745_v2 = vpop.eup %744 }
 0x2c3   :  { %v747_v3 = vpop.eup %746  ;;  %v431_v4 = vmul.f32 %v745_v2, %v909_v63  ;;  %v460_v5 = vadd.f32 %v644_v0, %v445_v1 }
 0x2c4   :  { %v432_v6 = vmul.f32 %v747_v3, %v907_v62 }
 0x2c5   :  { %v446_v9 = vmul.f32 %v643_v59, %v431_v4  ;;  %726 = vmatprep.mubr.msk.f32.mxu0 %vm332_vm3, %v460_v5 }
 0x2c6   :  { %v749_v10 = vpop.eup %748  ;;  %v447_v11 = vmul.f32 %v643_v59, %v432_v6 }
 0x2c7   :  { %v751_v12 = vpop.eup %750  ;;  %v461_v56 = vadd.f32 %v644_v0, %v446_v9  ;;  %v433_v13 = vmul.f32 %v749_v10, %v916_v7 }
 0x2c8   :  { %v462_v14 = vadd.f32 %v644_v0, %v447_v11  ;;  %v434_v15 = vmul.f32 %v751_v12, %v918_v8 }
 0x2c9   :  { %727 = vmatmul.mubr.msk.f32.vlgmr.msra.gmra.mxu0 %vm332_vm3, %v461_v56  ;;  %v448_v16 = vmul.f32 %v643_v59, %v433_v13 }
 0x2ca   :  { %v753_v19 = vpop.eup %752  ;;  %729 = vmatprep.mubr.msk.f32.mxu0 %vm332_vm3, %v462_v14  ;;  %v449_v63 = vmul.f32 %v643_v59, %v434_v15 }
 0x2cb   :  { %v755_v62 = vpop.eup %754  ;;  %v463_v20 = vadd.f32 %v644_v0, %v448_v16  ;;  %v435_v21 = vmul.f32 %v753_v19, %v926_v17 }
 0x2cc   :  { %v464_v22 = vadd.f32 %v644_v0, %v449_v63  ;;  %v436_v23 = vmul.f32 %v755_v62, %v928_v18  ;;  %v645_v18 = vld [vmem:[%s1013_s8] ss:$0 sm:$0xff] }
 0x2cd   :  { %730 = vmatmul.mubr.msk.f32.gmra.mxu0 %vm332_vm3, %v463_v20  ;;  %v450_v7 = vmul.f32 %v643_v59, %v435_v21 }
 0x2ce   :  { %v757_v24 = vpop.eup %756  ;;  %732 = vmatprep.mubr.msk.f32.mxu0 %vm332_vm3, %v464_v22  ;;  %v451_v8 = vmul.f32 %v643_v59, %v436_v23 }
 0x2cf   :  { %v465_v26 = vadd.f32 %v644_v0, %v450_v7  ;;  %v437_v27 = vmul.f32 %v757_v24, %v936_v25 }
 0x2d0   :  { %v466_v28 = vadd.f32 %v644_v0, %v451_v8 }
 0x2d1   :  { %733 = vmatmul.mubr.msk.f32.gmra.mxu0 %vm332_vm3, %v465_v26  ;;  %v452_v29 = vmul.f32 %v643_v59, %v437_v27 }
 0x2d2   :  { %735 = vmatprep.mubr.msk.f32.mxu0 %vm332_vm3, %v466_v28 }
 0x2d3   :  { %v467_v17 = vadd.f32 %v644_v0, %v452_v29 }
 0x2d5   :  { %736 = vmatmul.mubr.msk.f32.gmra.mxu0 %vm332_vm3, %v467_v17 }
 0x389   :  { %v728_v30 = vpop.f32.mrf.mxu0 }
 0x38a   :  { %v575_v31 = vadd.f32 %v728_v30, %v645_v18 }
 0x38b   :  { %v569_v32 = vpop.f32.mrf.mxu0 }
 0x38c   :  { %609 = vst [vmem:[%s1014_s10 + $0x8] sm:$0xff] %v575_v31  ;;  %v570_v25 = vadd.f32 %v645_v18, %v569_v32 }
 0x38d   :  { %v731_v33 = vpop.f32.mrf.mxu0 }
 0x38e   :  { %608 = vst [vmem:[%s1014_s10] sm:$0xff] %v570_v25  ;;  %v585_v34 = vadd.f32 %v731_v33, %v645_v18 }
 0x38f   :  { %v579_v35 = vpop.f32.mrf.mxu0 }
 0x390   :  { %611 = vst [vmem:[%s1014_s10 + $0x18] sm:$0xff] %v585_v34  ;;  %v580_v36 = vadd.f32 %v645_v18, %v579_v35 }
 0x391   :  { %v734_v37 = vpop.f32.mrf.mxu0 }
 0x392   :  { %610 = vst [vmem:[%s1014_s10 + $0x10] sm:$0xff] %v580_v36  ;;  %v595_v38 = vadd.f32 %v734_v37, %v645_v18 }
 0x393   :  { %v589_v39 = vpop.f32.mrf.mxu0 }
 0x394   :  { %613 = vst [vmem:[%s1014_s10 + $0x28] sm:$0xff] %v595_v38  ;;  %v590_v40 = vadd.f32 %v645_v18, %v589_v39 }
 0x395   :  { %v737_v41 = vpop.f32.mrf.mxu0 }
 0x396   :  { %612 = vst [vmem:[%s1014_s10 + $0x20] sm:$0xff] %v590_v40  ;;  %v605_v42 = vadd.f32 %v737_v41, %v645_v18 }
 0x397   :  { %v599_v43 = vpop.f32.mrf.mxu0 }
 0x398   :  { %615 = vst [vmem:[%s1014_s10 + $0x38] sm:$0xff] %v605_v42  ;;  %v600_v44 = vadd.f32 %v645_v18, %v599_v43 }
 0x39a   :  { %614 = vst [vmem:[%s1014_s10 + $0x30] sm:$0xff] %v600_v44 }

// kernel: custom-call.57
= control target key start
LH: loop header
LB: loop body
LE: loop exit
PB: predicated region body
PF: predicated region fallthrough
CT: control target
= control target key end

     0   :  { %s651_s9 = smov 0   ;;  %s653_s10 = smov 0   ;;  %s801_s0 = inlined_call_operand.vmem [shape: f32[2,6,3], index: 0, kind: input, shape index: {}]   ;;  %s802_s1 = inlined_call_operand.vmem [shape: f32[2,6,3], index: 1, kind: output, shape index: {0}]   ;;  %s803_s2 = inlined_call_operand.vmem [shape: f32[2,3], index: 2, kind: output, shape index: {1}]  }
   0x1   :  { %s655_s11 = smov 0   ;;  %s657_s12 = smov 0  }
   0x2   :  { %s659_s13 = smov 0  }
   0x3 LB: > { %s28_s14 = sadd.s32 1, %s624_s12  ;;  %s506_s15 = sadd.s32 4294967295, %s628_s13   ;;  %s628_s13 = sphi %s659_s13, %s9_s13   ;;  %s624_s12 = sphi %s657_s12, %s810_s12   ;;  %s620_s11 = sphi %s655_s11, %s809_s11   ;;  %s616_s10 = sphi %s653_s10, %s808_s10   ;;  %s612_s9 = sphi %s651_s9, %s807_s9  }
   0x4   : > { %p30_p0 = scmp.ge.s32.totalorder %s28_s14, 2  ;;  %s33_s16 = ssub.s32 0, %s624_s12 }
   0x5   : > { %s508_s17 = smin.u32 %s624_s12, %s33_s16  ;;  %p57_p1 = scmp.ne.s32.totalorder %s616_s10, %s612_s9 }
   0x6   : > { %s812_s14 = smov (%p30_p0, %s28_s14), 0  ;;  %s35_s18 = sshrl.u32 %s508_s17, 3 }
   0x7   : > { %s39_s19 = ssub.s32 0, %s812_s14  ;;  %p58_p2 = scmp.eq.s32.totalorder %s506_s15, 1 }
   0x8   : > { %s509_s20 = smin.u32 %s39_s19, %s812_s14  ;;  %s47_s24 = sadd.s32 1, %s616_s10 }
   0x9   : > { %s41_s21 = sshrl.u32 %s509_s20, 3  ;;  %p686_p3 = por %p58_p2, %p57_p1 }
   0xa   : > { %s44_s23 = ssub.s32 %s35_s18, %s41_s21  ;;  %p511_p5 = scmp.ge.s32.totalorder %s628_s13, 2 }
   0xb   : > { %p45_p4 = scmp.eq.s32.totalorder %s44_s23, 0  ;;  %s82_s26 = sand.u32 (!%p511_p5), 1, %s628_s13  }
   0xc   : > { %80 = sbr.rel (%p511_p5) target bundleno = 19 (0x13), region = 16  ;;  %s513_s27 = sshll.u32 (!%p511_p5), %s624_s12, 3 }
   0xd   : > { %s692_s25 = scalar_select %p45_p4, %s616_s10, %s47_s24  }
   0xe   : > { %s512_s28 = sshll.u32 (!%p511_p5), %s82_s26, 3  ;;  %s88_s3 = scalar_lea.vmem (!%p511_p5), %s801_s0, %s513_s27 }
   0xf   : > { %s84_s4 = scalar_lea.vmem (!%p511_p5), [#allocation0], %s512_s28 }
  0x11   : > { %v117_v0 = vld [vmem:[%s88_s3] sm:$0xff] }
  0x12   : > { %118 = vst [vmem:[%s84_s4] sm:$0xff] %v117_v0 }
  0x13 PF: > { %p514_p6 = scmp.ge.s32.totalorder %s628_s13, 1  ;;  %p123_p7 = scmp.lt.s32.totalorder %s628_s13, 3 }
  0x15   : > { %p124_p8 = pnand %p514_p6, %p123_p7 }
  0x17   : > { %127 = sbr.rel (%p124_p8) target bundleno = 336 (0x150), region = 54 }
  0x1c   : > { %s130_s5 = sand.u32 1, %s506_s15   ;;  %s144_s6 = sand.u32 1, %s612_s9   ;;  %v634_v2 = vmov 0.0  }
  0x1d   : > { %s515_s7 = sshll.u32 %s130_s5, 3  ;;  %s703_s8 = sshll.u32 %s144_s6, 1 }
  0x1e   : > { %s153_s16 = sand.u32 7, %s620_s11   ;;  %s132_s17 = scalar_lea.vmem [#allocation0], %s515_s7 }
  0x1f   : > { %v155_v1 = vld [vmem:[%s132_s17] sm:$0xff]  ;;  %s706_s18 = scalar_lea.vmem [#allocation1], %s515_s7  ;;  %s709_s19 = scalar_lea.vmem [#allocation2], %s153_s16 }
  0x20   : > { %156 = vst [vmem:[%s706_s18] sm:$0xff] %v155_v1  ;;  %157 = vst [vmem:[%s709_s19] sm:$0x1] %v634_v2  ;;  %s146_s15 = scalar_lea.vmem [#allocation3], %s703_s8  ;;  %s713_s20 = smov 0  }
  0x21 LB: >> { %v165_v3 = vlaneseq  ;;  %v722_v5 = vstv %s632_s20  ;;  %s192_s9 = scalar_lea.vmem %s706_s18, %s632_s20 [#allocation1]  ;;  %s250_s21 = scalar_lea.vmem [#allocation4], %s632_s20  ;;  %v635_v59 = vmov 1.0   ;;  %s632_s20 = sphi %s713_s20, %s163_s20  }
  0x22   : >> { %s267_s23 = smov [#allocation4] }
  0x23   : >> { %v719_v4 = vshrl.u32 %v165_v3, 7  ;;  %v244_v48 = vand.u32 127, %v165_v3 }
  0x25   : >> { %vm169_vm0 = vcmp.gt.s32.totalorder %v719_v4, %v722_v5  ;;  %vm170_vm1 = vcmp.lt.s32.totalorder %v719_v4, 6  ;;  %v231_v4 = vmov %v719_v4  ;;  %vm740_vm12 = vcmp.eq.s32.totalorder %v244_v48, %v722_v5 }
  0x26   : >> { %vm171_vm2 = vmand %vm169_vm0, %vm170_vm1  ;;  %vm235_vm9 = vcmp.gt.s32.totalorder %v231_v4, %v722_v5  ;;  %vm236_vm10 = vcmp.lt.s32.totalorder %v231_v4, 6  ;;  %v270_v4 = vmov %v719_v4  ;;  %vm296_vm15 = vcmp.gt.s32.totalorder %v244_v48, %v722_v5 }
  0x27   : >> { %v164_v6 = vld [vmem:[%s706_s18] sm:$0xff]  ;;  %v193_v15 = vld [vmem:[%s192_s9] ss:$0 sm:$0xff]  ;;  %s228_s18 = smov %s706_s18  ;;  %vm237_vm11 = vmand %vm235_vm9, %vm236_vm10  ;;  %vm275_vm13 = vcmp.lt.s32.totalorder %v270_v4, 6  ;;  %v287_v4 = vmov %v719_v4 }
  0x28   : >> { %v172_v7 = vsel %vm171_vm2, %v164_v6, 0.0  ;;  %v194_v16 = vand.u32 2147483647, %v193_v15  ;;  %vm219_vm8 = vcmp.lt.f32.partialorder %v193_v15, 0.0  ;;  %v232_v45 = vld [vmem:[%s228_s18] sm:$0xff]  ;;  %s266_s18 = smov %s706_s18  ;;  %vm304_vm14 = vcmp.ge.s32.totalorder %v287_v4, %v722_v5 }
  0x29   : >> { %v173_v8 = vmul.f32 %v172_v7, %v172_v7  ;;  %v238_v49 = vsel %vm237_vm11, %v232_v45, 0.0  ;;  %v263_v60 = vld [vmem:[%s709_s19] ss:$0 sm:$0xff]  ;;  %vm305_vm0 = vmand %vm740_vm12, %vm304_vm14 }
  0x2a   : >> { %v195_v21 = vmax.f32 %v194_v16, 0.0  ;;  %v273_v63 = vld [vmem:[%s266_s18] sm:$0xff]  ;;  %s283_s18 = smov %s266_s18 }
  0x2b   : >> { %v174_v9 = vrot.slane %v173_v8, 4  ;;  %s308_s24 = scalar_lea.vmem %s283_s18, %s632_s20  ;;  %s163_s20 = sadd.s32 1, %s632_s20  }
  0x2c   : >> { %p160_p9 = scmp.ge.s32.totalorder %s163_s20, 3  }
  0x2d   : >> { %v175_v10 = vadd.f32 %v174_v9, %v173_v8  ;;  %s521_s26 = sshll.u32 (%p160_p9), %s620_s11, 3 }
  0x2e   : > { %s335_s29 = scalar_lea.vmem (%p160_p9), %s802_s1, %s521_s26 }
  0x2f   : >> { %v176_v11 = vrot.slane %v175_v10, 2 }
  0x31   : >> { %v177_v12 = vadd.f32 %v176_v11, %v175_v10 }
  0x33   : >> { %v178_v13 = vrot.slane %v177_v12, 1 }
  0x35   : >> { %v179_v14 = vadd.f32 %v178_v13, %v177_v12  ;;  %v294_v13 = vld [vmem:[%s283_s18] sm:$0xff] }
  0x37   : >> { %576 = vrsqrt.f32 %v179_v14  ;;  %vm182_vm3 = vcmp.eq.f32.partialorder %v179_v14, inf  ;;  %v185_v18 = vand.u32 2147483648, %v179_v14  ;;  %vm184_vm4 = vcmp.eq.f32.partialorder %v179_v14, 0.0 }
  0x44   : >> { %v577_v17 = vpop.eup %576 }
  0x45   : >> { %v181_v19 = vmul.f32 %v577_v17, %v179_v14 }
  0x47   : >> { %v183_v20 = vsel %vm182_vm3, %v179_v14, %v181_v19 }
  0x48   : >> { %v186_v22 = vsel %vm184_vm4, %v185_v18, %v183_v20 }
  0x49   : >> { %v196_v23 = vand.u32 2147483647, %v186_v22 }
  0x4b   : >> { %v197_v24 = vmax.f32 %v195_v21, %v196_v23 }
  0x4d   : >> { %578 = vrcp.f32 %v197_v24  ;;  %vm209_vm7 = vcmp.eq.f32.partialorder %v197_v24, 0.0 }
  0x5a   : >> { %v579_v25 = vpop.eup %578 }
  0x5b   : >> { %v199_v26 = vmul.f32 %v579_v25, %v194_v16  ;;  %v202_v27 = vmul.f32 0.0, %v579_v25  ;;  %v206_v28 = vmul.f32 %v579_v25, %v196_v23 }
  0x5d   : >> { %v200_v29 = vmul.f32 %v199_v26, %v199_v26  ;;  %v203_v30 = vmul.f32 %v202_v27, %v202_v27  ;;  %v207_v31 = vmul.f32 %v206_v28, %v206_v28 }
  0x5f   : >> { %v204_v32 = vadd.f32 %v203_v30, %v200_v29 }
  0x61   : >> { %v208_v33 = vadd.f32 %v207_v31, %v204_v32 }
  0x63   : >> { %580 = vrsqrt.f32 %v208_v33  ;;  %vm212_vm5 = vcmp.eq.f32.partialorder %v208_v33, inf  ;;  %v215_v35 = vand.u32 2147483648, %v208_v33  ;;  %vm214_vm6 = vcmp.eq.f32.partialorder %v208_v33, 0.0 }
  0x70   : >> { %v581_v34 = vpop.eup %580 }
  0x71   : >> { %v211_v36 = vmul.f32 %v581_v34, %v208_v33 }
  0x73   : >> { %v213_v37 = vsel %vm212_vm5, %v208_v33, %v211_v36 }
  0x74   : >> { %v216_v38 = vsel %vm214_vm6, %v215_v35, %v213_v37 }
  0x75   : >> { %v217_v39 = vmul.f32 %v216_v38, %v197_v24 }
  0x77   : >> { %v218_v40 = vsel %vm209_vm7, 0.0, %v217_v39 }
  0x78   : >> { %v220_v41 = vxor.u32 2147483648, %v218_v40 }
  0x7a   : >> { %v221_v42 = vsel %vm219_vm8, %v218_v40, %v220_v41 }
  0x7b   : >> { %v732_v43 = vsel %vm184_vm4, %v193_v15, %v221_v42  ;;  %582 = vrcp.f32 %v221_v42  ;;  %v222_v46 = vsub.f32 %v221_v42, %v193_v15 }
  0x7c   : >> { %v227_v44 = vsub.f32 %v193_v15, %v732_v43 }
  0x7e   : >> { %584 = vrcp.f32 %v227_v44 }
  0x88   : >> { %v583_v47 = vpop.eup %582 }
  0x89   : >> { %v224_v50 = vmul.f32 %v583_v47, %v222_v46 }
  0x8b   : >> { %v585_v51 = vpop.eup %584  ;;  %v226_v55 = vsel %vm184_vm4, 0.0, %v224_v50 }
  0x8c   : >> { %v240_v52 = vmul.f32 %v585_v51, %v238_v49  ;;  %v256_v57 = vsel %vm740_vm12, %v226_v55, 0.0 }
  0x8e   : >> { %v241_v54 = vsel %vm184_vm4, 0.0, %v240_v52 }
  0x8f   : >> { %v246_v56 = vsel %vm740_vm12, %v241_v54, 0.0 }
  0x90   : >> { %247 = vadd.xlane.f32.xlu0 %v246_v56 }
  0x94   : >> { %257 = vadd.xlane.f32.xlu0 %v256_v57 }
 0x119   : >> { %v248_v58 = vpop.xlane.xlu0 %247 }
 0x11a   : >> { %249 = vst [vmem:[#allocation4] sm:$0xff] %v248_v58 }
 0x11b   : >> { %251 = vst [vmem:[%s250_s21] sm:$0x1] %v635_v59 }
 0x11d   : >> { %v258_v61 = vpop.xlane.xlu0 %257 }
 0x11e   : >> { %v264_v62 = vsel %vm740_vm12, %v258_v61, %v263_v60 }
 0x11f   : >> { %265 = vst [vmem:[%s709_s19] sm:$0x1] %v264_v62 }
 0x122   : >> { %v272_v0 = vld [vmem:[%s267_s23] sm:$0xff]  ;;  %s284_s23 = smov %s267_s23 }
 0x123   : >> { %v274_v1 = vmul.f32 %v273_v63, %v272_v0  ;;  %v292_v12 = vld [vmem:[%s284_s23] sm:$0xff] }
 0x125   : >> { %v276_v2 = vsel %vm275_vm13, %v274_v1, 0.0 }
 0x126   : >> { %v277_v3 = vrot.slane %v276_v2, 4  ;;  %v320_v4 = vld [vmem:[#allocation2] sm:$0x3] (%p160_p9) }
 0x127   : > { %323 = vst [vmem:[%s146_s15] sm:$0x3] (%p160_p9), %v320_v4 }
 0x128   : >> { %v278_v6 = vadd.f32 %v277_v3, %v276_v2 }
 0x12a   : >> { %v279_v7 = vrot.slane %v278_v6, 2 }
 0x12c   : >> { %v280_v8 = vadd.f32 %v279_v7, %v278_v6 }
 0x12e   : >> { %v281_v9 = vrot.slane %v280_v8, 1 }
 0x130   : >> { %v282_v10 = vadd.f32 %v281_v9, %v280_v8 }
 0x132   : >> { %v288_v11 = vmul.f32 %v282_v10, %v258_v61 }
 0x134   : >> { %v293_v14 = vmul.f32 %v292_v12, %v288_v11 }
 0x136   : >> { %v297_v15 = vsub.f32 %v294_v13, %v293_v14 }
 0x138   : >> { %v298_v16 = vsel %vm296_vm15, %v297_v15, %v294_v13 }
 0x139   : >> { %v306_v17 = vsel %vm305_vm0, %v292_v12, %v298_v16 }
 0x13a   : >> { %307 = vst [vmem:[%s283_s18] sm:$0xff] %v306_v17 }
 0x13f   : > { %162 = sbr.rel (!%p160_p9) target bundleno = 33 (0x21), region = 175 }
 0x141   : >> { %v309_v18 = vld [vmem:[%s308_s24] ss:$0 sm:$0xff] }
 0x142   : >> { %v314_v19 = vsel %vm740_vm12, %v732_v43, %v309_v18 }
 0x143   : >> { %315 = vst [vmem:[%s308_s24] sm:$0x1] %v314_v19 }
 0x144   : > { %p372_p10 = scmp.lt.s32.totalorder (%p686_p3), %s620_s11, 0  ;;  %s373_s30 = ssub.s32 (%p686_p3), 0, %s620_s11  ;;  %v396_v20 = vld [vmem:[%s146_s15] sm:$0x3] (%p686_p3) }
 0x145   : > { %s522_s3 = smin.u32 (%p686_p3), %s620_s11, %s373_s30 }
 0x146   : > { %s375_s4 = sshrl.u32 (%p686_p3), %s522_s3, 3 }
 0x147   : > { %371 = sbr.rel (!%p686_p3) target bundleno = 336 (0x150), region = 99  ;;  %s376_s5 = ssub.s32 (%p686_p3), 0, %s375_s4 }
 0x14a   : > { %v364_v5 = vld [vmem:[%s706_s18] sm:$0xff] }
 0x14b   : > { %365 = vst [vmem:[%s335_s29] sm:$0xff] %v364_v5 }
 0x14c   : > { %s814_s5 = smov (!%p372_p10, %s376_s5), %s375_s4 }
 0x14d   : > { %s523_s6 = sshll.u32 %s814_s5, 1 }
 0x14e   : > { %s379_s17 = scalar_lea.vmem %s803_s2, %s523_s6 }
 0x14f   : > { %397 = vst [vmem:[%s379_s17] sm:$0x3] %v396_v20 }
 0x150 PF: > { %s9_s13 = sadd.s32 1, %s628_s13   ;;  %s807_s9 = smov %s616_s10 }
 0x151   : > { %p6_p11 = scmp.ge.s32.totalorder %s9_s13, 4   ;;  %s808_s10 = smov %s692_s25 }
 0x152   : > { %s809_s11 = smov %s624_s12  ;;  %s810_s12 = smov %s812_s14 }
 0x153   :  { %8 = sbr.rel (!%p6_p11) target bundleno = 3 (0x3), region = 186 }

// kernel: custom-call.58
= control target key start
LH: loop header
LB: loop body
LE: loop exit
PB: predicated region body
PF: predicated region fallthrough
CT: control target
= control target key end

     0   :  { %s243_s6 = smov 0   ;;  %s270_s0 = inlined_call_operand.vmem [shape: f32[2,3,3], index: 0, kind: input, shape index: {}]   ;;  %s271_s1 = inlined_call_operand.vmem [shape: f32[2,3,3], index: 1, kind: output, shape index: {}]  }
   0x1 LB: > { %s205_s7 = sadd.s32 4294967295, %s231_s6   ;;  %p207_p0 = scmp.ge.s32.totalorder %s231_s6, 2  ;;  %s231_s6 = sphi %s243_s6, %s7_s6  }
   0x2   : > { %s23_s8 = sand.u32 (!%p207_p0), 1, %s231_s6   ;;  %s209_s9 = sshll.u32 (!%p207_p0), %s231_s6, 2 }
   0x3   : > { %21 = sbr.rel (%p207_p0) target bundleno = 10 (0xa), region = 16  ;;  %s208_s10 = sshll.u32 (!%p207_p0), %s23_s8, 2 }
   0x4   : > { %s27_s13 = scalar_lea.vmem (!%p207_p0), %s270_s0, %s209_s9  ;;  %s25_s14 = scalar_lea.vmem (!%p207_p0), [#allocation1], %s208_s10 }
   0x8   : > { %v44_v0 = vld [vmem:[%s27_s13] sm:$0xf] }
   0x9   : > { %45 = vst [vmem:[%s25_s14] sm:$0xf] %v44_v0 }
   0xa PF: > { %p210_p1 = scmp.ge.s32.totalorder %s231_s6, 1  ;;  %p62_p2 = scmp.lt.s32.totalorder %s231_s6, 3 }
   0xc   : > { %p63_p3 = pnand %p210_p1, %p62_p2 }
   0xd   : > { %s259_s15 = sand.u32 (!%p63_p3), 1, %s205_s7   ;;  %s214_s19 = sshll.u32 (!%p63_p3), %s205_s7, 2 }
   0xe   : > { %66 = sbr.rel (%p63_p3) target bundleno = 329 (0x149), region = 50  ;;  %s211_s16 = sshll.u32 (!%p63_p3), %s259_s15, 2 }
   0xf   : > { %s75_s17 = scalar_lea.vmem (!%p63_p3), [#allocation1], %s211_s16  ;;  %s79_s18 = scalar_lea.vmem (!%p63_p3), [#allocation3], %s211_s16 }
  0x10   : > { %s133_s22 = scalar_lea.vmem (!%p63_p3), %s271_s1, %s214_s19 }
  0x13   : > { %v85_v1 = vlaneseq  ;;  %v83_v2 = vld [vmem:[%s75_s17] sm:$0xf]  ;;  %vm99_vm1 = vcmask 23552  }
  0x14   : > { %84 = vst [vmem:[#allocation0] sm:$0xf] %v83_v2 }
  0x15   : > { %v86_v3 = vand.u32 127, %v85_v1  ;;  %v88_v4 = vshrl.u32 %v85_v1, 7 }
  0x17   : > { %vm94_vm0 = vcmp.eq.s32.totalorder %v86_v3, 0  ;;  %vm90_vm2 = vcmp.eq.s32.totalorder %v86_v3, %v88_v4  ;;  %vm103_vm3 = vcmp.eq.s32.totalorder %v86_v3, 1  ;;  %vm114_vm4 = vcmp.eq.s32.totalorder %v86_v3, 2 }
  0x1b   : > { %v91_v5 = vld [vmem:[#allocation0] sm:$0xff] }
  0x1c   : > { %v98_v6 = vld [vmem:[#allocation0 + $0x1] ss:$0 sm:$0xff]  ;;  %v95_v7 = vsel %vm94_vm0, %v91_v5, 1.0  ;;  %v109_v11 = vld [vmem:[#allocation0 + $0x2] ss:$0 sm:$0xff] }
  0x1d   : > { %v100_v8 = vsel %vm99_vm1, %v98_v6, 0.0  ;;  %v96_v9 = vsel %vm90_vm2, %v95_v7, 0.0  ;;  %v111_v12 = vsel %vm99_vm1, %v109_v11, 0.0 }
  0x1e   : > { %v104_v10 = vmul.f32 %v100_v8, %v96_v9 }
  0x20   : > { %105 = vadd.xlane.f32.xlu0 %v104_v10 }
  0xa9   : > { %v106_v13 = vpop.xlane.xlu0 %105 }
  0xaa   : > { %v107_v14 = vsel %vm103_vm3, %v106_v13, %v96_v9 }
  0xab   : > { %v115_v15 = vmul.f32 %v111_v12, %v107_v14 }
  0xad   : > { %116 = vadd.xlane.f32.xlu0 %v115_v15 }
 0x136   : > { %v117_v16 = vpop.xlane.xlu0 %116 }
 0x137   : > { %v118_v17 = vsel %vm114_vm4, %v117_v16, %v107_v14 }
 0x138   : > { %119 = vst [vmem:[#allocation2] sm:$0xff] %v118_v17 }
 0x13f   : > { %v124_v18 = vld [vmem:[#allocation2] sm:$0xf] }
 0x140   : > { %127 = vst [vmem:[%s79_s18] sm:$0xf] %v124_v18 }
 0x147   : > { %v150_v19 = vld [vmem:[%s79_s18] sm:$0xf] }
 0x148   : > { %151 = vst [vmem:[%s133_s22] sm:$0xf] %v150_v19 }
 0x149 PF: > { %s7_s6 = sadd.s32 1, %s231_s6  }
 0x14a   : > { %p4_p4 = scmp.ge.s32.totalorder %s7_s6, 4  }
 0x14c   :  { %6 = sbr.rel (!%p4_p4) target bundleno = 1 (0x1), region = 112 }

// kernel: dvmnet_forward.3
= control target key start
LH: loop header
LB: loop body
LE: loop exit
PB: predicated region body
PF: predicated region fallthrough
CT: control target
= control target key end

     0   :  { %s982_s15 = smov 0   ;;  %s1052_s0 = inlined_call_operand.vmem [shape: f32[2,64,8], index: 0, kind: input, shape index: {}]   ;;  %s1053_s1 = inlined_call_operand.vmem [shape: f32[2,8,64], index: 1, kind: input, shape index: {}]   ;;  %s1054_s2 = inlined_call_operand.vmem [shape: f32[2,8,64], index: 2, kind: input, shape index: {}]   ;;  %s1055_s3 = inlined_call_operand.vmem [shape: f32[2,3,3], index: 3, kind: output, shape index: {0}]   ;;  %s1056_s4 = inlined_call_operand.vmem [shape: f32[2,3,1], index: 4, kind: output, shape index: {1}]  }
   0x1 LB: > { %s807_s16 = sadd.s32 4294967295, %s953_s15   ;;  %p811_p0 = scmp.ge.s32.totalorder %s953_s15, 1  ;;  %s953_s15 = sphi %s982_s15, %s15_s15  }
   0x2   : > { %p183_p1 = scmp.lt.s32.totalorder %s953_s15, 3 }
   0x4   : > { %p184_p2 = pnand %p811_p0, %p183_p1 }
   0x5   : > { %p220_p3 = scmp.lt.s32.totalorder (!%p184_p2), %s807_s16, 1 }
   0x6   : > { %187 = sbr.rel (%p184_p2) target bundleno = 1160 (0x488), region = 32 }
   0xb   : > { %s1058_s16 = smov (!%p220_p3, %s807_s16), 1  ;;  %vm250_vm0 = vcmask 64512   ;;  %vm388_vm1 = vcmask 523264   ;;  %vm956_vm2 = vmmov 0   ;;  %vm590_vm3 = vcmask 521221  }
   0xc   : > { %s840_s17 = sshll.u32 %s1058_s16, 6  ;;  %s814_s18 = sshll.u32 %s1058_s16, 3  ;;  %vm602_vm4 = vcmask 518144   ;;  %vm697_vm5 = vcmask 2048   ;;  %vm695_vm6 = vcmask 18432  }
   0xd   : > { %s224_s21 = scalar_lea.vmem %s1052_s0, %s840_s17  ;;  %s228_s24 = scalar_lea.vmem %s1053_s1, %s814_s18 }
   0xe   : > { %v249_v0 = vld [vmem:[%s228_s24] sm:$0xff]  ;;  %v242_v2 = vld [vmem:[%s224_s21 + $0x8] sm:$0xff]  ;;  %v243_v3 = vld [vmem:[%s224_s21 + $0x10] sm:$0xff]  ;;  %s232_s27 = scalar_lea.vmem %s1054_s2, %s814_s18  ;;  %s816_s28 = sshll.u32 %s1058_s16, 2 }
   0xf   : > { %v241_v1 = vld [vmem:[%s224_s21] sm:$0xff]  ;;  %861 = vmatprep.subr.mxu0 %v249_v0  ;;  %v244_v4 = vld [vmem:[%s224_s21 + $0x18] sm:$0xff]  ;;  %v246_v6 = vld [vmem:[%s224_s21 + $0x28] sm:$0xff]  ;;  %s240_s5 = scalar_lea.vmem %s1056_s4, %s816_s28  ;;  %s236_s8 = scalar_lea.vmem %s1055_s3, %s816_s28 }
  0x10   : > { %863 = vmatprep.mubr.msk.f32.mxu0 %vm250_vm0, %v241_v1  ;;  %862 = vmatpush3.msra.mxu0 %v249_v0  ;;  %v245_v5 = vld [vmem:[%s224_s21 + $0x20] sm:$0xff]  ;;  %v247_v7 = vld [vmem:[%s224_s21 + $0x30] sm:$0xff]  ;;  %v248_v8 = vld [vmem:[%s224_s21 + $0x38] sm:$0xff] }
  0x11   : > { %864 = vmatmul.mubr.msk.f32.vlgmr.msra.gmra.mxu0 %vm250_vm0, %v242_v2 }
  0x12   : > { %866 = vmatprep.mubr.msk.f32.mxu0 %vm250_vm0, %v243_v3 }
  0x15   : > { %867 = vmatmul.mubr.msk.f32.gmra.mxu0 %vm250_vm0, %v244_v4 }
  0x16   : > { %869 = vmatprep.mubr.msk.f32.mxu0 %vm250_vm0, %v245_v5 }
  0x19   : > { %870 = vmatmul.mubr.msk.f32.gmra.mxu0 %vm250_vm0, %v246_v6 }
  0x1a   : > { %872 = vmatprep.mubr.msk.f32.mxu0 %vm250_vm0, %v247_v7 }
  0x1d   : > { %873 = vmatmul.mubr.msk.f32.gmra.mxu0 %vm250_vm0, %v248_v8 }
  0xd1   : > { %v865_v9 = vpop.f32.mrf.mxu0 }
  0xd2   : > { %v381_v29 = vmul.f32 0.35355338, %v865_v9  ;;  %v955_v9 = vmov 0.0  }
  0xd3   : > { %v341_v10 = vpop.f32.mrf.mxu0  ;;  %875 = vmatprep.subr.mxu1 %v955_v9  ;;  %894 = vmatprep.subr.mxu0 %v955_v9 }
  0xd4   : > { %v380_v25 = vmul.f32 0.35355338, %v341_v10  ;;  %v392_v32 = vsel %vm388_vm1, %v381_v29, -inf  ;;  %891 = vmatprep.mubr.msk.f32.mxu1 %vm956_vm2, %v955_v9  ;;  %896 = vmatprep.mubr.msk.f32.mxu0 %vm956_vm2, %v955_v9 }
  0xd5   : > { %v868_v11 = vpop.f32.mrf.mxu0 }
  0xd6   : > { %v383_v26 = vmul.f32 0.35355338, %v868_v11  ;;  %v389_v30 = vsel %vm388_vm1, %v380_v25, -inf }
  0xd7   : > { %v351_v12 = vpop.f32.mrf.mxu0 }
  0xd8   : > { %v382_v21 = vmul.f32 0.35355338, %v351_v12  ;;  %v398_v31 = vsel %vm388_vm1, %v383_v26, -inf }
  0xd9   : > { %v871_v13 = vpop.f32.mrf.mxu0 }
  0xda   : > { %v385_v14 = vmul.f32 0.35355338, %v871_v13  ;;  %v395_v27 = vsel %vm388_vm1, %v382_v21, -inf }
  0xdb   : > { %v361_v15 = vpop.f32.mrf.mxu0 }
  0xdc   : > { %v384_v16 = vmul.f32 0.35355338, %v361_v15  ;;  %v404_v17 = vsel %vm388_vm1, %v385_v14, -inf }
  0xdd   : > { %405 = vmax.xlane.f32.xlu1 %v404_v17  ;;  %v874_v18 = vpop.f32.mrf.mxu0 }
  0xde   : > { %v387_v19 = vmul.f32 0.35355338, %v874_v18  ;;  %v401_v23 = vsel %vm388_vm1, %v384_v16, -inf }
  0xdf   : > { %v371_v20 = vpop.f32.mrf.mxu0 }
  0xe0   : > { %v386_v22 = vmul.f32 0.35355338, %v371_v20  ;;  %v410_v24 = vsel %vm388_vm1, %v387_v19, -inf }
  0xe1   : > { %402 = vmax.xlane.f32.xlu1 %v401_v23  ;;  %411 = vmax.xlane.f32.xlu0 %v410_v24 }
  0xe2   : > { %v407_v28 = vsel %vm388_vm1, %v386_v22, -inf }
  0xe5   : > { %396 = vmax.xlane.f32.xlu1 %v395_v27  ;;  %408 = vmax.xlane.f32.xlu0 %v407_v28 }
  0xe9   : > { %390 = vmax.xlane.f32.xlu1 %v389_v30  ;;  %399 = vmax.xlane.f32.xlu0 %v398_v31 }
  0xed   : > { %393 = vmax.xlane.f32.xlu0 %v392_v32 }
 0x166   : > { %v406_v33 = vpop.xlane.xlu1 %405 }
 0x167   : > { %v418_v34 = vsub.f32 %v385_v14, %v406_v33 }
 0x169   : > { %v431_v39 = vmul.f32 1.442695, %v418_v34  ;;  %v477_v34 = vld [vmem:[%s232_s27] sm:$0xff] }
 0x16a   : > { %v403_v35 = vpop.xlane.xlu1 %402  ;;  %v412_v36 = vpop.xlane.xlu0 %411 }
 0x16b   : > { %v420_v37 = vsub.f32 %v387_v19, %v412_v36  ;;  %v417_v40 = vsub.f32 %v384_v16, %v403_v35 }
 0x16d   : > { %v435_v38 = vmul.f32 1.442695, %v420_v37  ;;  %v429_v45 = vmul.f32 1.442695, %v417_v40 }
 0x16e   : > { %v397_v41 = vpop.xlane.xlu1 %396  ;;  %v409_v42 = vpop.xlane.xlu0 %408 }
 0x16f   : > { %v419_v43 = vsub.f32 %v386_v22, %v409_v42  ;;  %909 = vpow2.f32 %v435_v38  ;;  %v415_v46 = vsub.f32 %v382_v21, %v397_v41 }
 0x170   : > { %911 = vpow2.f32 %v431_v39 }
 0x171   : > { %v433_v44 = vmul.f32 1.442695, %v419_v43  ;;  %v425_v51 = vmul.f32 1.442695, %v415_v46 }
 0x172   : > { %v400_v47 = vpop.xlane.xlu0 %399  ;;  %v391_v48 = vpop.xlane.xlu1 %390 }
 0x173   : > { %v416_v49 = vsub.f32 %v383_v26, %v400_v47  ;;  %913 = vpow2.f32 %v433_v44  ;;  %v413_v52 = vsub.f32 %v380_v25, %v391_v48  ;;  %v603_v48 = vsel %vm602_vm4, %v477_v34, 0.0 }
 0x174   : > { %915 = vpow2.f32 %v429_v45 }
 0x175   : > { %v427_v50 = vmul.f32 1.442695, %v416_v49  ;;  %v421_v56 = vmul.f32 1.442695, %v413_v52 }
 0x176   : > { %v394_v53 = vpop.xlane.xlu0 %393 }
 0x177   : > { %v414_v54 = vsub.f32 %v381_v29, %v394_v53  ;;  %917 = vpow2.f32 %v427_v50 }
 0x178   : > { %919 = vpow2.f32 %v425_v51 }
 0x179   : > { %v423_v55 = vmul.f32 1.442695, %v414_v54 }
 0x17b   : > { %921 = vpow2.f32 %v423_v55 }
 0x17c   : > { %v910_v57 = vpop.eup %909  ;;  %923 = vpow2.f32 %v421_v56 }
 0x17d   : > { %v458_v58 = vsel %vm388_vm1, %v910_v57, 0.0  ;;  %v912_v59 = vpop.eup %911 }
 0x17e   : > { %459 = vadd.xlane.f32.xlu0 %v458_v58  ;;  %v452_v61 = vsel %vm388_vm1, %v912_v59, 0.0 }
 0x180   : > { %v914_v60 = vpop.eup %913 }
 0x181   : > { %v455_v62 = vsel %vm388_vm1, %v914_v60, 0.0  ;;  %v916_v63 = vpop.eup %915 }
 0x182   : > { %453 = vadd.xlane.f32.xlu0 %v452_v61  ;;  %456 = vadd.xlane.f32.xlu1 %v455_v62  ;;  %v449_v1 = vsel %vm388_vm1, %v916_v63, 0.0 }
 0x184   : > { %v918_v0 = vpop.eup %917 }
 0x185   : > { %v446_v2 = vsel %vm388_vm1, %v918_v0, 0.0  ;;  %v920_v3 = vpop.eup %919 }
 0x186   : > { %450 = vadd.xlane.f32.xlu1 %v449_v1  ;;  %447 = vadd.xlane.f32.xlu0 %v446_v2  ;;  %v443_v6 = vsel %vm388_vm1, %v920_v3, 0.0 }
 0x188   : > { %v922_v4 = vpop.eup %921 }
 0x189   : > { %v440_v5 = vsel %vm388_vm1, %v922_v4, 0.0  ;;  %v924_v7 = vpop.eup %923 }
 0x18a   : > { %444 = vadd.xlane.f32.xlu1 %v443_v6  ;;  %441 = vadd.xlane.f32.xlu0 %v440_v5  ;;  %v437_v8 = vsel %vm388_vm1, %v924_v7, 0.0 }
 0x18e   : > { %438 = vadd.xlane.f32.xlu1 %v437_v8 }
 0x207   : > { %v460_v10 = vpop.xlane.xlu0 %459 }
 0x208   : > { %925 = vrcp.f32 %v460_v10 }
 0x20b   : > { %v457_v11 = vpop.xlane.xlu1 %456  ;;  %v454_v12 = vpop.xlane.xlu0 %453 }
 0x20c   : > { %927 = vrcp.f32 %v457_v11 }
 0x20d   : > { %929 = vrcp.f32 %v454_v12 }
 0x20f   : > { %v451_v13 = vpop.xlane.xlu1 %450  ;;  %v448_v14 = vpop.xlane.xlu0 %447 }
 0x210   : > { %931 = vrcp.f32 %v451_v13 }
 0x211   : > { %933 = vrcp.f32 %v448_v14 }
 0x213   : > { %v445_v17 = vpop.xlane.xlu1 %444  ;;  %v442_v21 = vpop.xlane.xlu0 %441 }
 0x214   : > { %935 = vrcp.f32 %v445_v17 }
 0x215   : > { %v926_v15 = vpop.eup %925  ;;  %937 = vrcp.f32 %v442_v21 }
 0x216   : > { %v476_v16 = vmul.f32 %v926_v15, %v910_v57  ;;  %v614_v57 = vlaneseq }
 0x217   : > { %v439_v24 = vpop.xlane.xlu1 %438 }
 0x218   : > { %876 = vmatpush3.xpose.msk.msra.mxu1 %vm388_vm1, %v476_v16  ;;  %939 = vrcp.f32 %v439_v24 }
 0x219   : > { %v928_v18 = vpop.eup %927  ;;  %877 = vmatprep.subr.mxu1 %v955_v9 }
 0x21a   : > { %v475_v19 = vmul.f32 %v928_v18, %v914_v60  ;;  %v930_v20 = vpop.eup %929 }
 0x21b   : > { %v474_v22 = vmul.f32 %v930_v20, %v912_v59  ;;  %v615_v59 = vshrl.u32 %v614_v57, 7 }
 0x21c   : > { %878 = vmatpush3.xpose.msk.msra.mxu1 %vm388_vm1, %v475_v19 }
 0x21d   : > { %879 = vmatprep.subr.mxu1 %v955_v9  ;;  %v932_v23 = vpop.eup %931  ;;  %v616_v62 = vsub.s32 5, %v615_v59 }
 0x21e   : > { %v473_v25 = vmul.f32 %v932_v23, %v916_v63  ;;  %v934_v26 = vpop.eup %933 }
 0x21f   : > { %v472_v27 = vmul.f32 %v934_v26, %v918_v0 }
 0x220   : > { %880 = vmatpush3.xpose.msk.msra.mxu1 %vm388_vm1, %v474_v22 }
 0x221   : > { %881 = vmatprep.subr.mxu1 %v955_v9  ;;  %v936_v28 = vpop.eup %935 }
 0x222   : > { %v471_v29 = vmul.f32 %v936_v28, %v920_v3  ;;  %v938_v30 = vpop.eup %937 }
 0x223   : > { %v470_v31 = vmul.f32 %v938_v30, %v922_v4 }
 0x224   : > { %882 = vmatpush3.xpose.msk.msra.mxu1 %vm388_vm1, %v473_v25 }
 0x225   : > { %883 = vmatprep.subr.mxu1 %v955_v9  ;;  %v940_v32 = vpop.eup %939 }
 0x226   : > { %v469_v33 = vmul.f32 %v940_v32, %v924_v7 }
 0x228   : > { %884 = vmatpush3.xpose.msk.msra.mxu1 %vm388_vm1, %v472_v27 }
 0x229   : > { %885 = vmatprep.subr.mxu1 %v955_v9 }
 0x22c   : > { %886 = vmatpush3.xpose.msk.msra.mxu1 %vm388_vm1, %v471_v29 }
 0x22d   : > { %887 = vmatprep.subr.mxu1 %v955_v9 }
 0x230   : > { %888 = vmatpush3.xpose.msk.msra.mxu1 %vm388_vm1, %v470_v31 }
 0x231   : > { %889 = vmatprep.subr.mxu1 %v955_v9 }
 0x234   : > { %890 = vmatpush3.xpose.msk.msra.mxu1 %vm388_vm1, %v469_v33 }
 0x237   : > { %892 = vmatmul.mubr.msk.f32.vlgmr.msra.gmra.mxu1 %vm388_vm1, %v477_v34 }
 0x2f7   : > { %v571_v35 = vpop.f32.mrf.mxu1 }
 0x2f8   : > { %v576_v36 = vrot.slane %v571_v35, 6  ;;  %v609_v49 = vsel %vm602_vm4, %v571_v35, 0.0 }
 0x2f9   : > { %v893_v37 = vpop.f32.mrf.mxu1 }
 0x2fa   : > { %v578_v38 = vadd.f32 %v576_v36, %v477_v34 }
 0x2fc   : > { %v835_v39 = vmul.f32 -0.5, %v578_v38 }
 0x2fe   : > { %v581_v40 = vmul.f32 1.442695, %v835_v39 }
 0x300   : > { %941 = vpow2.f32 %v581_v40 }
 0x30d   : > { %v942_v41 = vpop.eup %941 }
 0x30e   : > { %v583_v42 = vadd.f32 1.0, %v942_v41 }
 0x310   : > { %943 = vrcp.f32 %v583_v42 }
 0x31d   : > { %v944_v43 = vpop.eup %943 }
 0x31e   : > { %v587_v44 = vrot.slane %v944_v43, 1 }
 0x320   : > { %v589_v45 = vmul.f32 %v944_v43, %v587_v44 }
 0x322   : > { %v594_v46 = vsel %vm590_vm3, %v589_v45, -inf  ;;  %v591_v47 = vsel %vm590_vm3, %v589_v45, inf }
 0x323   : > { %595 = vmax.xlane.f32.xlu1 %v594_v46  ;;  %592 = vmin.xlane.f32.xlu0 %v591_v47 }
 0x327   : > { %610 = vadd.xlane.f32.xlu0 %v609_v49  ;;  %604 = vadd.xlane.f32.xlu1 %v603_v48 }
 0x3ac   : > { %v596_v50 = vpop.xlane.xlu1 %595  ;;  %v593_v51 = vpop.xlane.xlu0 %592 }
 0x3ad   : > { %v598_v52 = vsub.f32 %v596_v50, %v593_v51  ;;  %v597_v61 = vsub.f32 %v589_v45, %v593_v51 }
 0x3af   : > { %v599_v53 = vmax.f32 %v598_v52, 1e-06 }
 0x3b0   : > { %v611_v54 = vpop.xlane.xlu0 %610  ;;  %v605_v58 = vpop.xlane.xlu1 %604 }
 0x3b1   : > { %945 = vrcp.f32 %v599_v53  ;;  %v612_v55 = vmul.f32 0.015625, %v611_v54  ;;  %v607_v60 = vmul.f32 0.015625, %v605_v58 }
 0x3b3   : > { %v613_v56 = vsub.f32 %v571_v35, %v612_v55  ;;  %698 = vst.msk [vmem:[%s240_s5] sm:$0x7] %vm697_vm5, %v612_v55  ;;  %v608_v1 = vsub.f32 %v477_v34, %v607_v60 }
 0x3b5   : > { %895 = vmatpush3.xpose.msk.msra.mxu0 %vm388_vm1, %v613_v56 }
 0x3be   : > { %v946_v63 = vpop.eup %945 }
 0x3bf   : > { %v601_v0 = vmul.f32 %v946_v63, %v597_v61 }
 0x3c1   : > { %v617_v2 = vrot.slane %v601_v0, %v616_v62 }
 0x3c3   : > { %v618_v3 = vmul.f32 %v617_v2, %v608_v1 }
 0x3c5   : > { %897 = vmatmul.mubr.msk.f32.vlgmr.msra.gmra.mxu0 %vm388_vm1, %v618_v3 }
 0x485   : > { %v691_v4 = vpop.f32.mrf.mxu0 }
 0x486   : > { %696 = vst.msk [vmem:[%s236_s8] sm:$0x7] %vm695_vm6, %v691_v4 }
 0x487   : > { %v898_v5 = vpop.f32.mrf.mxu0 }
 0x488 PF: > { %s15_s15 = sadd.s32 1, %s953_s15  }
 0x489   : > { %p12_p4 = scmp.ge.s32.totalorder %s15_s15, 4  }
 0x48b   :  { %14 = sbr.rel (!%p12_p4) target bundleno = 1 (0x1), region = 80 }

// kernel: custom-call.55
= control target key start
LH: loop header
LB: loop body
LE: loop exit
PB: predicated region body
PF: predicated region fallthrough
CT: control target
= control target key end

     0   :  { %s350_s6 = smov 0   ;;  %s352_s7 = smov 0   ;;  %s397_s0 = inlined_call_operand.vmem [shape: f32[2,3,3], index: 0, kind: input, shape index: {}]   ;;  %s398_s1 = inlined_call_operand.vmem [shape: f32[2,3,3], index: 1, kind: output, shape index: {}]  }
   0x1   :  { %s354_s8 = smov 0  }
   0x2 LB: > { %s272_s9 = sadd.s32 4294967295, %s337_s8   ;;  %s26_s10 = sadd.s32 1, %s333_s7  ;;  %s337_s8 = sphi %s354_s8, %s7_s8   ;;  %s333_s7 = sphi %s352_s7, %s400_s7   ;;  %s329_s6 = sphi %s350_s6, %s399_s6  }
   0x3   : > { %p28_p0 = scmp.ge.s32.totalorder %s26_s10, 2  ;;  %p274_p1 = scmp.ge.s32.totalorder %s337_s8, 2 }
   0x4   : > { %s42_s11 = sand.u32 (!%p274_p1), 1, %s337_s8   ;;  %s276_s12 = sshll.u32 (!%p274_p1), %s333_s7, 2 }
   0x5   : > { %s402_s10 = smov (%p28_p0, %s26_s10), 0  ;;  %40 = sbr.rel (%p274_p1) target bundleno = 12 (0xc), region = 16 }
   0x6   : > { %s275_s13 = sshll.u32 (!%p274_p1), %s42_s11, 2  ;;  %s48_s16 = scalar_lea.vmem (!%p274_p1), %s397_s0, %s276_s12 }
   0x7   : > { %s44_s17 = scalar_lea.vmem (!%p274_p1), [#allocation1], %s275_s13 }
   0xa   : > { %v65_v0 = vld [vmem:[%s48_s16] sm:$0xf] }
   0xb   : > { %66 = vst [vmem:[%s44_s17] sm:$0xf] %v65_v0 }
   0xc PF: > { %p277_p2 = scmp.ge.s32.totalorder %s337_s8, 1  ;;  %p83_p3 = scmp.lt.s32.totalorder %s337_s8, 3 }
   0xe   : > { %p84_p4 = pnand %p277_p2, %p83_p3 }
   0xf   : > { %s377_s18 = sand.u32 (!%p84_p4), 1, %s272_s9   ;;  %s281_s22 = sshll.u32 (!%p84_p4), %s329_s6, 2 }
  0x10   : > { %87 = sbr.rel (%p84_p4) target bundleno = 544 (0x220), region = 50  ;;  %s278_s19 = sshll.u32 (!%p84_p4), %s377_s18, 2 }
  0x11   : > { %s96_s20 = scalar_lea.vmem (!%p84_p4), [#allocation1], %s278_s19  ;;  %s100_s21 = scalar_lea.vmem (!%p84_p4), [#allocation3], %s278_s19 }
  0x12   : > { %s184_s25 = scalar_lea.vmem (!%p84_p4), %s398_s1, %s281_s22 }
  0x15   : > { %v339_v1 = vmov 0.0   ;;  %v104_v5 = vld [vmem:[%s96_s20] sm:$0xf]  ;;  %vm107_vm0 = vcmask 7168   ;;  %vm125_vm1 = vcmask 15368   ;;  %vm142_vm2 = vcmask 1047553  }
  0x16   : > { %106 = vst [vmem:[#allocation2] sm:$0xff] %v339_v1  ;;  %105 = vst [vmem:[#allocation0] sm:$0xf] %v104_v5  ;;  %vm147_vm4 = vcmask 23568   ;;  %vm164_vm5 = vcmask 1047554  }
  0x17   : > { %vm143_vm3 = vmand %vm125_vm1, %vm142_vm2 }
  0x18   : > { %vm165_vm6 = vmand %vm147_vm4, %vm164_vm5 }
  0x1d   : > { %v108_v2 = vld [vmem:[#allocation2] ss:$0 sm:$0xff]  ;;  %v109_v6 = vld [vmem:[#allocation0] ss:$0 sm:$0xff]  ;;  %v129_v18 = vld [vmem:[#allocation0 + $0x1] ss:$0 sm:$0xff] }
  0x1e   : > { %v110_v3 = vmul.f32 %v108_v2, %v108_v2  ;;  %v117_v4 = vmul.f32 0.0, %v108_v2  ;;  %v115_v10 = vld [vmem:[#allocation0] sm:$0xff] }
  0x1f   : > { %v151_v30 = vld [vmem:[#allocation0 + $0x2] ss:$0 sm:$0xff] }
  0x20   : > { %111 = vadd.xlane.f32.xlu0 %v110_v3 }
  0x24   : > { %118 = vadd.xlane.f32.xlu0 %v117_v4 }
  0xa9   : > { %v112_v7 = vpop.xlane.xlu0 %111 }
  0xaa   : > { %v113_v8 = vsub.f32 %v109_v6, %v112_v7 }
  0xac   : > { %309 = vrsqrt.f32 %v113_v8 }
  0xad   : > { %v119_v9 = vpop.xlane.xlu0 %118 }
  0xae   : > { %v120_v11 = vsub.f32 %v115_v10, %v119_v9 }
  0xb9   : > { %v310_v12 = vpop.eup %309 }
  0xba   : > { %v121_v13 = vmul.f32 %v310_v12, %v120_v11 }
  0xbc   : > { %v122_v14 = vsel %vm107_vm0, %v121_v13, 0.0 }
  0xbd   : > { %124 = vst [vmem:[#allocation2] sm:$0xff] %v122_v14 }
  0xc4   : > { %v127_v15 = vld [vmem:[#allocation2 + $0x1] ss:$0 sm:$0xff] }
  0xc5   : > { %v130_v16 = vmul.f32 %v127_v15, %v127_v15  ;;  %v137_v17 = vmul.f32 %v127_v15, %v122_v14 }
  0xc7   : > { %131 = vadd.xlane.f32.xlu1 %v130_v16 }
  0xcb   : > { %138 = vadd.xlane.f32.xlu1 %v137_v17 }
 0x150   : > { %v132_v19 = vpop.xlane.xlu1 %131 }
 0x151   : > { %v133_v20 = vsub.f32 %v129_v18, %v132_v19 }
 0x153   : > { %311 = vrsqrt.f32 %v133_v20 }
 0x154   : > { %v139_v21 = vpop.xlane.xlu1 %138 }
 0x155   : > { %v140_v22 = vsub.f32 %v115_v10, %v139_v21 }
 0x160   : > { %v312_v23 = vpop.eup %311 }
 0x161   : > { %v141_v24 = vmul.f32 %v312_v23, %v140_v22 }
 0x163   : > { %v144_v25 = vsel %vm143_vm3, %v141_v24, 0.0 }
 0x164   : > { %v145_v26 = vadd.f32 %v144_v25, %v122_v14 }
 0x166   : > { %146 = vst [vmem:[#allocation2] sm:$0xff] %v145_v26 }
 0x16d   : > { %v149_v27 = vld [vmem:[#allocation2 + $0x2] ss:$0 sm:$0xff] }
 0x16e   : > { %v159_v28 = vmul.f32 %v149_v27, %v145_v26  ;;  %v152_v29 = vmul.f32 %v149_v27, %v149_v27 }
 0x170   : > { %160 = vadd.xlane.f32.xlu1 %v159_v28  ;;  %153 = vadd.xlane.f32.xlu0 %v152_v29 }
 0x1f9   : > { %v154_v31 = vpop.xlane.xlu0 %153  ;;  %v161_v33 = vpop.xlane.xlu1 %160 }
 0x1fa   : > { %v155_v32 = vsub.f32 %v151_v30, %v154_v31  ;;  %v162_v34 = vsub.f32 %v115_v10, %v161_v33 }
 0x1fc   : > { %313 = vrsqrt.f32 %v155_v32 }
 0x209   : > { %v314_v35 = vpop.eup %313 }
 0x20a   : > { %v163_v36 = vmul.f32 %v314_v35, %v162_v34 }
 0x20c   : > { %v166_v37 = vsel %vm165_vm6, %v163_v36, 0.0 }
 0x20d   : > { %v167_v38 = vadd.f32 %v166_v37, %v145_v26 }
 0x20f   : > { %168 = vst [vmem:[#allocation2] sm:$0xff] %v167_v38 }
 0x216   : > { %v173_v39 = vld [vmem:[#allocation2] sm:$0xf] }
 0x217   : > { %176 = vst [vmem:[%s100_s21] sm:$0xf] %v173_v39 }
 0x21e   : > { %v201_v40 = vld [vmem:[%s100_s21] sm:$0xf] }
 0x21f   : > { %202 = vst [vmem:[%s184_s25] sm:$0xf] %v201_v40 }
 0x220 PF: > { %s7_s8 = sadd.s32 1, %s337_s8   ;;  %s399_s6 = smov %s333_s7 }
 0x221   : > { %p4_p5 = scmp.ge.s32.totalorder %s7_s8, 4   ;;  %s400_s7 = smov %s402_s10 }
 0x223   :  { %6 = sbr.rel (!%p4_p5) target bundleno = 2 (0x2), region = 114 }

// kernel: custom-call.56
= control target key start
LH: loop header
LB: loop body
LE: loop exit
PB: predicated region body
PF: predicated region fallthrough
CT: control target
= control target key end

     0   :  { %s350_s6 = smov 0   ;;  %s352_s7 = smov 0   ;;  %s397_s0 = inlined_call_operand.vmem [shape: f32[2,1,3,3], index: 0, kind: input, shape index: {}]   ;;  %s398_s1 = inlined_call_operand.vmem [shape: f32[2,1,3,3], index: 1, kind: output, shape index: {}]  }
   0x1   :  { %s354_s8 = smov 0  }
   0x2 LB: > { %s276_s9 = sadd.s32 4294967295, %s337_s8   ;;  %s33_s10 = sadd.s32 1, %s333_s7  ;;  %s337_s8 = sphi %s354_s8, %s7_s8   ;;  %s333_s7 = sphi %s352_s7, %s400_s7   ;;  %s329_s6 = sphi %s350_s6, %s399_s6  }
   0x3   : > { %p35_p0 = scmp.ge.s32.totalorder %s33_s10, 2  ;;  %p278_p1 = scmp.ge.s32.totalorder %s337_s8, 2 }
   0x4   : > { %s49_s11 = sand.u32 (!%p278_p1), 1, %s337_s8   ;;  %s280_s12 = sshll.u32 (!%p278_p1), %s333_s7, 2 }
   0x5   : > { %s402_s10 = smov (%p35_p0, %s33_s10), 0  ;;  %47 = sbr.rel (%p278_p1) target bundleno = 12 (0xc), region = 16 }
   0x6   : > { %s279_s13 = sshll.u32 (!%p278_p1), %s49_s11, 2  ;;  %s56_s16 = scalar_lea.vmem (!%p278_p1), %s397_s0, %s280_s12 }
   0x7   : > { %s51_s17 = scalar_lea.vmem (!%p278_p1), [#allocation1], %s279_s13 }
   0xa   : > { %v73_v0 = vld [vmem:[%s56_s16] sm:$0xf] }
   0xb   : > { %74 = vst [vmem:[%s51_s17] sm:$0xf] %v73_v0 }
   0xc PF: > { %p281_p2 = scmp.ge.s32.totalorder %s337_s8, 1  ;;  %p91_p3 = scmp.lt.s32.totalorder %s337_s8, 3 }
   0xe   : > { %p92_p4 = pnand %p281_p2, %p91_p3 }
  0x10   : > { %95 = sbr.rel (%p92_p4) target bundleno = 500 (0x1f4), region = 50 }
  0x15   : > { %s377_s18 = sand.u32 1, %s276_s9   ;;  %v114_v1 = vlaneseq  ;;  %v339_v11 = vmov -1.0   ;;  %s285_s22 = sshll.u32 %s329_s6, 2 }
  0x16   : > { %s282_s19 = sshll.u32 %s377_s18, 2  ;;  %s183_s25 = scalar_lea.vmem %s398_s1, %s285_s22 }
  0x17   : > { %s104_s20 = scalar_lea.vmem [#allocation1], %s282_s19  ;;  %v115_v3 = vand.u32 127, %v114_v1  ;;  %v118_v4 = vshrl.u32 %v114_v1, 7  ;;  %s108_s21 = scalar_lea.vmem [#allocation3], %s282_s19 }
  0x18   : > { %v112_v2 = vld [vmem:[%s104_s20] sm:$0xf] }
  0x19   : > { %113 = vst [vmem:[#allocation0] sm:$0xf] %v112_v2  ;;  %vm116_vm0 = vcmp.lt.s32.totalorder %v115_v3, 3  ;;  %vm125_vm1 = vcmp.ge.s32.totalorder %v118_v4, %v115_v3  ;;  %vm120_vm2 = vcmp.eq.s32.totalorder %v118_v4, %v115_v3  ;;  %vm139_vm4 = vcmp.eq.s32.totalorder %v115_v3, 0 }
  0x1a   : > { %vm126_vm3 = vmand %vm125_vm1, %vm116_vm0  ;;  %vm136_vm5 = vcmp.eq.s32.totalorder %v115_v3, %v118_v4  ;;  %v140_v12 = vsel %vm139_vm4, 1.0, %v339_v11  ;;  %vm147_vm6 = vcmp.eq.s32.totalorder %v115_v3, 1  ;;  %vm157_vm7 = vcmp.eq.s32.totalorder %v115_v3, 2 }
  0x1b   : > { %v141_v13 = vsel %vm136_vm5, %v140_v12, 0.0 }
  0x20   : > { %v121_v5 = vld [vmem:[#allocation0] sm:$0xff] }
  0x21   : > { %v122_v6 = vsel %vm120_vm2, %v121_v5, 0.0  ;;  %v127_v7 = vsel %vm126_vm3, %v121_v5, 0.0 }
  0x22   : > { %123 = vadd.xlane.f32.xlu0 %v122_v6 }
  0xab   : > { %v124_v8 = vpop.xlane.xlu0 %123 }
  0xac   : > { %313 = vrcp.f32 %v124_v8  ;;  %vm164_vm8 = vweird.f32 %v124_v8 }
  0xb9   : > { %v314_v9 = vpop.eup %313 }
  0xba   : > { %v129_v10 = vmul.f32 %v314_v9, %v127_v7 }
  0xbc   : > { %130 = vst [vmem:[#allocation4] sm:$0xff] %v129_v10 }
  0xc3   : > { %v143_v14 = vld [vmem:[#allocation4 + $0x1] ss:$0 sm:$0xff]  ;;  %v153_v17 = vld [vmem:[#allocation4 + $0x2] ss:$0 sm:$0xff] }
  0xc4   : > { %v144_v15 = vxor.u32 2147483648, %v143_v14  ;;  %v154_v19 = vxor.u32 2147483648, %v153_v17 }
  0xc6   : > { %v148_v16 = vmul.f32 %v144_v15, %v141_v13 }
  0xc8   : > { %149 = vadd.xlane.f32.xlu0 %v148_v16 }
 0x151   : > { %v150_v18 = vpop.xlane.xlu0 %149 }
 0x152   : > { %v151_v20 = vsel %vm147_vm6, %v150_v18, %v141_v13 }
 0x153   : > { %v158_v21 = vmul.f32 %v154_v19, %v151_v20 }
 0x155   : > { %159 = vadd.xlane.f32.xlu1 %v158_v21 }
 0x1de   : > { %v160_v22 = vpop.xlane.xlu1 %159 }
 0x1df   : > { %v161_v23 = vsel %vm157_vm7, %v160_v22, %v151_v20 }
 0x1e0   : > { %v163_v24 = vmul.f32 %v314_v9, %v161_v23 }
 0x1e2   : > { %v165_v25 = vsel %vm164_vm8, %v161_v23, %v163_v24 }
 0x1e3   : > { %166 = vst [vmem:[#allocation2] sm:$0xff] %v165_v25 }
 0x1ea   : > { %v171_v26 = vld [vmem:[#allocation2] sm:$0xf] }
 0x1eb   : > { %174 = vst [vmem:[%s108_s21] sm:$0xf] %v171_v26 }
 0x1f2   : > { %v200_v27 = vld [vmem:[%s108_s21] sm:$0xf] }
 0x1f3   : > { %201 = vst [vmem:[%s183_s25] sm:$0xf] %v200_v27 }
 0x1f4 PF: > { %s7_s8 = sadd.s32 1, %s337_s8   ;;  %s399_s6 = smov %s333_s7 }
 0x1f5   : > { %p4_p5 = scmp.ge.s32.totalorder %s7_s8, 4   ;;  %s400_s7 = smov %s402_s10 }
 0x1f7   :  { %6 = sbr.rel (!%p4_p5) target bundleno = 2 (0x2), region = 112 }

// kernel: custom-call.22
= control target key start
LH: loop header
LB: loop body
LE: loop exit
PB: predicated region body
PF: predicated region fallthrough
CT: control target
= control target key end

     0   :  { %s1740_s30 = smov 0   ;;  %s1742_s10 = smov 0   ;;  %s2066_s0 = inlined_call_operand.vmem [shape: f32[2,2,2], index: 0, kind: input, shape index: {}]   ;;  %s2067_s1 = inlined_call_operand.vmem [shape: f32[2,2,2], index: 1, kind: input, shape index: {}]   ;;  %s2068_s2 = inlined_call_operand.vmem [shape: f32[2,2,2], index: 2, kind: input, shape index: {}]   ;;  %s2069_s3 = inlined_call_operand.vmem [shape: f32[2,2,2], index: 3, kind: input, shape index: {}]   ;;  %s2070_s4 = inlined_call_operand.vmem [shape: f32[2,2], index: 4, kind: output, shape index: {0}]   ;;  %s2071_s5 = inlined_call_operand.vmem [shape: f32[2,2], index: 5, kind: output, shape index: {1}]   ;;  %s2072_s6 = inlined_call_operand.vmem [shape: f32[2,2,2], index: 6, kind: output, shape index: {2}]   ;;  %s2073_s7 = inlined_call_operand.vmem [shape: f32[2,2,2], index: 7, kind: output, shape index: {3}]   ;;  %s2074_s8 = inlined_call_operand.vmem [shape: f32[2,2,2], index: 8, kind: output, shape index: {4}]   ;;  %s2075_s9 = inlined_call_operand.vmem [shape: f32[2,2,2], index: 9, kind: output, shape index: {5}]  }
   0x1   :  { %s1744_s11 = smov 0  }
   0x2 LB: > { %s1756_s12 = sadd.s32 4294967295, %s1677_s11   ;;  %s1759_s13 = sadd.s32 1, %s1677_s11   ;;  %s1677_s11 = sphi %s1744_s11, %s2094_s11   ;;  %s1673_s10 = sphi %s1742_s10, %s2093_s10   ;;  %s1669_s30 = sphi %s1740_s30, %s2092_s30  }
   0x3   : > { %s20_s14 = sshrl.u32 %s1677_s11, 3  ;;  %s21_s15 = sshrl.u32 %s1759_s13, 3 }
   0x4   : > { %s22_s16 = ssub.s32 %s20_s14, %s21_s15  ;;  %s25_s17 = sadd.s32 1, %s1673_s10 }
   0x5   : > { %p23_p0 = scmp.eq.s32.totalorder %s22_s16, 0  ;;  %p35_p1 = scmp.ne.s32.totalorder %s1673_s10, %s1669_s30 }
   0x6   : > { %p36_p2 = scmp.eq.s32.totalorder %s1756_s12, 1  ;;  %p1538_p4 = scmp.ge.s32.totalorder %s1677_s11, 2 }
   0x7   : > { %s1768_s18 = scalar_select %p23_p0, %s1673_s10, %s25_s17  }
   0x8   : > { %p1770_p3 = por %p36_p2, %p35_p1  ;;  %86 = sbr.rel (%p1538_p4) target bundleno = 18 (0x12), region = 16 }
   0x9   : > { %2076 = sst [smem:[#allocation33_spill]] %s1768_s18  ;;  %s88_s20 = sand.u32 (!%p1538_p4), 1, %s1677_s11  }
   0xa   : > { %s1540_s21 = sshll.u32 (!%p1538_p4), %s1677_s11, 1  ;;  %s1539_s22 = sshll.u32 (!%p1538_p4), %s88_s20, 1 }
   0xb   : > { %s92_s25 = scalar_lea.vmem (!%p1538_p4), %s2066_s0, %s1540_s21  ;;  %s90_s26 = scalar_lea.vmem (!%p1538_p4), [#allocation1], %s1539_s22 }
   0xc   : > { %s131_s29 = scalar_lea.vmem (!%p1538_p4), %s2067_s1, %s1540_s21  ;;  %s170_s16 = scalar_lea.vmem (!%p1538_p4), %s2068_s2, %s1540_s21 }
   0xd   : > { %v109_v0 = vld [vmem:[%s92_s25] sm:$0x3]  ;;  %s129_s17 = scalar_lea.vmem [#allocation3], %s1539_s22  ;;  %s209_s23 = scalar_lea.vmem %s2069_s3, %s1540_s21 }
   0xe   : > { %110 = vst [vmem:[%s90_s26] sm:$0x3] %v109_v0  ;;  %v148_v1 = vld [vmem:[%s131_s29] sm:$0x3]  ;;  %s168_s24 = scalar_lea.vmem [#allocation5], %s1539_s22  ;;  %s207_s25 = scalar_lea.vmem [#allocation7], %s1539_s22 }
   0xf   : > { %149 = vst [vmem:[%s129_s17] sm:$0x3] %v148_v1  ;;  %v187_v2 = vld [vmem:[%s170_s16] sm:$0x3] }
  0x10   : > { %188 = vst [vmem:[%s168_s24] sm:$0x3] %v187_v2  ;;  %v226_v3 = vld [vmem:[%s209_s23] sm:$0x3] }
  0x11   : > { %227 = vst [vmem:[%s207_s25] sm:$0x3] %v226_v3 }
  0x12 PF: > { %p1547_p5 = scmp.ge.s32.totalorder %s1677_s11, 1  ;;  %p244_p6 = scmp.lt.s32.totalorder %s1677_s11, 3 }
  0x14   : > { %p245_p7 = pnand %p1547_p5, %p244_p6 }
  0x16   : > { %248 = sbr.rel (%p245_p7) target bundleno = 994 (0x3e2), region = 140 }
  0x1b   : > { %s267_s26 = sand.u32 1, %s1756_s12   ;;  %s285_s27 = sand.u32 1, %s1669_s30   ;;  %v349_v4 = vlaneseq  ;;  %v1687_v5 = vmov 0.0  }
  0x1c   : > { %s1793_s28 = sshll.u32 %s267_s26, 1  ;;  %s1795_s18 = sshll.u32 %s285_s27, 1  ;;  %344 = vst [vmem:[#allocation12] sm:$0xff] %v1687_v5  ;;  %345 = vst [vmem:[#allocation14] sm:$0xff] %v1687_v5 }
  0x1d   : > { %346 = vst [vmem:[#allocation16] sm:$0xff] %v1687_v5  ;;  %347 = vst [vmem:[#allocation18] sm:$0xff] %v1687_v5  ;;  %v1797_v6 = vand.u32 127, %v349_v4  ;;  %v1799_v7 = vshrl.u32 %v349_v4, 7  ;;  %s269_s11 = scalar_lea.vmem [#allocation1], %s1793_s28  ;;  %s273_s30 = scalar_lea.vmem [#allocation3], %s1793_s28 }
  0x1e   : > { %v313_v8 = vld [vmem:[%s269_s11] sm:$0x3]  ;;  %v318_v9 = vld [vmem:[%s273_s30] sm:$0x3]  ;;  %s277_s21 = scalar_lea.vmem [#allocation5], %s1793_s28  ;;  %s281_s22 = scalar_lea.vmem [#allocation7], %s1793_s28 }
  0x1f   : > { %314 = vst [vmem:[#allocation0] sm:$0x3] %v313_v8  ;;  %319 = vst [vmem:[#allocation2] sm:$0x3] %v318_v9  ;;  %v323_v10 = vld [vmem:[%s277_s21] sm:$0x3]  ;;  %v351_v6 = vmov %v1797_v6  ;;  %v354_v7 = vmov %v1799_v7 }
  0x20   : > { %v328_v11 = vld [vmem:[%s281_s22] sm:$0x3]  ;;  %324 = vst [vmem:[#allocation4] sm:$0x3] %v323_v10  ;;  %v364_v6 = vmov %v1797_v6  ;;  %v367_v7 = vmov %v1799_v7  ;;  %s332_s29 = smov [#allocation20]  ;;  %s335_s14 = smov [#allocation21]  ;;  %vm358_vm0 = vcmp.eq.s32.totalorder %v354_v7, %v351_v6 }
  0x21   : > { %329 = vst [vmem:[#allocation6] sm:$0x3] %v328_v11  ;;  %vm371_vm1 = vcmp.eq.s32.totalorder %v367_v7, %v364_v6  ;;  %s348_s15 = smov [#allocation12]  ;;  %s361_s16 = smov [#allocation18]  ;;  %vm1427_vm2 = vcmp.lt.s32.totalorder %v1797_v6, 2  ;;  %v1419_v6 = vmov %v1797_v6  ;;  %v1422_v7 = vmov %v1799_v7 }
  0x22   : > { %s338_s17 = smov [#allocation22]  ;;  %s341_s20 = smov [#allocation23]  ;;  %vm1432_vm3 = vcmp.eq.s32.totalorder %v1422_v7, %v1419_v6  ;;  %v1470_v6 = vmov %v1797_v6  ;;  %v1439_v7 = vmov %v1799_v7 }
  0x23   : > { %v355_v12 = vld [vmem:[%s348_s15] sm:$0x3]  ;;  %s1423_s30 = smov [#allocation20]  ;;  %s1440_s21 = smov [#allocation21]  ;;  %v1436_v6 = vmov %v1797_v6  ;;  %v1473_v7 = vmov %v1799_v7 }
  0x24   : > { %v368_v13 = vld [vmem:[%s361_s16] sm:$0x3]  ;;  %v359_v16 = vsel %vm358_vm0, 1.0, %v355_v12  ;;  %s1457_s22 = smov [#allocation22]  ;;  %v1453_v6 = vmov %v1797_v6  ;;  %v1456_v7 = vmov %v1799_v7  ;;  %vm1483_vm4 = vcmp.eq.s32.totalorder %v1473_v7, %v1470_v6 }
  0x25   : > { %v372_v17 = vsel %vm371_vm1, 1.0, %v368_v13  ;;  %360 = vst [vmem:[%s348_s15] sm:$0x3] %v359_v16 }
  0x26   : > { %v333_v14 = vld [vmem:[#allocation0] sm:$0xff]  ;;  %v336_v15 = vld [vmem:[#allocation2] sm:$0xff]  ;;  %373 = vst [vmem:[%s361_s16] sm:$0x3] %v372_v17 }
  0x27   : > { %334 = vst [vmem:[%s332_s29] sm:$0xff] %v333_v14  ;;  %337 = vst [vmem:[%s335_s14] sm:$0xff] %v336_v15  ;;  %v339_v18 = vld [vmem:[#allocation4] sm:$0xff]  ;;  %s1474_s29 = smov [#allocation23] }
  0x28   : > { %v342_v19 = vld [vmem:[#allocation6] sm:$0xff]  ;;  %340 = vst [vmem:[%s338_s17] sm:$0xff] %v339_v18 }
  0x29   : > { %343 = vst [vmem:[%s341_s20] sm:$0xff] %v342_v19 }
  0x2e   : > { %v1429_v20 = vld [vmem:[%s1423_s30] sm:$0x3] }
  0x2f   : > { %v1446_v21 = vld [vmem:[%s1440_s21] sm:$0x3]  ;;  %v1430_v22 = vsel %vm1427_vm2, %v1429_v20, 0.0 }
  0x30   : > { %v1447_v23 = vsel %vm1427_vm2, %v1446_v21, 0.0  ;;  %v1463_v24 = vld [vmem:[%s1457_s22] sm:$0x3]  ;;  %v1431_v26 = vmul.f32 %v1430_v22, %v1430_v22 }
  0x31   : > { %v1480_v25 = vld [vmem:[%s1474_s29] sm:$0x3]  ;;  %v1448_v27 = vmul.f32 %v1447_v23, %v1447_v23  ;;  %v1464_v28 = vsel %vm1427_vm2, %v1463_v24, 0.0 }
  0x32   : > { %v1481_v29 = vsel %vm1427_vm2, %v1480_v25, 0.0  ;;  %v1465_v30 = vmul.f32 %v1464_v28, %v1464_v28  ;;  %v1433_v33 = vsel %vm1432_vm3, 0.0, %v1431_v26 }
  0x33   : > { %v1450_v31 = vadd.f32 %v1448_v27, %v1431_v26  ;;  %v1482_v32 = vmul.f32 %v1481_v29, %v1481_v29  ;;  %v1449_v34 = vadd.f32 %v1448_v27, %v1433_v33 }
  0x35   : > { %v1467_v35 = vadd.f32 %v1465_v30, %v1450_v31  ;;  %v1466_v36 = vadd.f32 %v1465_v30, %v1449_v34  ;;  %v1484_v37 = vsel %vm1483_vm4, 0.0, %v1482_v32 }
  0x37   : > { %v1486_v38 = vadd.f32 %v1482_v32, %v1467_v35  ;;  %v1485_v39 = vadd.f32 %v1484_v37, %v1466_v36 }
  0x39   : > { %1487 = vadd.xlane.f32.xlu0 %v1486_v38 }
  0x3d   : > { %1495 = vadd.xlane.f32.xlu0 %v1485_v39 }
  0xc2   : > { %v1488_v40 = vpop.xlane.xlu0 %1487 }
  0xc3   : > { %v1489_v41 = vrot.slane %v1488_v40, 4 }
  0xc5   : > { %v1490_v42 = vadd.f32 %v1489_v41, %v1488_v40 }
  0xc6   : > { %v1496_v43 = vpop.xlane.xlu0 %1495 }
  0xc7   : > { %v1491_v44 = vrot.slane %v1490_v42, 2  ;;  %v1497_v45 = vrot.slane %v1496_v43, 4 }
  0xc9   : > { %v1498_v46 = vadd.f32 %v1497_v45, %v1496_v43  ;;  %v1492_v47 = vadd.f32 %v1491_v44, %v1490_v42 }
  0xcb   : > { %v1499_v48 = vrot.slane %v1498_v46, 2  ;;  %v1493_v50 = vrot.slane %v1492_v47, 1 }
  0xcd   : > { %v1500_v49 = vadd.f32 %v1499_v48, %v1498_v46  ;;  %v1494_v53 = vadd.f32 %v1493_v50, %v1492_v47 }
  0xcf   : > { %v1501_v51 = vrot.slane %v1500_v49, 1 }
  0xd1   : > { %v1502_v52 = vadd.f32 %v1501_v51, %v1500_v49 }
  0xd3   : > { %1588 = vpush %v1502_v52 }
  0xd4   : > { %1590 = vpush %v1494_v53 }
 0x104   : > { %s1589_s14 = spop %1588 }
 0x105   : > { %s1591_s15 = spop %1590 }
 0x106   : > { %s1505_s16 = smul.f32 1e-10, %s1591_s15 }
 0x108   : > { %p1506_p8 = scmp.le.f32.partialorder %s1589_s14, %s1505_s16 }
 0x109   : > { %s1833_s17 = smov (!%p1506_p8), 0  }
 0x10a   : > { %1509 = sbr.rel (%p1506_p8) target bundleno = 948 (0x3b4), region = 467 }
 0x10f LB: >> { %s1838_s20 = smov 0   ;;  %s1681_s17 = sphi %s1833_s17, %s2078_s17  }
 0x110 LB: >>> { %s478_s30 = smov [#allocation20]  ;;  %v482_v6 = vmov %v1797_v6  ;;  %v485_v7 = vmov %v1799_v7  ;;  %s498_s21 = smov [#allocation21]  ;;  %vm801_vm14 = vcmp.eq.s32.totalorder %v1799_v7, 0  ;;  %vm813_vm15 = vcmp.eq.s32.totalorder %v1799_v7, 1  ;;  %s1685_s20 = sphi %s1838_s20, %s477_s20  }
 0x111   : >>> { %v502_v6 = vmov %v1797_v6  ;;  %v505_v7 = vmov %v1799_v7  ;;  %v486_v54 = vld [vmem:[%s478_s30] sm:$0x3]  ;;  %vm489_vm5 = vcmp.eq.s32.totalorder %v485_v7, %v482_v6  ;;  %s518_s22 = smov [#allocation23]  ;;  %s479_s29 = smov [#allocation24] }
 0x112   : >>> { %vm509_vm6 = vcmp.eq.s32.totalorder %v505_v7, %v502_v6  ;;  %v522_v6 = vmov %v1797_v6  ;;  %v525_v7 = vmov %v1799_v7  ;;  %v490_v55 = vsel %vm489_vm5, %v486_v54, 0.0  ;;  %v506_v56 = vld [vmem:[%s498_s21] sm:$0x3]  ;;  %s499_s14 = smov [#allocation25]  ;;  %s519_s15 = smov [#allocation26] }
 0x113   : >>> { %vm529_vm7 = vcmp.eq.s32.totalorder %v525_v7, %v522_v6  ;;  %v491_v57 = vrot.slane %v490_v55, 4  ;;  %v510_v58 = vsel %vm509_vm6, %v506_v56, 0.0  ;;  %v526_v59 = vld [vmem:[%s518_s22] sm:$0x3]  ;;  %s542_s16 = smov [#allocation25]  ;;  %s540_s30 = smov [#allocation24]  ;;  %v591_v6 = vmov %v1797_v6 }
 0x114   : >>> { %v511_v60 = vrot.slane %v510_v58, 4  ;;  %v530_v61 = vsel %vm529_vm7, %v526_v59, 0.0  ;;  %s544_s21 = smov [#allocation26]  ;;  %s579_s22 = smov [#allocation27]  ;;  %v594_v7 = vmov %v1799_v7  ;;  %v606_v6 = vmov %v1797_v6 }
 0x115   : >>> { %v492_v62 = vadd.f32 %v491_v57, %v490_v55  ;;  %v531_v63 = vrot.slane %v530_v61, 4  ;;  %v609_v7 = vmov %v1799_v7  ;;  %vm596_vm12 = vcmp.eq.s32.totalorder %v594_v7, %v591_v6  ;;  %s1857_s24 = smov [#allocation22]  ;;  %s1863_s23 = smov [#allocation14] }
 0x116   : >>> { %v512_v0 = vadd.f32 %v511_v60, %v510_v58  ;;  %vm611_vm13 = vcmp.eq.s32.totalorder %v609_v7, %v606_v6  ;;  %s841_s11 = smov [#allocation31]  ;;  %s1869_s27 = smov [#allocation18]  ;;  %v627_v55 = vld [vmem:[%s1857_s24] sm:$0x3]  ;;  %v704_v6 = vmov %v1797_v6  ;;  %v707_v7 = vmov %v1799_v7 }
 0x117   : >>> { %v493_v1 = vrot.slane %v492_v62, 2  ;;  %v532_v2 = vadd.f32 %v531_v63, %v530_v61  ;;  %v850_v58 = vld [vmem:[%s1863_s23] sm:$0x3]  ;;  %s619_s26 = smov [#allocation32]  ;;  %s843_s25 = smov [#allocation32]  ;;  %v718_v6 = vmov %v1797_v6  ;;  %v721_v7 = vmov %v1799_v7 }
 0x118   : >>> { %v513_v3 = vrot.slane %v512_v0, 2  ;;  %v852_v61 = vld [vmem:[%s1869_s27] sm:$0x3]  ;;  %vm711_vm0 = vcmp.eq.s32.totalorder %v707_v7, %v704_v6  ;;  %v677_v6 = vmov %v1797_v6  ;;  %v680_v7 = vmov %v1799_v7  ;;  %s477_s20 = sadd.s32 1, %s1685_s20  }
 0x119   : >>> { %v494_v4 = vadd.f32 %v493_v1, %v492_v62  ;;  %v533_v5 = vrot.slane %v532_v2, 2  ;;  %v691_v6 = vmov %v1797_v6  ;;  %v694_v7 = vmov %v1799_v7  ;;  %p474_p9 = scmp.ge.s32.totalorder %s477_s20, 3  }
 0x11a   : >>> { %v514_v8 = vadd.f32 %v513_v3, %v512_v0  ;;  %vm726_vm1 = vcmp.eq.s32.totalorder %v721_v7, %v718_v6  ;;  %vm685_vm3 = vcmp.eq.s32.totalorder %v680_v7, %v677_v6  ;;  %vm698_vm4 = vcmp.eq.s32.totalorder %v694_v7, %v691_v6 }
 0x11b   : >>> { %v495_v9 = vrot.slane %v494_v4, 1  ;;  %v534_v10 = vadd.f32 %v533_v5, %v532_v2  ;;  %vm740_vm5 = vcmp.eq.s32.totalorder %v1797_v6, 0  ;;  %vm744_vm6 = vcmp.eq.s32.totalorder %v1797_v6, 1 }
 0x11c   : >>> { %v515_v11 = vrot.slane %v514_v8, 1  ;;  %v378_v6 = vmov (%p474_p9), %v1797_v6  ;;  %v381_v7 = vmov (%p474_p9), %v1799_v7 }
 0x11d   : >>> { %v496_v12 = vadd.f32 %v495_v9, %v494_v4  ;;  %v535_v13 = vrot.slane %v534_v10, 1  ;;  %v431_v6 = vmov (%p474_p9), %v1797_v6  ;;  %vm393_vm7 = vcmp.eq.s32.totalorder (%p474_p9), %v381_v7, %v378_v6 }
 0x11e   : >>> { %v516_v14 = vadd.f32 %v515_v11, %v514_v8  ;;  %v434_v7 = vmov (%p474_p9), %v1799_v7  ;;  %v397_v6 = vmov (%p474_p9), %v1797_v6 }
 0x11f   : >>> { %497 = vst [vmem:[%s479_s29] sm:$0x1] %v496_v12  ;;  %v536_v15 = vadd.f32 %v535_v13, %v534_v10  ;;  %s581_s29 = smov [#allocation28]  ;;  %v400_v7 = vmov (%p474_p9), %v1799_v7  ;;  %v414_v6 = vmov (%p474_p9), %v1797_v6 }
 0x120   : >>> { %517 = vst [vmem:[%s499_s14] sm:$0x1] %v516_v14  ;;  %s538_s14 = smov [#allocation29]  ;;  %v417_v7 = vmov (%p474_p9), %v1799_v7 }
 0x121   : >>> { %537 = vst [vmem:[%s519_s15] sm:$0x1] %v536_v15  ;;  %s539_s15 = smov [#allocation30]  ;;  %s583_s14 = smov %s538_s14 }
 0x122   : >>> { %s585_s15 = smov %s539_s15 }
 0x126   : >>> { %v541_v18 = vld [vmem:[%s540_s30] sm:$0xff]  ;;  %s602_s30 = smov [#allocation30] }
 0x127   : >>> { %v543_v16 = vld [vmem:[%s542_s16] sm:$0xff]  ;;  %v564_v33 = vand.u32 2147483647, %v541_v18  ;;  %s587_s16 = smov [#allocation29] }
 0x128   : >>> { %v547_v17 = vmul.f32 2.0, %v543_v16  ;;  %v545_v19 = vld [vmem:[%s544_s21] sm:$0xff]  ;;  %v565_v36 = vand.u32 2147483647, %v543_v16  ;;  %s600_s21 = smov [#allocation31] }
 0x129   : >>> { %v546_v20 = vsub.f32 %v545_v19, %v541_v18  ;;  %v566_v34 = vand.u32 2147483647, %v545_v19 }
 0x12a   : >>> { %1639 = vrcp.f32 %v547_v17 }
 0x12b   : >>> { %v567_v35 = vmin.f32 %v564_v33, %v566_v34 }
 0x12d   : >>> { %v568_v37 = vmul.f32 1.1920929e-08, %v567_v35 }
 0x12f   : >>> { %vm569_vm11 = vcmp.le.f32.partialorder %v565_v36, %v568_v37 }
 0x137   : >>> { %v1640_v21 = vpop.eup %1639 }
 0x138   : >>> { %v549_v22 = vmul.f32 %v1640_v21, %v546_v20 }
 0x13a   : >>> { %v551_v23 = vmul.f32 %v549_v22, %v549_v22  ;;  %vm550_vm10 = vcmp.ge.f32.partialorder %v549_v22, 0.0 }
 0x13c   : >>> { %v552_v24 = vadd.f32 1.0, %v551_v23 }
 0x13e   : >>> { %1641 = vrsqrt.f32 %v552_v24  ;;  %vm555_vm8 = vcmp.eq.f32.partialorder %v552_v24, inf  ;;  %v558_v26 = vand.u32 2147483648, %v552_v24  ;;  %vm557_vm9 = vcmp.eq.f32.partialorder %v552_v24, 0.0 }
 0x14b   : >>> { %v1642_v25 = vpop.eup %1641 }
 0x14c   : >>> { %v554_v27 = vmul.f32 %v1642_v25, %v552_v24 }
 0x14e   : >>> { %v556_v28 = vsel %vm555_vm8, %v552_v24, %v554_v27  ;;  %vm446_vm8 = vcmp.eq.s32.totalorder (%p474_p9), %v434_v7, %v431_v6 }
 0x14f   : >>> { %v559_v29 = vsel %vm557_vm9, %v558_v26, %v556_v28 }
 0x150   : >>> { %v560_v30 = vxor.u32 2147483648, %v559_v29 }
 0x152   : >>> { %v561_v31 = vsel %vm550_vm10, %v559_v29, %v560_v30 }
 0x153   : >>> { %v562_v32 = vadd.f32 %v561_v31, %v549_v22 }
 0x155   : >>> { %1643 = vrcp.f32 %v562_v32 }
 0x162   : >>> { %v1644_v38 = vpop.eup %1643 }
 0x163   : >>> { %v570_v39 = vsel %vm569_vm11, 0.0, %v1644_v38 }
 0x164   : >>> { %v571_v40 = vmul.f32 %v570_v39, %v570_v39  ;;  %v575_v41 = vmul.f32 %v570_v39, %v543_v16 }
 0x166   : >>> { %v572_v42 = vadd.f32 1.0, %v571_v40  ;;  %v576_v43 = vsub.f32 %v541_v18, %v575_v41  ;;  %v578_v44 = vadd.f32 %v575_v41, %v545_v19 }
 0x168   : >>> { %1645 = vrsqrt.f32 %v572_v42  ;;  %580 = vst [vmem:[%s579_s22] sm:$0xff] %v576_v43  ;;  %582 = vst [vmem:[%s581_s29] sm:$0xff] %v578_v44  ;;  %s617_s22 = smov [#allocation31]  ;;  %s1853_s29 = smov [#allocation20] }
 0x169   : >>> { %v625_v53 = vld [vmem:[%s1853_s29] sm:$0x3] }
 0x175   : >>> { %v1646_v45 = vpop.eup %1645 }
 0x176   : >>> { %584 = vst [vmem:[%s583_s14] sm:$0xff] %v1646_v45  ;;  %v574_v46 = vmul.f32 %v1646_v45, %v570_v39  ;;  %s615_s14 = smov [#allocation32] }
 0x178   : >>> { %586 = vst [vmem:[%s585_s15] sm:$0xff] %v574_v46  ;;  %s1855_s15 = smov [#allocation21] }
 0x179   : >>> { %v626_v54 = vld [vmem:[%s1855_s15] sm:$0x3] }
 0x17d   : >>> { %v588_v47 = vld [vmem:[%s587_s16] ss:$0 sm:$0xff]  ;;  %s1859_s16 = smov [#allocation23] }
 0x17e   : >>> { %v597_v48 = vsel %vm596_vm12, %v588_v47, 0.0  ;;  %v628_v56 = vld [vmem:[%s1859_s16] sm:$0x3] }
 0x17f   : >>> { %598 = vadd.xlane.f32.xlu0 %v597_v48  ;;  %v603_v49 = vld [vmem:[%s602_s30] ss:$0 sm:$0xff]  ;;  %s1861_s30 = smov [#allocation12] }
 0x180   : >>> { %v612_v50 = vsel %vm611_vm13, %v603_v49, 0.0  ;;  %v849_v57 = vld [vmem:[%s1861_s30] sm:$0x3] }
 0x183   : >>> { %613 = vadd.xlane.f32.xlu0 %v612_v50 }
 0x208   : >>> { %v599_v51 = vpop.xlane.xlu0 %598 }
 0x209   : >>> { %601 = vst [vmem:[%s600_s21] sm:$0xff] %v599_v51  ;;  %s1865_s21 = smov [#allocation16] }
 0x20a   : >>> { %v851_v59 = vld [vmem:[%s1865_s21] sm:$0x3] }
 0x20c   : >>> { %v614_v52 = vpop.xlane.xlu0 %613 }
 0x20d   : >>> { %616 = vst [vmem:[%s615_s14] sm:$0xff] %v614_v52  ;;  %s1889_s14 = smov [#allocation23] }
 0x210   : >>> { %v618_v60 = vld [vmem:[%s617_s22] sm:$0xff]  ;;  %s1887_s22 = smov [#allocation22] }
 0x211   : >>> { %v842_v62 = vld [vmem:[%s841_s11] sm:$0xff]  ;;  %v629_v63 = vmul.f32 %v625_v53, %v618_v60  ;;  %v632_v0 = vmul.f32 %v626_v54, %v618_v60  ;;  %v636_v1 = vmul.f32 %v627_v55, %v618_v60  ;;  %v639_v2 = vmul.f32 %v628_v56, %v618_v60  ;;  %s1885_s11 = smov [#allocation12] }
 0x212   : >>> { %v853_v3 = vmul.f32 %v849_v57, %v842_v62  ;;  %v856_v4 = vmul.f32 %v850_v58, %v842_v62  ;;  %v860_v5 = vmul.f32 %v851_v59, %v842_v62  ;;  %v863_v8 = vmul.f32 %v852_v61, %v842_v62 }
 0x214   : >>> { %v620_v9 = vld [vmem:[%s619_s26] sm:$0xff]  ;;  %s647_s26 = smov [#allocation30] }
 0x215   : >>> { %v844_v10 = vld [vmem:[%s843_s25] sm:$0xff]  ;;  %v630_v11 = vmul.f32 %v627_v55, %v620_v9  ;;  %v633_v12 = vmul.f32 %v628_v56, %v620_v9  ;;  %v635_v13 = vmul.f32 %v625_v53, %v620_v9  ;;  %v638_v14 = vmul.f32 %v626_v54, %v620_v9  ;;  %s645_s25 = smov [#allocation29] }
 0x216   : >>> { %v854_v15 = vmul.f32 %v851_v59, %v844_v10  ;;  %v857_v16 = vmul.f32 %v852_v61, %v844_v10  ;;  %v859_v17 = vmul.f32 %v849_v57, %v844_v10  ;;  %v862_v18 = vmul.f32 %v850_v58, %v844_v10  ;;  %v646_v27 = vld [vmem:[%s645_s25] ss:$0 sm:$0xff]  ;;  %s674_s25 = smov [#allocation27] }
 0x217   : >>> { %v631_v19 = vsub.f32 %v629_v63, %v630_v11  ;;  %v634_v20 = vsub.f32 %v632_v0, %v633_v12  ;;  %v637_v21 = vadd.f32 %v636_v1, %v635_v13  ;;  %v640_v22 = vadd.f32 %v639_v2, %v638_v14  ;;  %v648_v28 = vld [vmem:[%s647_s26] ss:$0 sm:$0xff]  ;;  %s673_s26 = smov [#allocation20] }
 0x218   : >>> { %v855_v23 = vsub.f32 %v853_v3, %v854_v15  ;;  %v858_v24 = vsub.f32 %v856_v4, %v857_v16  ;;  %v861_v25 = vadd.f32 %v860_v5, %v859_v17  ;;  %v864_v26 = vadd.f32 %v863_v8, %v862_v18  ;;  %v681_v63 = vld [vmem:[%s674_s25] ss:$0 sm:$0xff]  ;;  %s917_s25 = sadd.s32 (%p474_p9), 1, %s1681_s17  }
 0x219   : >>> { %642 = vst [vmem:[%s1855_s15] sm:$0x3] %v634_v20  ;;  %644 = vst [vmem:[%s1859_s16] sm:$0x3] %v640_v22  ;;  %s1891_s15 = smov [#allocation20]  ;;  %s715_s16 = smov [#allocation28] }
 0x21a   : >>> { %641 = vst [vmem:[%s1853_s29] sm:$0x3] %v631_v19  ;;  %643 = vst [vmem:[%s1857_s24] sm:$0x3] %v637_v21  ;;  %s1893_s24 = smov [#allocation16]  ;;  %s1901_s29 = smov [#allocation21]  ;;  %v722_v59 = vld [vmem:[%s715_s16] ss:$0 sm:$0xff] }
 0x21b   : >>> { %865 = vst [vmem:[%s1861_s30] sm:$0x3] %v855_v23  ;;  %866 = vst [vmem:[%s1863_s23] sm:$0x3] %v858_v24  ;;  %s1895_s23 = smov [#allocation14]  ;;  %s701_s30 = smov [#allocation22] }
 0x21c   : >>> { %867 = vst [vmem:[%s1865_s21] sm:$0x3] %v861_v25  ;;  %868 = vst [vmem:[%s1869_s27] sm:$0x3] %v864_v26  ;;  %s1899_s27 = smov [#allocation18]  ;;  %s714_s21 = smov [#allocation23] }
 0x21d   : >>> { %s817_s16 = smov [#allocation21]  ;;  %p470_p10 = scmp.ge.s32.totalorder (%p474_p9), %s917_s25, 15 }
 0x21e   : >> { %s2078_s17 = smov (%p474_p9), %s917_s25 }
 0x220   : >>> { %v656_v30 = vld [vmem:[%s1889_s14] sm:$0x3] }
 0x221   : >>> { %v655_v29 = vld [vmem:[%s1887_s22] sm:$0x3]  ;;  %v664_v36 = vmul.f32 %v656_v30, %v648_v28  ;;  %v667_v42 = vmul.f32 %v656_v30, %v646_v27 }
 0x222   : >>> { %v653_v31 = vld [vmem:[%s1891_s15] sm:$0x3]  ;;  %v663_v35 = vmul.f32 %v655_v29, %v646_v27  ;;  %v666_v37 = vmul.f32 %v655_v29, %v648_v28 }
 0x223   : >>> { %v871_v32 = vld [vmem:[%s1885_s11] ss:$0 sm:$0xff]  ;;  %v1567_v34 = vld [vmem:[%s1885_s11 + $0x1] ss:$0 sm:$0xff]  ;;  %v657_v48 = vmul.f32 %v653_v31, %v646_v27  ;;  %v660_v49 = vmul.f32 %v653_v31, %v648_v28 }
 0x224   : >>> { %v1566_v33 = vld [vmem:[%s1885_s11 - $0x1] sm:$0x2]  ;;  %v1569_v40 = vld [vmem:[%s1893_s24 + $0x1] sm:$0x1]  ;;  %v665_v47 = vsub.f32 %v663_v35, %v664_v36  ;;  %v668_v53 = vadd.f32 %v667_v42, %v666_v37 }
 0x225   : >>> { %v878_v38 = vsel %vm801_vm14, %v871_v32, %v1566_v33  ;;  %v882_v39 = vld [vmem:[%s1893_s24] ss:$0 sm:$0xff]  ;;  %v890_v43 = vsel %vm813_vm15, %v1567_v34, %v1569_v40  ;;  %v1571_v45 = vld [vmem:[%s1895_s23 + $0x1] ss:$0 sm:$0xff] }
 0x226   : >>> { %v895_v41 = vld [vmem:[%s1895_s23] ss:$0 sm:$0xff]  ;;  %881 = vst [vmem:[%s1885_s11] sm:$0x3] %v878_v38  ;;  %892 = vst [vmem:[%s1893_s24] sm:$0x3] %v890_v43  ;;  %v1573_v51 = vld [vmem:[%s1899_s27 + $0x1] sm:$0x1] }
 0x227   : >>> { %v1570_v44 = vld [vmem:[%s1895_s23 - $0x1] sm:$0x2]  ;;  %1568 = vst [vmem:[%s1885_s11 + $0x1] sm:$0x1] %v882_v39  ;;  %v914_v54 = vsel %vm813_vm15, %v1571_v45, %v1573_v51  ;;  %671 = vst [vmem:[%s1887_s22] sm:$0x3] %v665_v47  ;;  %s688_s11 = smov [#allocation21] }
 0x228   : >>> { %v906_v46 = vld [vmem:[%s1899_s27] ss:$0 sm:$0xff]  ;;  %v902_v50 = vsel %vm801_vm14, %v895_v41, %v1570_v44  ;;  %672 = vst [vmem:[%s1889_s14] sm:$0x3] %v668_v53  ;;  %s1943_s22 = smov [#allocation22]  ;;  %s1688_s14 = smov 1  }
 0x229   : >>> { %v654_v52 = vld [vmem:[%s1901_s29] sm:$0x3]  ;;  %905 = vst [vmem:[%s1895_s23] sm:$0x3] %v902_v50  ;;  %916 = vst [vmem:[%s1899_s27] sm:$0x3] %v914_v54  ;;  %s730_s24 = smov [#allocation21]  ;;  %s1946_s27 = smov [#allocation23] }
 0x22a   : >>> { %v658_v55 = vmul.f32 %v654_v52, %v648_v28  ;;  %v661_v56 = vmul.f32 %v654_v52, %v646_v27  ;;  %1572 = vst [vmem:[%s1895_s23 + $0x1] sm:$0x1] %v906_v46  ;;  %s1689_s23 = smov 127  }
 0x22c   : >>> { %v659_v57 = vsub.f32 %v657_v48, %v658_v55  ;;  %v662_v58 = vadd.f32 %v661_v56, %v660_v49 }
 0x22e   : >>> { %669 = vst [vmem:[%s1891_s15] sm:$0x3] %v659_v57  ;;  %670 = vst [vmem:[%s1901_s29] sm:$0x3] %v662_v58  ;;  %v708_v60 = vld [vmem:[%s701_s30] sm:$0x3]  ;;  %s729_s15 = smov [#allocation20]  ;;  %s793_s29 = smov [#allocation20] }
 0x22f   : >>> { %v712_v61 = vsel %vm711_vm0, 0.0, %v708_v60  ;;  %v723_v62 = vld [vmem:[%s714_s21] sm:$0x3] }
 0x230   : >>> { %713 = vst [vmem:[%s701_s30] sm:$0x3] %v712_v61  ;;  %v727_v0 = vsel %vm726_vm1, %v722_v59, %v723_v62  ;;  %s794_s30 = smov [#allocation22] }
 0x231   : >>> { %728 = vst [vmem:[%s714_s21] sm:$0x3] %v727_v0  ;;  %s818_s21 = smov [#allocation23] }
 0x235   : >>> { %v682_v1 = vld [vmem:[%s673_s26] sm:$0x3] }
 0x236   : >>> { %v695_v2 = vld [vmem:[%s688_s11] sm:$0x3]  ;;  %v686_v3 = vsel %vm685_vm3, %v681_v63, %v682_v1 }
 0x237   : >>> { %v699_v4 = vsel %vm698_vm4, 0.0, %v695_v2  ;;  %687 = vst [vmem:[%s673_s26] sm:$0x3] %v686_v3  ;;  %v767_v5 = vld [vmem:[%s1943_s22] sm:$0x3]  ;;  %s382_s26 = smov (%p474_p9), [#allocation20] }
 0x238   : >>> { %700 = vst [vmem:[%s688_s11] sm:$0x3] %v699_v4  ;;  %768 = vrot.lane.b32.xlu0 %v767_v5, %s1688_s14  ;;  %v763_v11 = vld [vmem:[%s1946_s27] sm:$0x3]  ;;  %s401_s11 = smov (%p474_p9), [#allocation21] }
 0x239   : >>> { %v784_v12 = vld [vmem:[%s1946_s27] sm:$0x3] }
 0x23a   : >>> { %v766_v30 = vld [vmem:[%s1943_s22] sm:$0x3] }
 0x23e   : >>> { %v735_v8 = vld [vmem:[%s729_s15] sm:$0x3] }
 0x23f   : >>> { %736 = vrot.lane.b32.xlu1 %v735_v8, %s1688_s14  ;;  %v731_v9 = vld [vmem:[%s730_s24] sm:$0x3] }
 0x240   : >>> { %v752_v10 = vld [vmem:[%s730_s24] sm:$0x3] }
 0x241   : >>> { %v734_v18 = vld [vmem:[%s729_s15] sm:$0x3] }
 0x243   : >>> { %732 = vrot.lane.b32.xlu1 %v731_v9, %s1688_s14 }
 0x247   : >>> { %753 = vrot.lane.b32.xlu1 %v752_v10, %s1689_s23 }
 0x24b   : >>> { %764 = vrot.lane.b32.xlu1 %v763_v11, %s1688_s14  ;;  %s435_s14 = smov (%p474_p9), [#allocation23] }
 0x24f   : >>> { %785 = vrot.lane.b32.xlu1 %v784_v12, %s1689_s23 }
 0x2aa   : >>> { %v769_v20 = vpop.permute.xlu0 %768 }
 0x2ab   : >>> { %v773_v22 = vsel %vm740_vm5, %v767_v5, %v769_v20 }
 0x2b1   : >>> { %v737_v13 = vpop.permute.xlu1 %736 }
 0x2b2   : >>> { %v741_v14 = vsel %vm740_vm5, %v735_v8, %v737_v13 }
 0x2b5   : >>> { %v733_v15 = vpop.permute.xlu1 %732 }
 0x2b6   : >>> { %v745_v16 = vsel %vm744_vm6, %v733_v15, %v741_v14 }
 0x2b7   : >>> { %v751_v17 = vsel %vm1427_vm2, %v745_v16, 0.0 }
 0x2b8   : >>> { %759 = vst [vmem:[%s729_s15] sm:$0x3] %v751_v17 }
 0x2b9   : >>> { %v754_v19 = vpop.permute.xlu1 %753 }
 0x2ba   : >>> { %v758_v21 = vsel %vm744_vm6, %v734_v18, %v754_v19 }
 0x2bb   : >>> { %760 = vst [vmem:[%s730_s24] sm:$0x3] %v758_v21 }
 0x2bd   : >>> { %v765_v23 = vpop.permute.xlu1 %764 }
 0x2be   : >>> { %v777_v24 = vsel %vm744_vm6, %v765_v23, %v773_v22 }
 0x2bf   : >>> { %v795_v25 = vld [vmem:[%s793_s29] ss:$0 sm:$0xff]  ;;  %v1559_v27 = vld [vmem:[%s793_s29 + $0x1] ss:$0 sm:$0xff]  ;;  %v783_v29 = vsel %vm1427_vm2, %v777_v24, 0.0 }
 0x2c0   : >>> { %v1558_v26 = vld [vmem:[%s793_s29 - $0x1] sm:$0x2]  ;;  %791 = vst [vmem:[%s1943_s22] sm:$0x3] %v783_v29  ;;  %s418_s22 = smov (%p474_p9), [#allocation22] }
 0x2c1   : >>> { %v802_v28 = vsel %vm801_vm14, %v795_v25, %v1558_v26  ;;  %v786_v31 = vpop.permute.xlu1 %785 }
 0x2c2   : >>> { %805 = vst [vmem:[%s793_s29] sm:$0x3] %v802_v28  ;;  %v819_v32 = vld [vmem:[%s817_s16] ss:$0 sm:$0xff]  ;;  %v1563_v34 = vld [vmem:[%s817_s16 + $0x1] ss:$0 sm:$0xff]  ;;  %v790_v35 = vsel %vm744_vm6, %v766_v30, %v786_v31 }
 0x2c3   : >>> { %v1562_v33 = vld [vmem:[%s817_s16 - $0x1] sm:$0x2]  ;;  %792 = vst [vmem:[%s1946_s27] sm:$0x3] %v790_v35 }
 0x2c4   : >>> { %v826_v36 = vsel %vm801_vm14, %v819_v32, %v1562_v33 }
 0x2c5   : >>> { %829 = vst [vmem:[%s817_s16] sm:$0x3] %v826_v36 }
 0x2c7   : >>> { %v806_v37 = vld [vmem:[%s794_s30] ss:$0 sm:$0xff]  ;;  %v1561_v38 = vld [vmem:[%s794_s30 + $0x1] sm:$0x1] }
 0x2c8   : >>> { %1560 = vst [vmem:[%s793_s29 + $0x1] sm:$0x1] %v806_v37  ;;  %v814_v39 = vsel %vm813_vm15, %v1559_v27, %v1561_v38 }
 0x2c9   : >>> { %816 = vst [vmem:[%s794_s30] sm:$0x3] %v814_v39 }
 0x2ca   : >>> { %v830_v40 = vld [vmem:[%s818_s21] ss:$0 sm:$0xff]  ;;  %v1565_v41 = vld [vmem:[%s818_s21 + $0x1] sm:$0x1] }
 0x2cb   : >>> { %1564 = vst [vmem:[%s817_s16 + $0x1] sm:$0x1] %v830_v40  ;;  %v838_v42 = vsel %vm813_vm15, %v1563_v34, %v1565_v41 }
 0x2cc   : >>> { %840 = vst [vmem:[%s818_s21] sm:$0x3] %v838_v42  ;;  %476 = sbr.rel (!%p474_p9) target bundleno = 272 (0x110), region = 462 }
 0x2cf   : >> { %v388_v43 = vld [vmem:[%s382_s26] sm:$0x3] (%p474_p9) }
 0x2d0   : >> { %v389_v45 = vsel (%p474_p9), %vm1427_vm2, %v388_v43, 0.0  ;;  %v424_v47 = vld [vmem:[%s418_s22] sm:$0x3] (%p474_p9) }
 0x2d1   : >> { %v390_v49 = vmul.f32 %v389_v45, %v389_v45  ;;  %v425_v51 = vsel %vm1427_vm2, %v424_v47, 0.0 }
 0x2d2   : >> { %v407_v44 = vld [vmem:[%s401_s11] sm:$0x3]  ;;  %v426_v53 = vmul.f32 %v425_v51, %v425_v51 }
 0x2d3   : >> { %v408_v46 = vsel %vm1427_vm2, %v407_v44, 0.0  ;;  %v441_v48 = vld [vmem:[%s435_s14] sm:$0x3]  ;;  %v394_v56 = vsel %vm393_vm7, 0.0, %v390_v49 }
 0x2d4   : >> { %v409_v50 = vmul.f32 %v408_v46, %v408_v46  ;;  %v442_v52 = vsel %vm1427_vm2, %v441_v48, 0.0 }
 0x2d5   : >> { %v443_v55 = vmul.f32 %v442_v52, %v442_v52 }
 0x2d6   : >> { %v411_v54 = vadd.f32 %v409_v50, %v390_v49  ;;  %v410_v57 = vadd.f32 %v409_v50, %v394_v56 }
 0x2d7   : >> { %v447_v60 = vsel %vm446_vm8, 0.0, %v443_v55 }
 0x2d8   : >> { %v428_v58 = vadd.f32 %v426_v53, %v411_v54  ;;  %v427_v59 = vadd.f32 %v426_v53, %v410_v57 }
 0x2da   : >> { %v449_v61 = vadd.f32 %v443_v55, %v428_v58  ;;  %v448_v62 = vadd.f32 %v447_v60, %v427_v59 }
 0x2dc   : >> { %450 = vadd.xlane.f32.xlu0 %v449_v61 }
 0x2e0   : >> { %458 = vadd.xlane.f32.xlu0 %v448_v62 }
 0x365   : >> { %v451_v63 = vpop.xlane.xlu0 %450 }
 0x366   : >> { %v452_v0 = vrot.slane %v451_v63, 4 }
 0x368   : >> { %v453_v1 = vadd.f32 %v452_v0, %v451_v63 }
 0x369   : >> { %v459_v2 = vpop.xlane.xlu0 %458 }
 0x36a   : >> { %v454_v3 = vrot.slane %v453_v1, 2  ;;  %v460_v4 = vrot.slane %v459_v2, 4 }
 0x36c   : >> { %v461_v5 = vadd.f32 %v460_v4, %v459_v2  ;;  %v455_v8 = vadd.f32 %v454_v3, %v453_v1 }
 0x36e   : >> { %v462_v9 = vrot.slane %v461_v5, 2  ;;  %v456_v11 = vrot.slane %v455_v8, 1 }
 0x370   : >> { %v463_v10 = vadd.f32 %v462_v9, %v461_v5  ;;  %v457_v14 = vadd.f32 %v456_v11, %v455_v8 }
 0x372   : >> { %v464_v12 = vrot.slane %v463_v10, 1 }
 0x374   : >> { %v465_v13 = vadd.f32 %v464_v12, %v463_v10 }
 0x376   : >> { %1592 = vpush %v465_v13 }
 0x377   : >> { %1594 = vpush %v457_v14 }
 0x3a7   : >> { %s1593_s20 = spop %1592 }
 0x3a8   : >> { %s1595_s15 = spop %1594 }
 0x3a9   : >> { %s468_s24 = smul.f32 1e-10, %s1595_s15 }
 0x3ab   : >> { %p469_p11 = scmp.le.f32.partialorder %s1593_s20, %s468_s24 }
 0x3ad   : >> { %p471_p12 = por %p470_p10, %p469_p11 }
 0x3af   : > { %919 = sbr.rel (!%p471_p12) target bundleno = 271 (0x10f), region = 473 }
 0x3b4 PF: > { %s924_s23 = smov [#allocation20]  ;;  %v928_v6 = vmov %v1797_v6  ;;  %v931_v7 = vmov %v1799_v7  ;;  %v984_v15 = vld [vmem:[#allocation12] sm:$0x3]  ;;  %v992_v16 = vld [vmem:[#allocation14] sm:$0x3]  ;;  %s2079_s17 = scalar_lea.vmem [#allocation13], %s1793_s28 }
 0x3b5   : > { %v948_v6 = vmov %v1797_v6  ;;  %v951_v7 = vmov %v1799_v7  ;;  %v932_v17 = vld [vmem:[%s924_s23] sm:$0x3]  ;;  %vm935_vm9 = vcmp.eq.s32.totalorder %v931_v7, %v928_v6  ;;  %987 = vst [vmem:[%s2079_s17] sm:$0x3] %v984_v15  ;;  %s2080_s27 = scalar_lea.vmem [#allocation15], %s1793_s28  ;;  %s944_s29 = smov [#allocation23] }
 0x3b6   : > { %vm955_vm10 = vcmp.eq.s32.totalorder %v951_v7, %v948_v6  ;;  %995 = vst [vmem:[%s2080_s27] sm:$0x3] %v992_v16  ;;  %v1000_v18 = vld [vmem:[#allocation16] sm:$0x3]  ;;  %v936_v19 = vsel %vm935_vm9, %v932_v17, 0.0  ;;  %s2081_s16 = scalar_lea.vmem [#allocation17], %s1793_s28  ;;  %s2082_s30 = scalar_lea.vmem [#allocation19], %s1793_s28 }
 0x3b7   : > { %1003 = vst [vmem:[%s2081_s16] sm:$0x3] %v1000_v18  ;;  %v1008_v20 = vld [vmem:[#allocation18] sm:$0x3]  ;;  %v937_v21 = vrot.slane %v936_v19, 4  ;;  %v952_v22 = vld [vmem:[%s944_s29] sm:$0x3] }
 0x3b8   : > { %1011 = vst [vmem:[%s2082_s30] sm:$0x3] %v1008_v20  ;;  %v956_v23 = vsel %vm955_vm10, %v952_v22, 0.0  ;;  %s920_s21 = sand.u32 7, %s1756_s12   ;;  %s2083_s11 = scalar_lea.vmem [#allocation9], %s1795_s18 }
 0x3b9   : > { %v938_v24 = vadd.f32 %v937_v21, %v936_v19  ;;  %v957_v25 = vrot.slane %v956_v23, 4  ;;  %s921_s25 = scalar_lea.vmem [#allocation8], %s920_s21  ;;  %s923_s26 = scalar_lea.vmem [#allocation10], %s920_s21 }
 0x3ba   : > { %s925_s25 = smov %s921_s25  ;;  %s945_s26 = smov %s923_s26 }
 0x3bb   : > { %v939_v26 = vrot.slane %v938_v24, 2  ;;  %v958_v6 = vadd.f32 %v957_v25, %v956_v23  ;;  %s2084_s22 = scalar_lea.vmem [#allocation11], %s1795_s18  ;;  %s1039_s14 = sshrl.u32 (%p1770_p3), %s1756_s12, 3 }
 0x3bc   : > { %s2085_s20 = scalar_lea.vmem (%p1770_p3), [#allocation9], %s1795_s18  ;;  %s1580_s15 = sshll.u32 (%p1770_p3), %s1039_s14, 1 }
 0x3bd   : > { %v940_v7 = vadd.f32 %v939_v26, %v938_v24  ;;  %v959_v27 = vrot.slane %v958_v6, 2  ;;  %s1041_s17 = scalar_lea.vmem (%p1770_p3), %s2070_s4, %s1580_s15 }
 0x3bf   : > { %v941_v28 = vrot.slane %v940_v7, 1  ;;  %v960_v29 = vadd.f32 %v959_v27, %v958_v6 }
 0x3c1   : > { %v942_v30 = vadd.f32 %v941_v28, %v940_v7  ;;  %v961_v31 = vrot.slane %v960_v29, 1 }
 0x3c3   : > { %943 = vst [vmem:[%s925_s25] sm:$0x1] %v942_v30  ;;  %v962_v32 = vadd.f32 %v961_v31, %v960_v29 }
 0x3c5   : > { %963 = vst [vmem:[%s945_s26] sm:$0x1] %v962_v32 }
 0x3c9   : > { %1038 = sbr.rel (!%p1770_p3) target bundleno = 980 (0x3d4), region = 158 }
 0x3ca   : > { %v968_v33 = vld [vmem:[#allocation8] sm:$0x3] }
 0x3cb   : > { %971 = vst [vmem:[%s2083_s11] sm:$0x3] %v968_v33 }
 0x3cc   : > { %v976_v34 = vld [vmem:[#allocation10] sm:$0x3] }
 0x3cd   : > { %979 = vst [vmem:[%s2084_s22] sm:$0x3] %v976_v34 }
 0x3d2   : > { %v1058_v35 = vld [vmem:[%s2085_s20] sm:$0x3] }
 0x3d3   : > { %1059 = vst [vmem:[%s1041_s17] sm:$0x3] %v1058_v35 }
 0x3d4 PF: > { %1077 = sbr.rel (!%p1770_p3) target bundleno = 988 (0x3dc), region = 192  ;;  %s1078_s27 = sshrl.u32 (%p1770_p3), %s1756_s12, 3 }
 0x3d5   : > { %s2086_s29 = scalar_lea.vmem (%p1770_p3), [#allocation11], %s1795_s18  ;;  %s1581_s16 = sshll.u32 (%p1770_p3), %s1078_s27, 1 }
 0x3d6   : > { %s1080_s25 = scalar_lea.vmem (%p1770_p3), %s2071_s5, %s1581_s16 }
 0x3da   : > { %v1097_v36 = vld [vmem:[%s2086_s29] sm:$0x3] }
 0x3db   : > { %1098 = vst [vmem:[%s1080_s25] sm:$0x3] %v1097_v36 }
 0x3dc PF: > { %s1582_s26 = sshll.u32 %s1756_s12, 1  ;;  %s2087_s19 = scalar_lea.vmem [#allocation13], %s1793_s28 }
 0x3dd   : > { %v1132_v37 = vld [vmem:[%s2087_s19] sm:$0x3]  ;;  %s2088_s11 = scalar_lea.vmem [#allocation15], %s1793_s28  ;;  %s1115_s14 = scalar_lea.vmem %s2072_s6, %s1582_s26 }
 0x3de   : > { %v1167_v38 = vld [vmem:[%s2088_s11] sm:$0x3]  ;;  %s1150_s24 = scalar_lea.vmem %s2073_s7, %s1582_s26  ;;  %s2089_s23 = scalar_lea.vmem [#allocation17], %s1793_s28  ;;  %1133 = vst [vmem:[%s1115_s14] sm:$0x3] %v1132_v37 }
 0x3df   : > { %v1202_v39 = vld [vmem:[%s2089_s23] sm:$0x3]  ;;  %s2090_s17 = scalar_lea.vmem [#allocation19], %s1793_s28  ;;  %1168 = vst [vmem:[%s1150_s24] sm:$0x3] %v1167_v38  ;;  %s1185_s29 = scalar_lea.vmem %s2074_s8, %s1582_s26 }
 0x3e0   : > { %v1237_v40 = vld [vmem:[%s2090_s17] sm:$0x3]  ;;  %s1220_s21 = scalar_lea.vmem %s2075_s9, %s1582_s26  ;;  %1203 = vst [vmem:[%s1185_s29] sm:$0x3] %v1202_v39 }
 0x3e1   : > { %1238 = vst [vmem:[%s1220_s21] sm:$0x3] %v1237_v40 }
 0x3e2 PF: > { %s2091_s25 = sld [smem:[#allocation33_spill]]  ;;  %p13_p13 = scmp.ge.s32.totalorder %s1759_s13, 4  }
 0x3e3   : > { %s2092_s30 = smov %s1673_s10  ;;  %s2094_s11 = smov %s1759_s13 }
 0x3e4   :  { %15 = sbr.rel (!%p13_p13) target bundleno = 2 (0x2), region = 484 }
 0x3e8   : > { %s2093_s10 = smov %s2091_s25 }

// kernel: reverse
= control target key start
LH: loop header
LB: loop body
LE: loop exit
PB: predicated region body
PF: predicated region fallthrough
CT: control target
= control target key end

     0   :  { %v2_v0 = vlaneseq  ;;  %s112_s0 = inlined_call_operand.vmem [shape: f32[2,3], index: 0, kind: input, shape index: {}]   ;;  %s113_s1 = inlined_call_operand.vmem [shape: f32[2,3], index: 1, kind: output, shape index: {}]  }
   0x2   :  { %v3_v1 = vsub.s32 2, %v2_v0 }
   0x4   :  { %4 = vset.pattern.permute.xlu0 %v3_v1 }
   0x5   :  { %v21_v2 = vld [vmem:[%s112_s0] sm:$0x3] }
   0x6   :  { %22 = vst [vmem:[#allocation1] sm:$0x3] %v21_v2 }
   0xd   :  { %v41_v3 = vld [vmem:[#allocation1] sm:$0x3] }
   0xe   :  { %42 = vst [vmem:[#allocation0] sm:$0x3] %v41_v3 }
  0x15   :  { %v43_v4 = vld [vmem:[#allocation0] sm:$0xff] }
  0x16   :  { %44 = vperm.xlu0 %4, %v43_v4  }
  0x91   :  { %v45_v5 = vpop.permute.xlu0 %44 }
  0x92   :  { %46 = vst [vmem:[#allocation2] sm:$0xff] %v45_v5 }
  0x99   :  { %v51_v6 = vld [vmem:[#allocation2] sm:$0x3] }
  0x9a   :  { %54 = vst [vmem:[#allocation3] sm:$0x3] %v51_v6 }
  0xa1   :  { %v71_v7 = vld [vmem:[#allocation3] sm:$0x3] }
  0xa2   :  { %72 = vst [vmem:[%s113_s1] sm:$0x3] %v71_v7 }

// kernel: custom-call.16
= control target key start
LH: loop header
LB: loop body
LE: loop exit
PB: predicated region body
PF: predicated region fallthrough
CT: control target
= control target key end

     0   :  { %s664_s9 = smov 0   ;;  %s666_s10 = smov 0   ;;  %s810_s0 = inlined_call_operand.vmem [shape: f32[2,3,3], index: 0, kind: input, shape index: {}]   ;;  %s811_s1 = inlined_call_operand.vmem [shape: f32[2,3,3], index: 1, kind: output, shape index: {0}]   ;;  %s812_s2 = inlined_call_operand.vmem [shape: f32[2,3], index: 2, kind: output, shape index: {1}]  }
   0x1   :  { %s668_s11 = smov 0   ;;  %s670_s12 = smov 0  }
   0x2   :  { %s672_s13 = smov 0  }
   0x3 LB: > { %s28_s14 = sadd.s32 1, %s637_s12  ;;  %s519_s15 = sadd.s32 4294967295, %s641_s13   ;;  %s641_s13 = sphi %s672_s13, %s9_s13   ;;  %s637_s12 = sphi %s670_s12, %s819_s12   ;;  %s633_s11 = sphi %s668_s11, %s818_s11   ;;  %s629_s10 = sphi %s666_s10, %s817_s10   ;;  %s625_s9 = sphi %s664_s9, %s816_s9  }
   0x4   : > { %p30_p0 = scmp.ge.s32.totalorder %s28_s14, 2  ;;  %s33_s16 = ssub.s32 0, %s637_s12 }
   0x5   : > { %s521_s17 = smin.u32 %s637_s12, %s33_s16  ;;  %p57_p1 = scmp.ne.s32.totalorder %s629_s10, %s625_s9 }
   0x6   : > { %s821_s14 = smov (%p30_p0, %s28_s14), 0  ;;  %s35_s18 = sshrl.u32 %s521_s17, 3 }
   0x7   : > { %s39_s19 = ssub.s32 0, %s821_s14  ;;  %p58_p2 = scmp.eq.s32.totalorder %s519_s15, 1 }
   0x8   : > { %s522_s20 = smin.u32 %s39_s19, %s821_s14  ;;  %s47_s24 = sadd.s32 1, %s629_s10 }
   0x9   : > { %s41_s21 = sshrl.u32 %s522_s20, 3  ;;  %p699_p3 = por %p58_p2, %p57_p1 }
   0xa   : > { %s44_s23 = ssub.s32 %s35_s18, %s41_s21  ;;  %p524_p5 = scmp.ge.s32.totalorder %s641_s13, 2 }
   0xb   : > { %p45_p4 = scmp.eq.s32.totalorder %s44_s23, 0  ;;  %s82_s26 = sand.u32 (!%p524_p5), 1, %s641_s13  }
   0xc   : > { %80 = sbr.rel (%p524_p5) target bundleno = 19 (0x13), region = 16  ;;  %s526_s27 = sshll.u32 (!%p524_p5), %s637_s12, 2 }
   0xd   : > { %s705_s25 = scalar_select %p45_p4, %s629_s10, %s47_s24  }
   0xe   : > { %s525_s28 = sshll.u32 (!%p524_p5), %s82_s26, 2  ;;  %s88_s3 = scalar_lea.vmem (!%p524_p5), %s810_s0, %s526_s27 }
   0xf   : > { %s84_s4 = scalar_lea.vmem (!%p524_p5), [#allocation1], %s525_s28 }
  0x11   : > { %v105_v0 = vld [vmem:[%s88_s3] sm:$0xf] }
  0x12   : > { %106 = vst [vmem:[%s84_s4] sm:$0xf] %v105_v0 }
  0x13 PF: > { %p527_p6 = scmp.ge.s32.totalorder %s641_s13, 1  ;;  %p123_p7 = scmp.lt.s32.totalorder %s641_s13, 3 }
  0x15   : > { %p124_p8 = pnand %p527_p6, %p123_p7 }
  0x17   : > { %127 = sbr.rel (%p124_p8) target bundleno = 352 (0x160), region = 50 }
  0x1c   : > { %s134_s5 = sand.u32 1, %s519_s15   ;;  %s144_s6 = sand.u32 1, %s625_s9   ;;  %v647_v2 = vmov 0.0  }
  0x1d   : > { %s528_s7 = sshll.u32 %s134_s5, 2  ;;  %s716_s8 = sshll.u32 %s144_s6, 1 }
  0x1e   : > { %s136_s16 = scalar_lea.vmem [#allocation1], %s528_s7  ;;  %s158_s17 = sand.u32 7, %s633_s11  }
  0x1f   : > { %v150_v1 = vld [vmem:[%s136_s16] sm:$0xf]  ;;  %s719_s18 = scalar_lea.vmem [#allocation4], %s158_s17  ;;  %s722_s19 = scalar_lea.vmem [#allocation3], %s528_s7 }
  0x20   : > { %151 = vst [vmem:[#allocation0] sm:$0xf] %v150_v1  ;;  %162 = vst [vmem:[%s719_s18] sm:$0x1] %v647_v2  ;;  %s146_s15 = scalar_lea.vmem [#allocation5], %s716_s8  ;;  %s725_s20 = smov 0  }
  0x27   : > { %v160_v3 = vld [vmem:[#allocation0] sm:$0xff] }
  0x28   : > { %161 = vst [vmem:[#allocation2] sm:$0xff] %v160_v3 }
  0x29 LB: >> { %v170_v4 = vlaneseq  ;;  %v734_v6 = vstv %s645_s20  ;;  %s197_s9 = scalar_lea.vmem [#allocation2], %s645_s20  ;;  %s233_s21 = smov [#allocation2]  ;;  %v648_v60 = vmov 1.0   ;;  %v268_v61 = vld [vmem:[%s719_s18] ss:$0 sm:$0xff]  ;;  %s645_s20 = sphi %s725_s20, %s168_s20  }
  0x2a   : >> { %s255_s23 = scalar_lea.vmem [#allocation6], %s645_s20  ;;  %s271_s24 = smov [#allocation2] }
  0x2b   : >> { %v731_v5 = vshrl.u32 %v170_v4, 7  ;;  %v249_v49 = vand.u32 127, %v170_v4  ;;  %s272_s26 = smov [#allocation6] }
  0x2d   : >> { %vm174_vm0 = vcmp.gt.s32.totalorder %v731_v5, %v734_v6  ;;  %vm175_vm1 = vcmp.lt.s32.totalorder %v731_v5, 3  ;;  %v236_v5 = vmov %v731_v5  ;;  %vm749_vm12 = vcmp.eq.s32.totalorder %v249_v49, %v734_v6 }
  0x2e   : >> { %vm176_vm2 = vmand %vm174_vm0, %vm175_vm1  ;;  %vm240_vm9 = vcmp.gt.s32.totalorder %v236_v5, %v734_v6  ;;  %vm241_vm10 = vcmp.lt.s32.totalorder %v236_v5, 3  ;;  %v275_v5 = vmov %v731_v5  ;;  %vm301_vm15 = vcmp.gt.s32.totalorder %v249_v49, %v734_v6 }
  0x2f   : >> { %v169_v7 = vld [vmem:[#allocation2] sm:$0xff]  ;;  %v198_v16 = vld [vmem:[%s197_s9] ss:$0 sm:$0xff]  ;;  %vm242_vm11 = vmand %vm240_vm9, %vm241_vm10  ;;  %vm280_vm13 = vcmp.lt.s32.totalorder %v275_v5, 3  ;;  %v292_v5 = vmov %v731_v5 }
  0x30   : >> { %v177_v8 = vsel %vm176_vm2, %v169_v7, 0.0  ;;  %v199_v17 = vand.u32 2147483647, %v198_v16  ;;  %vm224_vm8 = vcmp.lt.f32.partialorder %v198_v16, 0.0  ;;  %v237_v46 = vld [vmem:[%s233_s21] sm:$0xff]  ;;  %vm309_vm14 = vcmp.ge.s32.totalorder %v292_v5, %v734_v6 }
  0x31   : >> { %v178_v9 = vmul.f32 %v177_v8, %v177_v8  ;;  %v243_v50 = vsel %vm242_vm11, %v237_v46, 0.0  ;;  %v278_v0 = vld [vmem:[%s271_s24] sm:$0xff]  ;;  %s288_s24 = smov %s271_s24  ;;  %vm310_vm0 = vmand %vm749_vm12, %vm309_vm14 }
  0x32   : >> { %v200_v22 = vmax.f32 %v199_v17, 0.0  ;;  %s313_s27 = scalar_lea.vmem %s288_s24, %s645_s20  ;;  %s168_s20 = sadd.s32 1, %s645_s20  }
  0x33   : >> { %v179_v10 = vrot.slane %v178_v9, 4  ;;  %p165_p9 = scmp.ge.s32.totalorder %s168_s20, 3  }
  0x34   : > { %s534_s28 = sshll.u32 (%p165_p9), %s633_s11, 2 }
  0x35   : >> { %v180_v11 = vadd.f32 %v179_v10, %v178_v9  ;;  %s348_s3 = scalar_lea.vmem (%p165_p9), %s811_s1, %s534_s28 }
  0x37   : >> { %v181_v12 = vrot.slane %v180_v11, 2 }
  0x39   : >> { %v182_v13 = vadd.f32 %v181_v12, %v180_v11 }
  0x3b   : >> { %v183_v14 = vrot.slane %v182_v13, 1 }
  0x3d   : >> { %v184_v15 = vadd.f32 %v183_v14, %v182_v13  ;;  %v299_v14 = vld [vmem:[%s288_s24] sm:$0xff] }
  0x3f   : >> { %589 = vrsqrt.f32 %v184_v15  ;;  %vm187_vm3 = vcmp.eq.f32.partialorder %v184_v15, inf  ;;  %v190_v19 = vand.u32 2147483648, %v184_v15  ;;  %vm189_vm4 = vcmp.eq.f32.partialorder %v184_v15, 0.0 }
  0x4c   : >> { %v590_v18 = vpop.eup %589 }
  0x4d   : >> { %v186_v20 = vmul.f32 %v590_v18, %v184_v15 }
  0x4f   : >> { %v188_v21 = vsel %vm187_vm3, %v184_v15, %v186_v20 }
  0x50   : >> { %v191_v23 = vsel %vm189_vm4, %v190_v19, %v188_v21 }
  0x51   : >> { %v201_v24 = vand.u32 2147483647, %v191_v23 }
  0x53   : >> { %v202_v25 = vmax.f32 %v200_v22, %v201_v24 }
  0x55   : >> { %591 = vrcp.f32 %v202_v25  ;;  %vm214_vm7 = vcmp.eq.f32.partialorder %v202_v25, 0.0 }
  0x62   : >> { %v592_v26 = vpop.eup %591 }
  0x63   : >> { %v204_v27 = vmul.f32 %v592_v26, %v199_v17  ;;  %v207_v28 = vmul.f32 0.0, %v592_v26  ;;  %v211_v29 = vmul.f32 %v592_v26, %v201_v24 }
  0x65   : >> { %v205_v30 = vmul.f32 %v204_v27, %v204_v27  ;;  %v208_v31 = vmul.f32 %v207_v28, %v207_v28  ;;  %v212_v32 = vmul.f32 %v211_v29, %v211_v29 }
  0x67   : >> { %v209_v33 = vadd.f32 %v208_v31, %v205_v30 }
  0x69   : >> { %v213_v34 = vadd.f32 %v212_v32, %v209_v33 }
  0x6b   : >> { %593 = vrsqrt.f32 %v213_v34  ;;  %vm217_vm5 = vcmp.eq.f32.partialorder %v213_v34, inf  ;;  %v220_v36 = vand.u32 2147483648, %v213_v34  ;;  %vm219_vm6 = vcmp.eq.f32.partialorder %v213_v34, 0.0 }
  0x78   : >> { %v594_v35 = vpop.eup %593 }
  0x79   : >> { %v216_v37 = vmul.f32 %v594_v35, %v213_v34 }
  0x7b   : >> { %v218_v38 = vsel %vm217_vm5, %v213_v34, %v216_v37 }
  0x7c   : >> { %v221_v39 = vsel %vm219_vm6, %v220_v36, %v218_v38 }
  0x7d   : >> { %v222_v40 = vmul.f32 %v221_v39, %v202_v25 }
  0x7f   : >> { %v223_v41 = vsel %vm214_vm7, 0.0, %v222_v40 }
  0x80   : >> { %v225_v42 = vxor.u32 2147483648, %v223_v41 }
  0x82   : >> { %v226_v43 = vsel %vm224_vm8, %v223_v41, %v225_v42 }
  0x83   : >> { %v742_v44 = vsel %vm189_vm4, %v198_v16, %v226_v43  ;;  %595 = vrcp.f32 %v226_v43  ;;  %v227_v47 = vsub.f32 %v226_v43, %v198_v16 }
  0x84   : >> { %v232_v45 = vsub.f32 %v198_v16, %v742_v44 }
  0x86   : >> { %597 = vrcp.f32 %v232_v45 }
  0x90   : >> { %v596_v48 = vpop.eup %595 }
  0x91   : >> { %v229_v51 = vmul.f32 %v596_v48, %v227_v47 }
  0x93   : >> { %v598_v52 = vpop.eup %597  ;;  %v231_v56 = vsel %vm189_vm4, 0.0, %v229_v51 }
  0x94   : >> { %v245_v53 = vmul.f32 %v598_v52, %v243_v50  ;;  %v261_v58 = vsel %vm749_vm12, %v231_v56, 0.0 }
  0x96   : >> { %v246_v55 = vsel %vm189_vm4, 0.0, %v245_v53 }
  0x97   : >> { %v251_v57 = vsel %vm749_vm12, %v246_v55, 0.0 }
  0x98   : >> { %252 = vadd.xlane.f32.xlu0 %v251_v57 }
  0x9c   : >> { %262 = vadd.xlane.f32.xlu0 %v261_v58 }
 0x121   : >> { %v253_v59 = vpop.xlane.xlu0 %252 }
 0x122   : >> { %254 = vst [vmem:[#allocation6] sm:$0xff] %v253_v59 }
 0x123   : >> { %256 = vst [vmem:[%s255_s23] sm:$0x1] %v648_v60 }
 0x125   : >> { %v263_v62 = vpop.xlane.xlu0 %262 }
 0x126   : >> { %v269_v63 = vsel %vm749_vm12, %v263_v62, %v268_v61 }
 0x127   : >> { %270 = vst [vmem:[%s719_s18] sm:$0x1] %v269_v63 }
 0x12a   : >> { %v277_v1 = vld [vmem:[%s272_s26] sm:$0xff]  ;;  %s289_s26 = smov %s272_s26 }
 0x12b   : >> { %v279_v2 = vmul.f32 %v278_v0, %v277_v1  ;;  %v297_v13 = vld [vmem:[%s289_s26] sm:$0xff] }
 0x12d   : >> { %v281_v3 = vsel %vm280_vm13, %v279_v2, 0.0 }
 0x12e   : >> { %v282_v4 = vrot.slane %v281_v3, 4  ;;  %v333_v6 = vld [vmem:[#allocation4] sm:$0x3] (%p165_p9) }
 0x12f   : > { %336 = vst [vmem:[%s146_s15] sm:$0x3] (%p165_p9), %v333_v6 }
 0x130   : >> { %v283_v7 = vadd.f32 %v282_v4, %v281_v3 }
 0x132   : >> { %v284_v8 = vrot.slane %v283_v7, 2 }
 0x134   : >> { %v285_v9 = vadd.f32 %v284_v8, %v283_v7 }
 0x136   : >> { %v286_v10 = vrot.slane %v285_v9, 1 }
 0x138   : >> { %v287_v11 = vadd.f32 %v286_v10, %v285_v9 }
 0x13a   : >> { %v293_v12 = vmul.f32 %v287_v11, %v263_v62 }
 0x13c   : >> { %v298_v15 = vmul.f32 %v297_v13, %v293_v12 }
 0x13e   : >> { %v302_v16 = vsub.f32 %v299_v14, %v298_v15 }
 0x140   : >> { %v303_v17 = vsel %vm301_vm15, %v302_v16, %v299_v14 }
 0x141   : >> { %v311_v18 = vsel %vm310_vm0, %v297_v13, %v303_v17 }
 0x142   : >> { %312 = vst [vmem:[%s288_s24] sm:$0xff] %v311_v18 }
 0x147   : > { %167 = sbr.rel (!%p165_p9) target bundleno = 41 (0x29), region = 167 }
 0x149   : >> { %v314_v19 = vld [vmem:[%s313_s27] ss:$0 sm:$0xff] }
 0x14a   : >> { %v319_v20 = vsel %vm749_vm12, %v742_v44, %v314_v19 }
 0x14b   : >> { %320 = vst [vmem:[%s313_s27] sm:$0x1] %v319_v20 }
 0x14c   : > { %p385_p10 = scmp.lt.s32.totalorder (%p699_p3), %s633_s11, 0  ;;  %s386_s4 = ssub.s32 (%p699_p3), 0, %s633_s11  ;;  %v409_v22 = vld [vmem:[%s146_s15] sm:$0x3] (%p699_p3) }
 0x14d   : > { %s535_s5 = smin.u32 (%p699_p3), %s633_s11, %s386_s4 }
 0x14e   : > { %s388_s6 = sshrl.u32 (%p699_p3), %s535_s5, 3 }
 0x14f   : > { %s389_s7 = ssub.s32 (%p699_p3), 0, %s388_s6 }
 0x152   : > { %v325_v5 = vld [vmem:[#allocation2] sm:$0xf] }
 0x153   : > { %328 = vst [vmem:[%s722_s19] sm:$0xf] %v325_v5 }
 0x157   : > { %384 = sbr.rel (!%p699_p3) target bundleno = 352 (0x160), region = 91 }
 0x15a   : > { %v365_v21 = vld [vmem:[%s722_s19] sm:$0xf] }
 0x15b   : > { %366 = vst [vmem:[%s348_s3] sm:$0xf] %v365_v21 }
 0x15c   : > { %s823_s7 = smov (!%p385_p10, %s389_s7), %s388_s6 }
 0x15d   : > { %s536_s16 = sshll.u32 %s823_s7, 1 }
 0x15e   : > { %s392_s19 = scalar_lea.vmem %s812_s2, %s536_s16 }
 0x15f   : > { %410 = vst [vmem:[%s392_s19] sm:$0x3] %v409_v22 }
 0x160 PF: > { %s9_s13 = sadd.s32 1, %s641_s13   ;;  %s816_s9 = smov %s629_s10 }
 0x161   : > { %p6_p11 = scmp.ge.s32.totalorder %s9_s13, 4   ;;  %s817_s10 = smov %s705_s25 }
 0x162   : > { %s818_s11 = smov %s637_s12  ;;  %s819_s12 = smov %s821_s14 }
 0x163   :  { %8 = sbr.rel (!%p6_p11) target bundleno = 3 (0x3), region = 178 }

</bundles_post_ra>
